<compile_context>
chip_gen: v6e
topology: v6e:2x2x1
jax: 0.10.0
libtpu: 0.0.40
codegen_flags: <defaults>
</compile_context>

<pallas_src>
import functools
from math import sqrt

import jax
import jax.numpy as jnp
from jax.experimental import pallas as pl
from jax.experimental.pallas import tpu as pltpu

_COMPILER_PARAMS_1D = pltpu.CompilerParams(
    dimension_semantics=("parallel",),
    vmem_limit_bytes=32 * 1024 * 1024,
)


# ----------------------------------------------------------------------------
# Pallas kernels
# ----------------------------------------------------------------------------
def _pw_relu_kernel(x_ref, w_ref, b_ref, o_ref):
    # conv1: y = relu(x @ w + b); BN scale already folded into w, bias is b.
    y = jnp.dot(x_ref[...], w_ref[...], preferred_element_type=jnp.float32)
    y = jnp.maximum(y + b_ref[...], 0.0)
    o_ref[...] = y.astype(o_ref.dtype)


def _conv2_se_kernel(stride, Ho, Wo, groups, gw, has_se,
                     x_ref, w_ref, b_ref, *rest):
    # Fused: 3x3 grouped conv (stride, pad=1) + folded-BN bias + ReLU + SE gate.
    # x_ref: (1, s*s, Hq, Wq, C) phase-decomposed padded input (one batch elem)
    # w_ref: (9, groups, gw, gw) per-tap per-group weights (BN scale folded in)
    if has_se:
        wse1_ref, bse1_ref, wse2_ref, bse2_ref, o_ref = rest
    else:
        (o_ref,) = rest

    M = Ho * Wo
    C = groups * gw
    xb = x_ref[0].astype(jnp.float32)          # (s*s, Hq, Wq, C)

    accs = [jnp.zeros((M, gw), jnp.float32) for _ in range(groups)]
    for ky in range(3):
        for kx in range(3):
            t = ky * 3 + kx
            p = (ky % stride) * stride + (kx % stride)   # phase index
            dy, dx = ky // stride, kx // stride          # offset inside phase
            tap = xb[p, dy:dy + Ho, dx:dx + Wo, :].reshape(M, C)
            for g in range(groups):
                accs[g] = accs[g] + jnp.dot(
                    tap[:, g * gw:(g + 1) * gw], w_ref[t, g],
                    preferred_element_type=jnp.float32)

    y = jnp.concatenate(accs, axis=-1) if groups > 1 else accs[0]   # (M, C)
    y = jnp.maximum(y + b_ref[...], 0.0)

    if has_se:
        m = jnp.mean(y, axis=0, keepdims=True)                      # (1, C)
        h = jnp.dot(m, wse1_ref[...], preferred_element_type=jnp.float32)
        h = jnp.maximum(h + bse1_ref[...], 0.0)
        gate = jnp.dot(h, wse2_ref[...], preferred_element_type=jnp.float32)
        gate = jax.nn.sigmoid(gate + bse2_ref[...])                 # (1, C)
        y = y * gate

    o_ref[...] = y.astype(o_ref.dtype)[None]


def _conv3_fused_kernel(has_shortcut, x1_ref, xs_ref, w3_ref, b3_ref, *rest):
    # Fused: 1x1 conv + folded-BN bias  +  (shortcut 1x1 conv + BN | identity)
    #        + residual add + ReLU.
    if has_shortcut:
        wsc_ref, bsc_ref, o_ref = rest
    else:
        (o_ref,) = rest
    y = jnp.dot(x1_ref[...], w3_ref[...], preferred_element_type=jnp.float32)
    y = y + b3_ref[...]
    if has_shortcut:
        sc = jnp.dot(xs_ref[...], wsc_ref[...], preferred_element_type=jnp.float32)
        y = y + sc + bsc_ref[...]
    else:
        y = y + xs_ref[...].astype(jnp.float32)
    o_ref[...] = jnp.maximum(y, 0.0).astype(o_ref.dtype)


# ----------------------------------------------------------------------------
# Pallas wrappers
# ----------------------------------------------------------------------------
def _row_tile(m):
    # Largest tile (<=512 rows) that divides M while keeping >=2 grid steps,
    # so both v7x TensorCores get work; falls back to the largest divisor.
    for t in (512, 256, 128, 64, 32, 16, 8):
        if m % t == 0 and m // t >= 2:
            return t
    for t in (512, 256, 128, 64, 32, 16, 8):
        if m % t == 0:
            return t
    return m


def pw_conv_relu(x2d, w, b):
    """relu(x @ w + b) — conv1 with folded BN. x,w: bf16; b: f32."""
    M, Cin = x2d.shape
    Cout = w.shape[1]
    tm = _row_tile(M)
    return pl.pallas_call(
        _pw_relu_kernel,
        out_shape=jax.ShapeDtypeStruct((M, Cout), jnp.bfloat16),
        grid=(M // tm,),
        in_specs=[
            pl.BlockSpec((tm, Cin), lambda i: (i, 0)),
            pl.BlockSpec((Cin, Cout), lambda i: (0, 0)),
            pl.BlockSpec((1, Cout), lambda i: (0, 0)),
        ],
        out_specs=pl.BlockSpec((tm, Cout), lambda i: (i, 0)),
        compiler_params=_COMPILER_PARAMS_1D,
    )(x2d, w, b)


def conv2_se(xph, w2, b2, se_params, stride, Ho, Wo):
    """Fused grouped 3x3 conv + BN + ReLU + SE, one batch element per grid step.

    xph: (N, s*s, Hq, Wq, C) padded, phase-decomposed conv1 output (bf16).
    Returns (N, Ho*Wo, C) bf16.
    """
    N, SS, Hq, Wq, C = xph.shape
    taps, groups, gw, _ = w2.shape
    M = Ho * Wo
    has_se = se_params is not None

    kern = functools.partial(_conv2_se_kernel, stride, Ho, Wo, groups, gw, has_se)
    in_specs = [
        pl.BlockSpec((1, SS, Hq, Wq, C), lambda n: (n, 0, 0, 0, 0)),
        pl.BlockSpec((taps, groups, gw, gw), lambda n: (0, 0, 0, 0)),
        pl.BlockSpec((1, C), lambda n: (0, 0)),
    ]
    args = [xph, w2, b2]
    if has_se:
        wse1, bse1, wse2, bse2 = se_params
        Cse = wse1.shape[1]
        in_specs += [
            pl.BlockSpec((C, Cse), lambda n: (0, 0)),
            pl.BlockSpec((1, Cse), lambda n: (0, 0)),
            pl.BlockSpec((Cse, C), lambda n: (0, 0)),
            pl.BlockSpec((1, C), lambda n: (0, 0)),
        ]
        args += [wse1, bse1, wse2, bse2]

    return pl.pallas_call(
        kern,
        out_shape=jax.ShapeDtypeStruct((N, M, C), jnp.bfloat16),
        grid=(N,),
        in_specs=in_specs,
        out_specs=pl.BlockSpec((1, M, C), lambda n: (n, 0, 0)),
        compiler_params=_COMPILER_PARAMS_1D,
    )(*args)


def conv3_fused(x1, xs, w3, b3, wsc=None, bsc=None):
    """relu(x1 @ w3 + b3 + shortcut); shortcut = xs @ wsc + bsc or identity xs."""
    M, C1 = x1.shape
    Cin = xs.shape[1]
    Cout = w3.shape[1]
    tm = _row_tile(M)
    has_sc = wsc is not None

    kern = functools.partial(_conv3_fused_kernel, has_sc)
    in_specs = [
        pl.BlockSpec((tm, C1), lambda i: (i, 0)),
        pl.BlockSpec((tm, Cin), lambda i: (i, 0)),
        pl.BlockSpec((C1, Cout), lambda i: (0, 0)),
        pl.BlockSpec((1, Cout), lambda i: (0, 0)),
    ]
    args = [x1, xs, w3, b3]
    if has_sc:
        in_specs += [
            pl.BlockSpec((Cin, Cout), lambda i: (0, 0)),
            pl.BlockSpec((1, Cout), lambda i: (0, 0)),
        ]
        args += [wsc, bsc]

    return pl.pallas_call(
        kern,
        out_shape=jax.ShapeDtypeStruct((M, Cout), jnp.bfloat16),
        grid=(M // tm,),
        in_specs=in_specs,
        out_specs=pl.BlockSpec((tm, Cout), lambda i: (i, 0)),
        compiler_params=_COMPILER_PARAMS_1D,
    )(*args)


# ----------------------------------------------------------------------------
# Wrapper-side glue: pad + stride-phase decomposition (single 1x copy of a small
# tensor, replacing the old 9x im2col expansion).
# ----------------------------------------------------------------------------
def pad_and_phase(y, stride):
    """y: (N,H,W,C) -> (N, s*s, Hq, Wq, C) so that for tap (ky,kx):
       padded[n, ho*s+ky, wo*s+kx, c] == out[n, (ky%s)*s+(kx%s), ho+ky//s, wo+kx//s, c]."""
    N, H, W, C = y.shape
    s = stride
    Hpp = -(-(H + 2) // s) * s
    Wpp = -(-(W + 2) // s) * s
    yp = jnp.pad(y, ((0, 0), (1, Hpp - H - 1), (1, Wpp - W - 1), (0, 0)))
    Hq, Wq = Hpp // s, Wpp // s
    if s == 1:
        return yp[:, None]
    yq = yp.reshape(N, Hq, s, Wq, s, C)
    yq = jnp.transpose(yq, (0, 2, 4, 1, 3, 5)).reshape(N, s * s, Hq, Wq, C)
    return yq


# ----------------------------------------------------------------------------
# Deterministic parameter init (inference-mode BN folded: scale into weights,
# bias kept separate in f32).
# ----------------------------------------------------------------------------
def _bn_scale_bias(key, c, eps=1e-5):
    k1, k2, k3, k4 = jax.random.split(key, 4)
    gamma = 1.0 + 0.1 * jax.random.normal(k1, (c,), jnp.float32)
    beta = 0.1 * jax.random.normal(k2, (c,), jnp.float32)
    mean = 0.1 * jax.random.normal(k3, (c,), jnp.float32)
    var = 1.0 + 0.1 * jnp.abs(jax.random.normal(k4, (c,), jnp.float32))
    scale = gamma / jnp.sqrt(var + eps)
    bias = beta - mean * scale
    return scale[None, :], bias[None, :]


def init_xblock(key, in_c, out_c, br, gw, stride, se_ratio):
    inter = out_c // br
    groups = inter // gw
    ks = jax.random.split(key, 12)
    p = {"stride": stride,
         "has_shortcut": (stride != 1 or in_c != out_c),
         "has_se": se_ratio is not None}

    # conv1: 1x1 in_c -> inter, BN scale folded, bf16 weight.
    w1 = jax.random.normal(ks[0], (in_c, inter), jnp.float32) / sqrt(in_c)
    s1, b1 = _bn_scale_bias(ks[1], inter)
    p["w1"] = (w1 * s1).astype(jnp.bfloat16)
    p["b1"] = b1

    # conv2: 3x3 grouped, per-tap per-group weights (9, G, gw, gw); BN folded.
    wg = jax.random.normal(ks[2], (9, groups, gw, gw), jnp.float32) / sqrt(9 * gw)
    s2, b2 = _bn_scale_bias(ks[3], inter)
    p["w2"] = wg * s2.reshape(groups, gw)[None, :, None, :]
    p["b2"] = b2

    # SE branch (tiny, kept in f32).
    if se_ratio is not None:
        se_c = in_c // se_ratio
        p["wse1"] = jax.random.normal(ks[4], (inter, se_c), jnp.float32) / sqrt(inter)
        p["bse1"] = 0.1 * jax.random.normal(ks[5], (1, se_c), jnp.float32)
        p["wse2"] = jax.random.normal(ks[6], (se_c, inter), jnp.float32) / sqrt(se_c)
        p["bse2"] = 0.1 * jax.random.normal(ks[7], (1, inter), jnp.float32)

    # conv3: 1x1 inter -> out_c, BN folded.
    w3 = jax.random.normal(ks[8], (inter, out_c), jnp.float32) / sqrt(inter)
    s3, b3 = _bn_scale_bias(ks[9], out_c)
    p["w3"] = (w3 * s3).astype(jnp.bfloat16)
    p["b3"] = b3

    # shortcut: 1x1 stride-s conv + BN folded.
    if p["has_shortcut"]:
        wsc = jax.random.normal(ks[10], (in_c, out_c), jnp.float32) / sqrt(in_c)
        ssc, bsc = _bn_scale_bias(ks[11], out_c)
        p["wsc"] = (wsc * ssc).astype(jnp.bfloat16)
        p["bsc"] = bsc

    return p


def init_stage(key, num_blocks, in_c, out_c, br, gw, stride, se_ratio):
    keys = jax.random.split(key, num_blocks)
    params = [init_xblock(keys[0], in_c, out_c, br, gw, stride, se_ratio)]
    for i in range(1, num_blocks):
        params.append(init_xblock(keys[i], out_c, out_c, br, gw, 1, se_ratio))
    return params


# ----------------------------------------------------------------------------
# Forward
# ----------------------------------------------------------------------------
def xblock_forward(x, p):
    # x: NHWC bf16
    N, H, W, Cin = x.shape
    s = p["stride"]
    C1 = p["w1"].shape[1]
    Cout = p["w3"].shape[1]
    Ho = (H - 1) // s + 1
    Wo = (W - 1) // s + 1

    # conv_block_1: fused 1x1 conv + BN + ReLU (row-tiled matmul).
    y1 = pw_conv_relu(x.reshape(N * H * W, Cin), p["w1"], p["b1"])
    y1 = y1.reshape(N, H, W, C1)

    # conv_block_2 (+ SE): fused grouped 3x3 conv + BN + ReLU + SE gate.
    xph = pad_and_phase(y1, s)
    se_params = ((p["wse1"], p["bse1"], p["wse2"], p["bse2"])
                 if p["has_se"] else None)
    y2 = conv2_se(xph, p["w2"], p["b2"], se_params, s, Ho, Wo)   # (N, Ho*Wo, C1)

    # conv_block_3 + shortcut + add + ReLU, fully fused.
    if p["has_shortcut"]:
        # Strided 1x1-conv input == strided spatial subsample (tiny XLA slice).
        xs = x[:, ::s, ::s, :]
        out = conv3_fused(y2.reshape(N * Ho * Wo, C1),
                          xs.reshape(N * Ho * Wo, Cin),
                          p["w3"], p["b3"], p["wsc"], p["bsc"])
    else:
        out = conv3_fused(y2.reshape(N * Ho * Wo, C1),
                          x.reshape(N * Ho * Wo, Cin),
                          p["w3"], p["b3"])
    return out.reshape(N, Ho, Wo, Cout)


def stage_forward(x_nchw, params):
    # Accept / return NCHW f32 (PyTorch convention); compute NHWC bf16 inside.
    x = jnp.transpose(x_nchw, (0, 2, 3, 1)).astype(jnp.bfloat16)
    for p in params:
        x = xblock_forward(x, p)
    return jnp.transpose(x.astype(jnp.float32), (0, 3, 1, 2))


# ----------------------------------------------------------------------------
if __name__ == "__main__":
    key = jax.random.PRNGKey(0)
    kx, kp = jax.random.split(key)

    # Stage(num_blocks=2, in_channels=8, out_channels=16, bottleneck_ratio=2,
    #       group_width=4, stride=2, se_ratio=4)
    num_blocks, in_c, out_c = 2, 8, 16
    bottleneck_ratio, group_width, stride, se_ratio = 2, 4, 2, 4

    x = jax.random.normal(kx, (2, in_c, 16, 16), jnp.float32)  # NCHW
    params = init_stage(kp, num_blocks, in_c, out_c,
                        bottleneck_ratio, group_width, stride, se_ratio)

    fwd = jax.jit(lambda inp: stage_forward(inp, params))
    y = fwd(x)
    jax.block_until_ready(y)
    assert y.shape == (2, out_c, 8, 8), y.shape
    print("KERNEL_OK")
</pallas_src>

<mosaic_0001>
module attributes {stable_mosaic.version = 11 : i64} {
  func.func @_pw_relu_kernel(%arg0: i32, %arg1: memref<256x8xbf16, #tpu.memory_space<vmem>>, %arg2: memref<8x8xbf16, #tpu.memory_space<vmem>>, %arg3: memref<1x8xf32, #tpu.memory_space<vmem>>, %arg4: memref<256x8xbf16, #tpu.memory_space<vmem>>) attributes {dimension_semantics = [#tpu.dimension_semantics<parallel>], iteration_bounds = array<i64: 2>, scalar_prefetch = 0 : i64, scratch_operands = 0 : i64, tpu.core_type = #tpu.core_type<tc>, window_params = [{transform_indices = @transform_0, window_bounds = array<i64: 256, 8>}, {pipeline_mode = #tpu.pipeline_mode<synchronous>, transform_indices = @transform_1, window_bounds = array<i64: 8, 8>}, {pipeline_mode = #tpu.pipeline_mode<synchronous>, transform_indices = @transform_2, window_bounds = array<i64: 1, 8>}, {transform_indices = @transform_3, window_bounds = array<i64: 256, 8>}]} {
    %c0 = arith.constant 0 : index
    %c0_0 = arith.constant 0 : index
    %0 = vector.load %arg1[%c0, %c0_0] : memref<256x8xbf16, #tpu.memory_space<vmem>>, vector<256x8xbf16>
    %c0_1 = arith.constant 0 : index
    %c0_2 = arith.constant 0 : index
    %1 = vector.load %arg2[%c0_1, %c0_2] : memref<8x8xbf16, #tpu.memory_space<vmem>>, vector<8x8xbf16>
    %cst = arith.constant dense<0.000000e+00> : vector<256x8xf32>
    %2 = tpu.matmul %0, %1, %cst {dimension_numbers = #tpu.dot_dimension_numbers<[1], [0], [0], [1], [0, 0, 1, 1], [], []>} : vector<256x8xbf16>, vector<8x8xbf16>, vector<256x8xf32> -> vector<256x8xf32>
    %c0_3 = arith.constant 0 : index
    %c0_4 = arith.constant 0 : index
    %3 = vector.load %arg3[%c0_3, %c0_4] : memref<1x8xf32, #tpu.memory_space<vmem>>, vector<1x8xf32>
    %4 = vector.broadcast %3 : vector<1x8xf32> to vector<256x8xf32>
    %5 = arith.addf %2, %4 : vector<256x8xf32>
    %cst_5 = arith.constant 0.000000e+00 : f32
    %6 = vector.broadcast %cst_5 : f32 to vector<256x8xf32>
    %7 = arith.maximumf %5, %6 : vector<256x8xf32>
    %8 = arith.truncf %7 : vector<256x8xf32> to vector<256x8xbf16>
    %c0_6 = arith.constant 0 : index
    %c0_7 = arith.constant 0 : index
    %9 = vector.load %arg4[%c0_6, %c0_7] : memref<256x8xbf16, #tpu.memory_space<vmem>>, vector<256x8xbf16>
    tpu.vector_store %arg4[%c0_6, %c0_7], %8 {strides = array<i32>} : memref<256x8xbf16, #tpu.memory_space<vmem>>, vector<256x8xbf16>,
    return
  }
  func.func @transform_0(%arg0: i32) -> (i32, i32) {
    %c0_i32 = arith.constant 0 : i32
    %c0_i32_0 = arith.constant 0 : i32
    return %arg0, %c0_i32 : i32, i32
  }
  func.func @transform_1(%arg0: i32) -> (i32, i32) {
    %c0_i32 = arith.constant 0 : i32
    %c0_i32_0 = arith.constant 0 : i32
    %c0_i32_1 = arith.constant 0 : i32
    return %c0_i32, %c0_i32_0 : i32, i32
  }
  func.func @transform_2(%arg0: i32) -> (i32, i32) {
    %c0_i32 = arith.constant 0 : i32
    %c0_i32_0 = arith.constant 0 : i32
    %c0_i32_1 = arith.constant 0 : i32
    return %c0_i32, %c0_i32_0 : i32, i32
  }
  func.func @transform_3(%arg0: i32) -> (i32, i32) {
    %c0_i32 = arith.constant 0 : i32
    %c0_i32_0 = arith.constant 0 : i32
    return %arg0, %c0_i32 : i32, i32
  }
}

module attributes {stable_mosaic.version = 11 : i64} {
  func.func @_conv2_se_kernel(%arg0: i32, %arg1: memref<1x4x9x9x8xbf16, #tpu.memory_space<vmem>>, %arg2: memref<9x2x4x4xf32, #tpu.memory_space<vmem>>, %arg3: memref<1x8xf32, #tpu.memory_space<vmem>>, %arg4: memref<8x2xf32, #tpu.memory_space<vmem>>, %arg5: memref<1x2xf32, #tpu.memory_space<vmem>>, %arg6: memref<2x8xf32, #tpu.memory_space<vmem>>, %arg7: memref<1x8xf32, #tpu.memory_space<vmem>>, %arg8: memref<1x64x8xbf16, #tpu.memory_space<vmem>>) attributes {dimension_semantics = [#tpu.dimension_semantics<parallel>], iteration_bounds = array<i64: 2>, scalar_prefetch = 0 : i64, scratch_operands = 0 : i64, tpu.core_type = #tpu.core_type<tc>, window_params = [{transform_indices = @transform_0, window_bounds = array<i64: 1, 4, 9, 9, 8>}, {pipeline_mode = #tpu.pipeline_mode<synchronous>, transform_indices = @transform_1, window_bounds = array<i64: 9, 2, 4, 4>}, {pipeline_mode = #tpu.pipeline_mode<synchronous>, transform_indices = @transform_2, window_bounds = array<i64: 1, 8>}, {pipeline_mode = #tpu.pipeline_mode<synchronous>, transform_indices = @transform_3, window_bounds = array<i64: 8, 2>}, {pipeline_mode = #tpu.pipeline_mode<synchronous>, transform_indices = @transform_4, window_bounds = array<i64: 1, 2>}, {pipeline_mode = #tpu.pipeline_mode<synchronous>, transform_indices = @transform_5, window_bounds = array<i64: 2, 8>}, {pipeline_mode = #tpu.pipeline_mode<synchronous>, transform_indices = @transform_6, window_bounds = array<i64: 1, 8>}, {transform_indices = @transform_7, window_bounds = array<i64: 1, 64, 8>}]} {
    %c0 = arith.constant 0 : index
    %c0_0 = arith.constant 0 : index
    %c0_1 = arith.constant 0 : index
    %c0_2 = arith.constant 0 : index
    %c0_3 = arith.constant 0 : index
    %0 = vector.load %arg1[%c0, %c0_0, %c0_1, %c0_2, %c0_3] : memref<1x4x9x9x8xbf16, #tpu.memory_space<vmem>>, vector<1x4x9x9x8xbf16>
    %1 = vector.shape_cast %0 : vector<1x4x9x9x8xbf16> to vector<4x9x9x8xbf16>
    %2 = arith.extf %1 : vector<4x9x9x8xbf16> to vector<4x9x9x8xf32>
    %cst = arith.constant 0.000000e+00 : f32
    %3 = vector.broadcast %cst : f32 to vector<64x4xf32>
    %cst_4 = arith.constant 0.000000e+00 : f32
    %4 = vector.broadcast %cst_4 : f32 to vector<64x4xf32>
    %5 = vector.extract_strided_slice %2 {offsets = [0, 0, 0, 0], sizes = [1, 8, 8, 8], strides = [1, 1, 1, 1]} : vector<4x9x9x8xf32> to vector<1x8x8x8xf32>
    %6 = vector.shape_cast %5 : vector<1x8x8x8xf32> to vector<8x8x8xf32>
    %7 = vector.shape_cast %6 : vector<8x8x8xf32> to vector<64x8xf32>
    %8 = vector.extract_strided_slice %7 {offsets = [0, 0], sizes = [64, 4], strides = [1, 1]} : vector<64x8xf32> to vector<64x4xf32>
    %c0_5 = arith.constant 0 : index
    %c0_6 = arith.constant 0 : index
    %c0_7 = arith.constant 0 : index
    %c0_8 = arith.constant 0 : index
    %9 = vector.load %arg2[%c0_5, %c0_6, %c0_7, %c0_8] : memref<9x2x4x4xf32, #tpu.memory_space<vmem>>, vector<1x1x4x4xf32>
    %10 = vector.shape_cast %9 : vector<1x1x4x4xf32> to vector<4x4xf32>
    %cst_9 = arith.constant dense<0.000000e+00> : vector<64x4xf32>
    %11 = tpu.matmul %8, %10, %cst_9 {dimension_numbers = #tpu.dot_dimension_numbers<[1], [0], [0], [1], [0, 0, 1, 1], [], []>} : vector<64x4xf32>, vector<4x4xf32>, vector<64x4xf32> -> vector<64x4xf32>
    %12 = arith.addf %3, %11 : vector<64x4xf32>
    %13 = vector.extract_strided_slice %7 {offsets = [0, 4], sizes = [64, 4], strides = [1, 1]} : vector<64x8xf32> to vector<64x4xf32>
    %c0_10 = arith.constant 0 : index
    %c1 = arith.constant 1 : index
    %c0_11 = arith.constant 0 : index
    %c0_12 = arith.constant 0 : index
    %14 = vector.load %arg2[%c0_10, %c1, %c0_11, %c0_12] : memref<9x2x4x4xf32, #tpu.memory_space<vmem>>, vector<1x1x4x4xf32>
    %15 = vector.shape_cast %14 : vector<1x1x4x4xf32> to vector<4x4xf32>
    %cst_13 = arith.constant dense<0.000000e+00> : vector<64x4xf32>
    %16 = tpu.matmul %13, %15, %cst_13 {dimension_numbers = #tpu.dot_dimension_numbers<[1], [0], [0], [1], [0, 0, 1, 1], [], []>} : vector<64x4xf32>, vector<4x4xf32>, vector<64x4xf32> -> vector<64x4xf32>
    %17 = arith.addf %4, %16 : vector<64x4xf32>
    %18 = vector.extract_strided_slice %2 {offsets = [1, 0, 0, 0], sizes = [1, 8, 8, 8], strides = [1, 1, 1, 1]} : vector<4x9x9x8xf32> to vector<1x8x8x8xf32>
    %19 = vector.shape_cast %18 : vector<1x8x8x8xf32> to vector<8x8x8xf32>
    %20 = vector.shape_cast %19 : vector<8x8x8xf32> to vector<64x8xf32>
    %21 = vector.extract_strided_slice %20 {offsets = [0, 0], sizes = [64, 4], strides = [1, 1]} : vector<64x8xf32> to vector<64x4xf32>
    %c1_14 = arith.constant 1 : index
    %c0_15 = arith.constant 0 : index
    %c0_16 = arith.constant 0 : index
    %c0_17 = arith.constant 0 : index
    %22 = vector.load %arg2[%c1_14, %c0_15, %c0_16, %c0_17] : memref<9x2x4x4xf32, #tpu.memory_space<vmem>>, vector<1x1x4x4xf32>
    %23 = vector.shape_cast %22 : vector<1x1x4x4xf32> to vector<4x4xf32>
    %cst_18 = arith.constant dense<0.000000e+00> : vector<64x4xf32>
    %24 = tpu.matmul %21, %23, %cst_18 {dimension_numbers = #tpu.dot_dimension_numbers<[1], [0], [0], [1], [0, 0, 1, 1], [], []>} : vector<64x4xf32>, vector<4x4xf32>, vector<64x4xf32> -> vector<64x4xf32>
    %25 = arith.addf %12, %24 : vector<64x4xf32>
    %26 = vector.extract_strided_slice %20 {offsets = [0, 4], sizes = [64, 4], strides = [1, 1]} : vector<64x8xf32> to vector<64x4xf32>
    %c1_19 = arith.constant 1 : index
    %c1_20 = arith.constant 1 : index
    %c0_21 = arith.constant 0 : index
    %c0_22 = arith.constant 0 : index
    %27 = vector.load %arg2[%c1_19, %c1_20, %c0_21, %c0_22] : memref<9x2x4x4xf32, #tpu.memory_space<vmem>>, vector<1x1x4x4xf32>
    %28 = vector.shape_cast %27 : vector<1x1x4x4xf32> to vector<4x4xf32>
    %cst_23 = arith.constant dense<0.000000e+00> : vector<64x4xf32>
    %29 = tpu.matmul %26, %28, %cst_23 {dimension_numbers = #tpu.dot_dimension_numbers<[1], [0], [0], [1], [0, 0, 1, 1], [], []>} : vector<64x4xf32>, vector<4x4xf32>, vector<64x4xf32> -> vector<64x4xf32>
    %30 = arith.addf %17, %29 : vector<64x4xf32>
    %31 = vector.extract_strided_slice %2 {offsets = [0, 0, 1, 0], sizes = [1, 8, 8, 8], strides = [1, 1, 1, 1]} : vector<4x9x9x8xf32> to vector<1x8x8x8xf32>
    %32 = vector.shape_cast %31 : vector<1x8x8x8xf32> to vector<8x8x8xf32>
    %33 = vector.shape_cast %32 : vector<8x8x8xf32> to vector<64x8xf32>
    %34 = vector.extract_strided_slice %33 {offsets = [0, 0], sizes = [64, 4], strides = [1, 1]} : vector<64x8xf32> to vector<64x4xf32>
    %c2 = arith.constant 2 : index
    %c0_24 = arith.constant 0 : index
    %c0_25 = arith.constant 0 : index
    %c0_26 = arith.constant 0 : index
    %35 = vector.load %arg2[%c2, %c0_24, %c0_25, %c0_26] : memref<9x2x4x4xf32, #tpu.memory_space<vmem>>, vector<1x1x4x4xf32>
    %36 = vector.shape_cast %35 : vector<1x1x4x4xf32> to vector<4x4xf32>
    %cst_27 = arith.constant dense<0.000000e+00> : vector<64x4xf32>
    %37 = tpu.matmul %34, %36, %cst_27 {dimension_numbers = #tpu.dot_dimension_numbers<[1], [0], [0], [1], [0, 0, 1, 1], [], []>} : vector<64x4xf32>, vector<4x4xf32>, vector<64x4xf32> -> vector<64x4xf32>
    %38 = arith.addf %25, %37 : vector<64x4xf32>
    %39 = vector.extract_strided_slice %33 {offsets = [0, 4], sizes = [64, 4], strides = [1, 1]} : vector<64x8xf32> to vector<64x4xf32>
    %c2_28 = arith.constant 2 : index
    %c1_29 = arith.constant 1 : index
    %c0_30 = arith.constant 0 : index
    %c0_31 = arith.constant 0 : index
    %40 = vector.load %arg2[%c2_28, %c1_29, %c0_30, %c0_31] : memref<9x2x4x4xf32, #tpu.memory_space<vmem>>, vector<1x1x4x4xf32>
    %41 = vector.shape_cast %40 : vector<1x1x4x4xf32> to vector<4x4xf32>
    %cst_32 = arith.constant dense<0.000000e+00> : vector<64x4xf32>
    %42 = tpu.matmul %39, %41, %cst_32 {dimension_numbers = #tpu.dot_dimension_numbers<[1], [0], [0], [1], [0, 0, 1, 1], [], []>} : vector<64x4xf32>, vector<4x4xf32>, vector<64x4xf32> -> vector<64x4xf32>
    %43 = arith.addf %30, %42 : vector<64x4xf32>
    %44 = vector.extract_strided_slice %2 {offsets = [2, 0, 0, 0], sizes = [1, 8, 8, 8], strides = [1, 1, 1, 1]} : vector<4x9x9x8xf32> to vector<1x8x8x8xf32>
    %45 = vector.shape_cast %44 : vector<1x8x8x8xf32> to vector<8x8x8xf32>
    %46 = vector.shape_cast %45 : vector<8x8x8xf32> to vector<64x8xf32>
    %47 = vector.extract_strided_slice %46 {offsets = [0, 0], sizes = [64, 4], strides = [1, 1]} : vector<64x8xf32> to vector<64x4xf32>
    %c3 = arith.constant 3 : index
    %c0_33 = arith.constant 0 : index
    %c0_34 = arith.constant 0 : index
    %c0_35 = arith.constant 0 : index
    %48 = vector.load %arg2[%c3, %c0_33, %c0_34, %c0_35] : memref<9x2x4x4xf32, #tpu.memory_space<vmem>>, vector<1x1x4x4xf32>
    %49 = vector.shape_cast %48 : vector<1x1x4x4xf32> to vector<4x4xf32>
    %cst_36 = arith.constant dense<0.000000e+00> : vector<64x4xf32>
    %50 = tpu.matmul %47, %49, %cst_36 {dimension_numbers = #tpu.dot_dimension_numbers<[1], [0], [0], [1], [0, 0, 1, 1], [], []>} : vector<64x4xf32>, vector<4x4xf32>, vector<64x4xf32> -> vector<64x4xf32>
    %51 = arith.addf %38, %50 : vector<64x4xf32>
    %52 = vector.extract_strided_slice %46 {offsets = [0, 4], sizes = [64, 4], strides = [1, 1]} : vector<64x8xf32> to vector<64x4xf32>
    %c3_37 = arith.constant 3 : index
    %c1_38 = arith.constant 1 : index
    %c0_39 = arith.constant 0 : index
    %c0_40 = arith.constant 0 : index
    %53 = vector.load %arg2[%c3_37, %c1_38, %c0_39, %c0_40] : memref<9x2x4x4xf32, #tpu.memory_space<vmem>>, vector<1x1x4x4xf32>
    %54 = vector.shape_cast %53 : vector<1x1x4x4xf32> to vector<4x4xf32>
    %cst_41 = arith.constant dense<0.000000e+00> : vector<64x4xf32>
    %55 = tpu.matmul %52, %54, %cst_41 {dimension_numbers = #tpu.dot_dimension_numbers<[1], [0], [0], [1], [0, 0, 1, 1], [], []>} : vector<64x4xf32>, vector<4x4xf32>, vector<64x4xf32> -> vector<64x4xf32>
    %56 = arith.addf %43, %55 : vector<64x4xf32>
    %57 = vector.extract_strided_slice %2 {offsets = [3, 0, 0, 0], sizes = [1, 8, 8, 8], strides = [1, 1, 1, 1]} : vector<4x9x9x8xf32> to vector<1x8x8x8xf32>
    %58 = vector.shape_cast %57 : vector<1x8x8x8xf32> to vector<8x8x8xf32>
    %59 = vector.shape_cast %58 : vector<8x8x8xf32> to vector<64x8xf32>
    %60 = vector.extract_strided_slice %59 {offsets = [0, 0], sizes = [64, 4], strides = [1, 1]} : vector<64x8xf32> to vector<64x4xf32>
    %c4 = arith.constant 4 : index
    %c0_42 = arith.constant 0 : index
    %c0_43 = arith.constant 0 : index
    %c0_44 = arith.constant 0 : index
    %61 = vector.load %arg2[%c4, %c0_42, %c0_43, %c0_44] : memref<9x2x4x4xf32, #tpu.memory_space<vmem>>, vector<1x1x4x4xf32>
    %62 = vector.shape_cast %61 : vector<1x1x4x4xf32> to vector<4x4xf32>
    %cst_45 = arith.constant dense<0.000000e+00> : vector<64x4xf32>
    %63 = tpu.matmul %60, %62, %cst_45 {dimension_numbers = #tpu.dot_dimension_numbers<[1], [0], [0], [1], [0, 0, 1, 1], [], []>} : vector<64x4xf32>, vector<4x4xf32>, vector<64x4xf32> -> vector<64x4xf32>
    %64 = arith.addf %51, %63 : vector<64x4xf32>
    %65 = vector.extract_strided_slice %59 {offsets = [0, 4], sizes = [64, 4], strides = [1, 1]} : vector<64x8xf32> to vector<64x4xf32>
    %c4_46 = arith.constant 4 : index
    %c1_47 = arith.constant 1 : index
    %c0_48 = arith.constant 0 : index
    %c0_49 = arith.constant 0 : index
    %66 = vector.load %arg2[%c4_46, %c1_47, %c0_48, %c0_49] : memref<9x2x4x4xf32, #tpu.memory_space<vmem>>, vector<1x1x4x4xf32>
    %67 = vector.shape_cast %66 : vector<1x1x4x4xf32> to vector<4x4xf32>
    %cst_50 = arith.constant dense<0.000000e+00> : vector<64x4xf32>
    %68 = tpu.matmul %65, %67, %cst_50 {dimension_numbers = #tpu.dot_dimension_numbers<[1], [0], [0], [1], [0, 0, 1, 1], [], []>} : vector<64x4xf32>, vector<4x4xf32>, vector<64x4xf32> -> vector<64x4xf32>
    %69 = arith.addf %56, %68 : vector<64x4xf32>
    %70 = vector.extract_strided_slice %2 {offsets = [2, 0, 1, 0], sizes = [1, 8, 8, 8], strides = [1, 1, 1, 1]} : vector<4x9x9x8xf32> to vector<1x8x8x8xf32>
    %71 = vector.shape_cast %70 : vector<1x8x8x8xf32> to vector<8x8x8xf32>
    %72 = vector.shape_cast %71 : vector<8x8x8xf32> to vector<64x8xf32>
    %73 = vector.extract_strided_slice %72 {offsets = [0, 0], sizes = [64, 4], strides = [1, 1]} : vector<64x8xf32> to vector<64x4xf32>
    %c5 = arith.constant 5 : index
    %c0_51 = arith.constant 0 : index
    %c0_52 = arith.constant 0 : index
    %c0_53 = arith.constant 0 : index
    %74 = vector.load %arg2[%c5, %c0_51, %c0_52, %c0_53] : memref<9x2x4x4xf32, #tpu.memory_space<vmem>>, vector<1x1x4x4xf32>
    %75 = vector.shape_cast %74 : vector<1x1x4x4xf32> to vector<4x4xf32>
    %cst_54 = arith.constant dense<0.000000e+00> : vector<64x4xf32>
    %76 = tpu.matmul %73, %75, %cst_54 {dimension_numbers = #tpu.dot_dimension_numbers<[1], [0], [0], [1], [0, 0, 1, 1], [], []>} : vector<64x4xf32>, vector<4x4xf32>, vector<64x4xf32> -> vector<64x4xf32>
    %77 = arith.addf %64, %76 : vector<64x4xf32>
    %78 = vector.extract_strided_slice %72 {offsets = [0, 4], sizes = [64, 4], strides = [1, 1]} : vector<64x8xf32> to vector<64x4xf32>
    %c5_55 = arith.constant 5 : index
    %c1_56 = arith.constant 1 : index
    %c0_57 = arith.constant 0 : index
    %c0_58 = arith.constant 0 : index
    %79 = vector.load %arg2[%c5_55, %c1_56, %c0_57, %c0_58] : memref<9x2x4x4xf32, #tpu.memory_space<vmem>>, vector<1x1x4x4xf32>
    %80 = vector.shape_cast %79 : vector<1x1x4x4xf32> to vector<4x4xf32>
    %cst_59 = arith.constant dense<0.000000e+00> : vector<64x4xf32>
    %81 = tpu.matmul %78, %80, %cst_59 {dimension_numbers = #tpu.dot_dimension_numbers<[1], [0], [0], [1], [0, 0, 1, 1], [], []>} : vector<64x4xf32>, vector<4x4xf32>, vector<64x4xf32> -> vector<64x4xf32>
    %82 = arith.addf %69, %81 : vector<64x4xf32>
    %83 = vector.extract_strided_slice %2 {offsets = [0, 1, 0, 0], sizes = [1, 8, 8, 8], strides = [1, 1, 1, 1]} : vector<4x9x9x8xf32> to vector<1x8x8x8xf32>
    %84 = vector.shape_cast %83 : vector<1x8x8x8xf32> to vector<8x8x8xf32>
    %85 = vector.shape_cast %84 : vector<8x8x8xf32> to vector<64x8xf32>
    %86 = vector.extract_strided_slice %85 {offsets = [0, 0], sizes = [64, 4], strides = [1, 1]} : vector<64x8xf32> to vector<64x4xf32>
    %c6 = arith.constant 6 : index
    %c0_60 = arith.constant 0 : index
    %c0_61 = arith.constant 0 : index
    %c0_62 = arith.constant 0 : index
    %87 = vector.load %arg2[%c6, %c0_60, %c0_61, %c0_62] : memref<9x2x4x4xf32, #tpu.memory_space<vmem>>, vector<1x1x4x4xf32>
    %88 = vector.shape_cast %87 : vector<1x1x4x4xf32> to vector<4x4xf32>
    %cst_63 = arith.constant dense<0.000000e+00> : vector<64x4xf32>
    %89 = tpu.matmul %86, %88, %cst_63 {dimension_numbers = #tpu.dot_dimension_numbers<[1], [0], [0], [1], [0, 0, 1, 1], [], []>} : vector<64x4xf32>, vector<4x4xf32>, vector<64x4xf32> -> vector<64x4xf32>
    %90 = arith.addf %77, %89 : vector<64x4xf32>
    %91 = vector.extract_strided_slice %85 {offsets = [0, 4], sizes = [64, 4], strides = [1, 1]} : vector<64x8xf32> to vector<64x4xf32>
    %c6_64 = arith.constant 6 : index
    %c1_65 = arith.constant 1 : index
    %c0_66 = arith.constant 0 : index
    %c0_67 = arith.constant 0 : index
    %92 = vector.load %arg2[%c6_64, %c1_65, %c0_66, %c0_67] : memref<9x2x4x4xf32, #tpu.memory_space<vmem>>, vector<1x1x4x4xf32>
    %93 = vector.shape_cast %92 : vector<1x1x4x4xf32> to vector<4x4xf32>
    %cst_68 = arith.constant dense<0.000000e+00> : vector<64x4xf32>
    %94 = tpu.matmul %91, %93, %cst_68 {dimension_numbers = #tpu.dot_dimension_numbers<[1], [0], [0], [1], [0, 0, 1, 1], [], []>} : vector<64x4xf32>, vector<4x4xf32>, vector<64x4xf32> -> vector<64x4xf32>
    %95 = arith.addf %82, %94 : vector<64x4xf32>
    %96 = vector.extract_strided_slice %2 {offsets = [1, 1, 0, 0], sizes = [1, 8, 8, 8], strides = [1, 1, 1, 1]} : vector<4x9x9x8xf32> to vector<1x8x8x8xf32>
    %97 = vector.shape_cast %96 : vector<1x8x8x8xf32> to vector<8x8x8xf32>
    %98 = vector.shape_cast %97 : vector<8x8x8xf32> to vector<64x8xf32>
    %99 = vector.extract_strided_slice %98 {offsets = [0, 0], sizes = [64, 4], strides = [1, 1]} : vector<64x8xf32> to vector<64x4xf32>
    %c7 = arith.constant 7 : index
    %c0_69 = arith.constant 0 : index
    %c0_70 = arith.constant 0 : index
    %c0_71 = arith.constant 0 : index
    %100 = vector.load %arg2[%c7, %c0_69, %c0_70, %c0_71] : memref<9x2x4x4xf32, #tpu.memory_space<vmem>>, vector<1x1x4x4xf32>
    %101 = vector.shape_cast %100 : vector<1x1x4x4xf32> to vector<4x4xf32>
    %cst_72 = arith.constant dense<0.000000e+00> : vector<64x4xf32>
    %102 = tpu.matmul %99, %101, %cst_72 {dimension_numbers = #tpu.dot_dimension_numbers<[1], [0], [0], [1], [0, 0, 1, 1], [], []>} : vector<64x4xf32>, vector<4x4xf32>, vector<64x4xf32> -> vector<64x4xf32>
    %103 = arith.addf %90, %102 : vector<64x4xf32>
    %104 = vector.extract_strided_slice %98 {offsets = [0, 4], sizes = [64, 4], strides = [1, 1]} : vector<64x8xf32> to vector<64x4xf32>
    %c7_73 = arith.constant 7 : index
    %c1_74 = arith.constant 1 : index
    %c0_75 = arith.constant 0 : index
    %c0_76 = arith.constant 0 : index
    %105 = vector.load %arg2[%c7_73, %c1_74, %c0_75, %c0_76] : memref<9x2x4x4xf32, #tpu.memory_space<vmem>>, vector<1x1x4x4xf32>
    %106 = vector.shape_cast %105 : vector<1x1x4x4xf32> to vector<4x4xf32>
    %cst_77 = arith.constant dense<0.000000e+00> : vector<64x4xf32>
    %107 = tpu.matmul %104, %106, %cst_77 {dimension_numbers = #tpu.dot_dimension_numbers<[1], [0], [0], [1], [0, 0, 1, 1], [], []>} : vector<64x4xf32>, vector<4x4xf32>, vector<64x4xf32> -> vector<64x4xf32>
    %108 = arith.addf %95, %107 : vector<64x4xf32>
    %109 = vector.extract_strided_slice %2 {offsets = [0, 1, 1, 0], sizes = [1, 8, 8, 8], strides = [1, 1, 1, 1]} : vector<4x9x9x8xf32> to vector<1x8x8x8xf32>
    %110 = vector.shape_cast %109 : vector<1x8x8x8xf32> to vector<8x8x8xf32>
    %111 = vector.shape_cast %110 : vector<8x8x8xf32> to vector<64x8xf32>
    %112 = vector.extract_strided_slice %111 {offsets = [0, 0], sizes = [64, 4], strides = [1, 1]} : vector<64x8xf32> to vector<64x4xf32>
    %c8 = arith.constant 8 : index
    %c0_78 = arith.constant 0 : index
    %c0_79 = arith.constant 0 : index
    %c0_80 = arith.constant 0 : index
    %113 = vector.load %arg2[%c8, %c0_78, %c0_79, %c0_80] : memref<9x2x4x4xf32, #tpu.memory_space<vmem>>, vector<1x1x4x4xf32>
    %114 = vector.shape_cast %113 : vector<1x1x4x4xf32> to vector<4x4xf32>
    %cst_81 = arith.constant dense<0.000000e+00> : vector<64x4xf32>
    %115 = tpu.matmul %112, %114, %cst_81 {dimension_numbers = #tpu.dot_dimension_numbers<[1], [0], [0], [1], [0, 0, 1, 1], [], []>} : vector<64x4xf32>, vector<4x4xf32>, vector<64x4xf32> -> vector<64x4xf32>
    %116 = arith.addf %103, %115 : vector<64x4xf32>
    %117 = vector.extract_strided_slice %111 {offsets = [0, 4], sizes = [64, 4], strides = [1, 1]} : vector<64x8xf32> to vector<64x4xf32>
    %c8_82 = arith.constant 8 : index
    %c1_83 = arith.constant 1 : index
    %c0_84 = arith.constant 0 : index
    %c0_85 = arith.constant 0 : index
    %118 = vector.load %arg2[%c8_82, %c1_83, %c0_84, %c0_85] : memref<9x2x4x4xf32, #tpu.memory_space<vmem>>, vector<1x1x4x4xf32>
    %119 = vector.shape_cast %118 : vector<1x1x4x4xf32> to vector<4x4xf32>
    %cst_86 = arith.constant dense<0.000000e+00> : vector<64x4xf32>
    %120 = tpu.matmul %117, %119, %cst_86 {dimension_numbers = #tpu.dot_dimension_numbers<[1], [0], [0], [1], [0, 0, 1, 1], [], []>} : vector<64x4xf32>, vector<4x4xf32>, vector<64x4xf32> -> vector<64x4xf32>
    %121 = arith.addf %108, %120 : vector<64x4xf32>
    %122 = tpu.concatenate %116, %121 in 1 : vector<64x4xf32>, vector<64x4xf32> -> vector<64x8xf32>
    %c0_87 = arith.constant 0 : index
    %c0_88 = arith.constant 0 : index
    %123 = vector.load %arg3[%c0_87, %c0_88] : memref<1x8xf32, #tpu.memory_space<vmem>>, vector<1x8xf32>
    %124 = vector.broadcast %123 : vector<1x8xf32> to vector<64x8xf32>
    %125 = arith.addf %122, %124 : vector<64x8xf32>
    %cst_89 = arith.constant 0.000000e+00 : f32
    %126 = vector.broadcast %cst_89 : f32 to vector<64x8xf32>
    %127 = arith.maximumf %125, %126 : vector<64x8xf32>
    %cst_90 = arith.constant dense<0.000000e+00> : vector<8xf32>
    %128 = vector.multi_reduction <add>, %127, %cst_90 [0] : vector<64x8xf32> to vector<8xf32>
    %129 = vector.shape_cast %128 : vector<8xf32> to vector<1x8xf32>
    %cst_91 = arith.constant 6.400000e+01 : f32
    %130 = vector.broadcast %cst_91 : f32 to vector<1x8xf32>
    %131 = arith.divf %129, %130 : vector<1x8xf32>
    %c0_92 = arith.constant 0 : index
    %c0_93 = arith.constant 0 : index
    %132 = vector.load %arg4[%c0_92, %c0_93] : memref<8x2xf32, #tpu.memory_space<vmem>>, vector<8x2xf32>
    %cst_94 = arith.constant dense<0.000000e+00> : vector<1x2xf32>
    %133 = tpu.matmul %131, %132, %cst_94 {dimension_numbers = #tpu.dot_dimension_numbers<[1], [0], [0], [1], [0, 0, 1, 1], [], []>} : vector<1x8xf32>, vector<8x2xf32>, vector<1x2xf32> -> vector<1x2xf32>
    %c0_95 = arith.constant 0 : index
    %c0_96 = arith.constant 0 : index
    %134 = vector.load %arg5[%c0_95, %c0_96] : memref<1x2xf32, #tpu.memory_space<vmem>>, vector<1x2xf32>
    %135 = arith.addf %133, %134 : vector<1x2xf32>
    %cst_97 = arith.constant 0.000000e+00 : f32
    %136 = vector.broadcast %cst_97 : f32 to vector<1x2xf32>
    %137 = arith.maximumf %135, %136 : vector<1x2xf32>
    %c0_98 = arith.constant 0 : index
    %c0_99 = arith.constant 0 : index
    %138 = vector.load %arg6[%c0_98, %c0_99] : memref<2x8xf32, #tpu.memory_space<vmem>>, vector<2x8xf32>
    %cst_100 = arith.constant dense<0.000000e+00> : vector<1x8xf32>
    %139 = tpu.matmul %137, %138, %cst_100 {dimension_numbers = #tpu.dot_dimension_numbers<[1], [0], [0], [1], [0, 0, 1, 1], [], []>} : vector<1x2xf32>, vector<2x8xf32>, vector<1x8xf32> -> vector<1x8xf32>
    %c0_101 = arith.constant 0 : index
    %c0_102 = arith.constant 0 : index
    %140 = vector.load %arg7[%c0_101, %c0_102] : memref<1x8xf32, #tpu.memory_space<vmem>>, vector<1x8xf32>
    %141 = arith.addf %139, %140 : vector<1x8xf32>
    %142 = arith.negf %141 : vector<1x8xf32>
    %143 = math.exp %142 : vector<1x8xf32>
    %cst_103 = arith.constant 1.000000e+00 : f32
    %144 = vector.broadcast %cst_103 : f32 to vector<1x8xf32>
    %145 = arith.addf %144, %143 : vector<1x8xf32>
    %146 = arith.divf %144, %145 : vector<1x8xf32>
    %147 = vector.broadcast %146 : vector<1x8xf32> to vector<64x8xf32>
    %148 = arith.mulf %127, %147 : vector<64x8xf32>
    %149 = arith.truncf %148 : vector<64x8xf32> to vector<64x8xbf16>
    %150 = vector.shape_cast %149 : vector<64x8xbf16> to vector<1x64x8xbf16>
    %c0_104 = arith.constant 0 : index
    %c0_105 = arith.constant 0 : index
    %c0_106 = arith.constant 0 : index
    %151 = vector.load %arg8[%c0_104, %c0_105, %c0_106] : memref<1x64x8xbf16, #tpu.memory_space<vmem>>, vector<1x64x8xbf16>
    tpu.vector_store %arg8[%c0_104, %c0_105, %c0_106], %150 {strides = array<i32>} : memref<1x64x8xbf16, #tpu.memory_space<vmem>>, vector<1x64x8xbf16>,
    return
  }
  func.func @transform_0(%arg0: i32) -> (i32, i32, i32, i32, i32) {
    %c0_i32 = arith.constant 0 : i32
    %c0_i32_0 = arith.constant 0 : i32
    %c0_i32_1 = arith.constant 0 : i32
    %c0_i32_2 = arith.constant 0 : i32
    %c0_i32_3 = arith.constant 0 : i32
    return %arg0, %c0_i32, %c0_i32_0, %c0_i32_1, %c0_i32_2 : i32, i32, i32, i32, i32
  }
  func.func @transform_1(%arg0: i32) -> (i32, i32, i32, i32) {
    %c0_i32 = arith.constant 0 : i32
    %c0_i32_0 = arith.constant 0 : i32
    %c0_i32_1 = arith.constant 0 : i32
    %c0_i32_2 = arith.constant 0 : i32
    %c0_i32_3 = arith.constant 0 : i32
    return %c0_i32, %c0_i32_0, %c0_i32_1, %c0_i32_2 : i32, i32, i32, i32
  }
  func.func @transform_2(%arg0: i32) -> (i32, i32) {
    %c0_i32 = arith.constant 0 : i32
    %c0_i32_0 = arith.constant 0 : i32
    %c0_i32_1 = arith.constant 0 : i32
    return %c0_i32, %c0_i32_0 : i32, i32
  }
  func.func @transform_3(%arg0: i32) -> (i32, i32) {
    %c0_i32 = arith.constant 0 : i32
    %c0_i32_0 = arith.constant 0 : i32
    %c0_i32_1 = arith.constant 0 : i32
    return %c0_i32, %c0_i32_0 : i32, i32
  }
  func.func @transform_4(%arg0: i32) -> (i32, i32) {
    %c0_i32 = arith.constant 0 : i32
    %c0_i32_0 = arith.constant 0 : i32
    %c0_i32_1 = arith.constant 0 : i32
    return %c0_i32, %c0_i32_0 : i32, i32
  }
  func.func @transform_5(%arg0: i32) -> (i32, i32) {
    %c0_i32 = arith.constant 0 : i32
    %c0_i32_0 = arith.constant 0 : i32
    %c0_i32_1 = arith.constant 0 : i32
    return %c0_i32, %c0_i32_0 : i32, i32
  }
  func.func @transform_6(%arg0: i32) -> (i32, i32) {
    %c0_i32 = arith.constant 0 : i32
    %c0_i32_0 = arith.constant 0 : i32
    %c0_i32_1 = arith.constant 0 : i32
    return %c0_i32, %c0_i32_0 : i32, i32
  }
  func.func @transform_7(%arg0: i32) -> (i32, i32, i32) {
    %c0_i32 = arith.constant 0 : i32
    %c0_i32_0 = arith.constant 0 : i32
    %c0_i32_1 = arith.constant 0 : i32
    return %arg0, %c0_i32, %c0_i32_0 : i32, i32, i32
  }
}

module attributes {stable_mosaic.version = 11 : i64} {
  func.func @_conv3_fused_kernel(%arg0: i32, %arg1: memref<64x8xbf16, #tpu.memory_space<vmem>>, %arg2: memref<64x8xbf16, #tpu.memory_space<vmem>>, %arg3: memref<8x16xbf16, #tpu.memory_space<vmem>>, %arg4: memref<1x16xf32, #tpu.memory_space<vmem>>, %arg5: memref<8x16xbf16, #tpu.memory_space<vmem>>, %arg6: memref<1x16xf32, #tpu.memory_space<vmem>>, %arg7: memref<64x16xbf16, #tpu.memory_space<vmem>>) attributes {dimension_semantics = [#tpu.dimension_semantics<parallel>], iteration_bounds = array<i64: 2>, scalar_prefetch = 0 : i64, scratch_operands = 0 : i64, tpu.core_type = #tpu.core_type<tc>, window_params = [{transform_indices = @transform_0, window_bounds = array<i64: 64, 8>}, {transform_indices = @transform_1, window_bounds = array<i64: 64, 8>}, {pipeline_mode = #tpu.pipeline_mode<synchronous>, transform_indices = @transform_2, window_bounds = array<i64: 8, 16>}, {pipeline_mode = #tpu.pipeline_mode<synchronous>, transform_indices = @transform_3, window_bounds = array<i64: 1, 16>}, {pipeline_mode = #tpu.pipeline_mode<synchronous>, transform_indices = @transform_4, window_bounds = array<i64: 8, 16>}, {pipeline_mode = #tpu.pipeline_mode<synchronous>, transform_indices = @transform_5, window_bounds = array<i64: 1, 16>}, {transform_indices = @transform_6, window_bounds = array<i64: 64, 16>}]} {
    %c0 = arith.constant 0 : index
    %c0_0 = arith.constant 0 : index
    %0 = vector.load %arg1[%c0, %c0_0] : memref<64x8xbf16, #tpu.memory_space<vmem>>, vector<64x8xbf16>
    %c0_1 = arith.constant 0 : index
    %c0_2 = arith.constant 0 : index
    %1 = vector.load %arg3[%c0_1, %c0_2] : memref<8x16xbf16, #tpu.memory_space<vmem>>, vector<8x16xbf16>
    %cst = arith.constant dense<0.000000e+00> : vector<64x16xf32>
    %2 = tpu.matmul %0, %1, %cst {dimension_numbers = #tpu.dot_dimension_numbers<[1], [0], [0], [1], [0, 0, 1, 1], [], []>} : vector<64x8xbf16>, vector<8x16xbf16>, vector<64x16xf32> -> vector<64x16xf32>
    %c0_3 = arith.constant 0 : index
    %c0_4 = arith.constant 0 : index
    %3 = vector.load %arg4[%c0_3, %c0_4] : memref<1x16xf32, #tpu.memory_space<vmem>>, vector<1x16xf32>
    %4 = vector.broadcast %3 : vector<1x16xf32> to vector<64x16xf32>
    %5 = arith.addf %2, %4 : vector<64x16xf32>
    %c0_5 = arith.constant 0 : index
    %c0_6 = arith.constant 0 : index
    %6 = vector.load %arg2[%c0_5, %c0_6] : memref<64x8xbf16, #tpu.memory_space<vmem>>, vector<64x8xbf16>
    %c0_7 = arith.constant 0 : index
    %c0_8 = arith.constant 0 : index
    %7 = vector.load %arg5[%c0_7, %c0_8] : memref<8x16xbf16, #tpu.memory_space<vmem>>, vector<8x16xbf16>
    %cst_9 = arith.constant dense<0.000000e+00> : vector<64x16xf32>
    %8 = tpu.matmul %6, %7, %cst_9 {dimension_numbers = #tpu.dot_dimension_numbers<[1], [0], [0], [1], [0, 0, 1, 1], [], []>} : vector<64x8xbf16>, vector<8x16xbf16>, vector<64x16xf32> -> vector<64x16xf32>
    %9 = arith.addf %5, %8 : vector<64x16xf32>
    %c0_10 = arith.constant 0 : index
    %c0_11 = arith.constant 0 : index
    %10 = vector.load %arg6[%c0_10, %c0_11] : memref<1x16xf32, #tpu.memory_space<vmem>>, vector<1x16xf32>
    %11 = vector.broadcast %10 : vector<1x16xf32> to vector<64x16xf32>
    %12 = arith.addf %9, %11 : vector<64x16xf32>
    %cst_12 = arith.constant 0.000000e+00 : f32
    %13 = vector.broadcast %cst_12 : f32 to vector<64x16xf32>
    %14 = arith.maximumf %12, %13 : vector<64x16xf32>
    %15 = arith.truncf %14 : vector<64x16xf32> to vector<64x16xbf16>
    %c0_13 = arith.constant 0 : index
    %c0_14 = arith.constant 0 : index
    %16 = vector.load %arg7[%c0_13, %c0_14] : memref<64x16xbf16, #tpu.memory_space<vmem>>, vector<64x16xbf16>
    tpu.vector_store %arg7[%c0_13, %c0_14], %15 {strides = array<i32>} : memref<64x16xbf16, #tpu.memory_space<vmem>>, vector<64x16xbf16>,
    return
  }
  func.func @transform_0(%arg0: i32) -> (i32, i32) {
    %c0_i32 = arith.constant 0 : i32
    %c0_i32_0 = arith.constant 0 : i32
    return %arg0, %c0_i32 : i32, i32
  }
  func.func @transform_1(%arg0: i32) -> (i32, i32) {
    %c0_i32 = arith.constant 0 : i32
    %c0_i32_0 = arith.constant 0 : i32
    return %arg0, %c0_i32 : i32, i32
  }
  func.func @transform_2(%arg0: i32) -> (i32, i32) {
    %c0_i32 = arith.constant 0 : i32
    %c0_i32_0 = arith.constant 0 : i32
    %c0_i32_1 = arith.constant 0 : i32
    return %c0_i32, %c0_i32_0 : i32, i32
  }
  func.func @transform_3(%arg0: i32) -> (i32, i32) {
    %c0_i32 = arith.constant 0 : i32
    %c0_i32_0 = arith.constant 0 : i32
    %c0_i32_1 = arith.constant 0 : i32
    return %c0_i32, %c0_i32_0 : i32, i32
  }
  func.func @transform_4(%arg0: i32) -> (i32, i32) {
    %c0_i32 = arith.constant 0 : i32
    %c0_i32_0 = arith.constant 0 : i32
    %c0_i32_1 = arith.constant 0 : i32
    return %c0_i32, %c0_i32_0 : i32, i32
  }
  func.func @transform_5(%arg0: i32) -> (i32, i32) {
    %c0_i32 = arith.constant 0 : i32
    %c0_i32_0 = arith.constant 0 : i32
    %c0_i32_1 = arith.constant 0 : i32
    return %c0_i32, %c0_i32_0 : i32, i32
  }
  func.func @transform_6(%arg0: i32) -> (i32, i32) {
    %c0_i32 = arith.constant 0 : i32
    %c0_i32_0 = arith.constant 0 : i32
    return %arg0, %c0_i32 : i32, i32
  }
}

module attributes {stable_mosaic.version = 11 : i64} {
  func.func @_pw_relu_kernel(%arg0: i32, %arg1: memref<64x16xbf16, #tpu.memory_space<vmem>>, %arg2: memref<16x8xbf16, #tpu.memory_space<vmem>>, %arg3: memref<1x8xf32, #tpu.memory_space<vmem>>, %arg4: memref<64x8xbf16, #tpu.memory_space<vmem>>) attributes {dimension_semantics = [#tpu.dimension_semantics<parallel>], iteration_bounds = array<i64: 2>, scalar_prefetch = 0 : i64, scratch_operands = 0 : i64, tpu.core_type = #tpu.core_type<tc>, window_params = [{transform_indices = @transform_0, window_bounds = array<i64: 64, 16>}, {pipeline_mode = #tpu.pipeline_mode<synchronous>, transform_indices = @transform_1, window_bounds = array<i64: 16, 8>}, {pipeline_mode = #tpu.pipeline_mode<synchronous>, transform_indices = @transform_2, window_bounds = array<i64: 1, 8>}, {transform_indices = @transform_3, window_bounds = array<i64: 64, 8>}]} {
    %c0 = arith.constant 0 : index
    %c0_0 = arith.constant 0 : index
    %0 = vector.load %arg1[%c0, %c0_0] : memref<64x16xbf16, #tpu.memory_space<vmem>>, vector<64x16xbf16>
    %c0_1 = arith.constant 0 : index
    %c0_2 = arith.constant 0 : index
    %1 = vector.load %arg2[%c0_1, %c0_2] : memref<16x8xbf16, #tpu.memory_space<vmem>>, vector<16x8xbf16>
    %cst = arith.constant dense<0.000000e+00> : vector<64x8xf32>
    %2 = tpu.matmul %0, %1, %cst {dimension_numbers = #tpu.dot_dimension_numbers<[1], [0], [0], [1], [0, 0, 1, 1], [], []>} : vector<64x16xbf16>, vector<16x8xbf16>, vector<64x8xf32> -> vector<64x8xf32>
    %c0_3 = arith.constant 0 : index
    %c0_4 = arith.constant 0 : index
    %3 = vector.load %arg3[%c0_3, %c0_4] : memref<1x8xf32, #tpu.memory_space<vmem>>, vector<1x8xf32>
    %4 = vector.broadcast %3 : vector<1x8xf32> to vector<64x8xf32>
    %5 = arith.addf %2, %4 : vector<64x8xf32>
    %cst_5 = arith.constant 0.000000e+00 : f32
    %6 = vector.broadcast %cst_5 : f32 to vector<64x8xf32>
    %7 = arith.maximumf %5, %6 : vector<64x8xf32>
    %8 = arith.truncf %7 : vector<64x8xf32> to vector<64x8xbf16>
    %c0_6 = arith.constant 0 : index
    %c0_7 = arith.constant 0 : index
    %9 = vector.load %arg4[%c0_6, %c0_7] : memref<64x8xbf16, #tpu.memory_space<vmem>>, vector<64x8xbf16>
    tpu.vector_store %arg4[%c0_6, %c0_7], %8 {strides = array<i32>} : memref<64x8xbf16, #tpu.memory_space<vmem>>, vector<64x8xbf16>,
    return
  }
  func.func @transform_0(%arg0: i32) -> (i32, i32) {
    %c0_i32 = arith.constant 0 : i32
    %c0_i32_0 = arith.constant 0 : i32
    return %arg0, %c0_i32 : i32, i32
  }
  func.func @transform_1(%arg0: i32) -> (i32, i32) {
    %c0_i32 = arith.constant 0 : i32
    %c0_i32_0 = arith.constant 0 : i32
    %c0_i32_1 = arith.constant 0 : i32
    return %c0_i32, %c0_i32_0 : i32, i32
  }
  func.func @transform_2(%arg0: i32) -> (i32, i32) {
    %c0_i32 = arith.constant 0 : i32
    %c0_i32_0 = arith.constant 0 : i32
    %c0_i32_1 = arith.constant 0 : i32
    return %c0_i32, %c0_i32_0 : i32, i32
  }
  func.func @transform_3(%arg0: i32) -> (i32, i32) {
    %c0_i32 = arith.constant 0 : i32
    %c0_i32_0 = arith.constant 0 : i32
    return %arg0, %c0_i32 : i32, i32
  }
}

module attributes {stable_mosaic.version = 11 : i64} {
  func.func @_conv2_se_kernel(%arg0: i32, %arg1: memref<1x1x10x10x8xbf16, #tpu.memory_space<vmem>>, %arg2: memref<9x2x4x4xf32, #tpu.memory_space<vmem>>, %arg3: memref<1x8xf32, #tpu.memory_space<vmem>>, %arg4: memref<8x4xf32, #tpu.memory_space<vmem>>, %arg5: memref<1x4xf32, #tpu.memory_space<vmem>>, %arg6: memref<4x8xf32, #tpu.memory_space<vmem>>, %arg7: memref<1x8xf32, #tpu.memory_space<vmem>>, %arg8: memref<1x64x8xbf16, #tpu.memory_space<vmem>>) attributes {dimension_semantics = [#tpu.dimension_semantics<parallel>], iteration_bounds = array<i64: 2>, scalar_prefetch = 0 : i64, scratch_operands = 0 : i64, tpu.core_type = #tpu.core_type<tc>, window_params = [{transform_indices = @transform_0, window_bounds = array<i64: 1, 1, 10, 10, 8>}, {pipeline_mode = #tpu.pipeline_mode<synchronous>, transform_indices = @transform_1, window_bounds = array<i64: 9, 2, 4, 4>}, {pipeline_mode = #tpu.pipeline_mode<synchronous>, transform_indices = @transform_2, window_bounds = array<i64: 1, 8>}, {pipeline_mode = #tpu.pipeline_mode<synchronous>, transform_indices = @transform_3, window_bounds = array<i64: 8, 4>}, {pipeline_mode = #tpu.pipeline_mode<synchronous>, transform_indices = @transform_4, window_bounds = array<i64: 1, 4>}, {pipeline_mode = #tpu.pipeline_mode<synchronous>, transform_indices = @transform_5, window_bounds = array<i64: 4, 8>}, {pipeline_mode = #tpu.pipeline_mode<synchronous>, transform_indices = @transform_6, window_bounds = array<i64: 1, 8>}, {transform_indices = @transform_7, window_bounds = array<i64: 1, 64, 8>}]} {
    %c0 = arith.constant 0 : index
    %c0_0 = arith.constant 0 : index
    %c0_1 = arith.constant 0 : index
    %c0_2 = arith.constant 0 : index
    %c0_3 = arith.constant 0 : index
    %0 = vector.load %arg1[%c0, %c0_0, %c0_1, %c0_2, %c0_3] : memref<1x1x10x10x8xbf16, #tpu.memory_space<vmem>>, vector<1x1x10x10x8xbf16>
    %1 = vector.shape_cast %0 : vector<1x1x10x10x8xbf16> to vector<1x10x10x8xbf16>
    %2 = arith.extf %1 : vector<1x10x10x8xbf16> to vector<1x10x10x8xf32>
    %cst = arith.constant 0.000000e+00 : f32
    %3 = vector.broadcast %cst : f32 to vector<64x4xf32>
    %cst_4 = arith.constant 0.000000e+00 : f32
    %4 = vector.broadcast %cst_4 : f32 to vector<64x4xf32>
    %5 = vector.extract_strided_slice %2 {offsets = [0, 0, 0, 0], sizes = [1, 8, 8, 8], strides = [1, 1, 1, 1]} : vector<1x10x10x8xf32> to vector<1x8x8x8xf32>
    %6 = vector.shape_cast %5 : vector<1x8x8x8xf32> to vector<8x8x8xf32>
    %7 = vector.shape_cast %6 : vector<8x8x8xf32> to vector<64x8xf32>
    %8 = vector.extract_strided_slice %7 {offsets = [0, 0], sizes = [64, 4], strides = [1, 1]} : vector<64x8xf32> to vector<64x4xf32>
    %c0_5 = arith.constant 0 : index
    %c0_6 = arith.constant 0 : index
    %c0_7 = arith.constant 0 : index
    %c0_8 = arith.constant 0 : index
    %9 = vector.load %arg2[%c0_5, %c0_6, %c0_7, %c0_8] : memref<9x2x4x4xf32, #tpu.memory_space<vmem>>, vector<1x1x4x4xf32>
    %10 = vector.shape_cast %9 : vector<1x1x4x4xf32> to vector<4x4xf32>
    %cst_9 = arith.constant dense<0.000000e+00> : vector<64x4xf32>
    %11 = tpu.matmul %8, %10, %cst_9 {dimension_numbers = #tpu.dot_dimension_numbers<[1], [0], [0], [1], [0, 0, 1, 1], [], []>} : vector<64x4xf32>, vector<4x4xf32>, vector<64x4xf32> -> vector<64x4xf32>
    %12 = arith.addf %3, %11 : vector<64x4xf32>
    %13 = vector.extract_strided_slice %7 {offsets = [0, 4], sizes = [64, 4], strides = [1, 1]} : vector<64x8xf32> to vector<64x4xf32>
    %c0_10 = arith.constant 0 : index
    %c1 = arith.constant 1 : index
    %c0_11 = arith.constant 0 : index
    %c0_12 = arith.constant 0 : index
    %14 = vector.load %arg2[%c0_10, %c1, %c0_11, %c0_12] : memref<9x2x4x4xf32, #tpu.memory_space<vmem>>, vector<1x1x4x4xf32>
    %15 = vector.shape_cast %14 : vector<1x1x4x4xf32> to vector<4x4xf32>
    %cst_13 = arith.constant dense<0.000000e+00> : vector<64x4xf32>
    %16 = tpu.matmul %13, %15, %cst_13 {dimension_numbers = #tpu.dot_dimension_numbers<[1], [0], [0], [1], [0, 0, 1, 1], [], []>} : vector<64x4xf32>, vector<4x4xf32>, vector<64x4xf32> -> vector<64x4xf32>
    %17 = arith.addf %4, %16 : vector<64x4xf32>
    %18 = vector.extract_strided_slice %2 {offsets = [0, 0, 1, 0], sizes = [1, 8, 8, 8], strides = [1, 1, 1, 1]} : vector<1x10x10x8xf32> to vector<1x8x8x8xf32>
    %19 = vector.shape_cast %18 : vector<1x8x8x8xf32> to vector<8x8x8xf32>
    %20 = vector.shape_cast %19 : vector<8x8x8xf32> to vector<64x8xf32>
    %21 = vector.extract_strided_slice %20 {offsets = [0, 0], sizes = [64, 4], strides = [1, 1]} : vector<64x8xf32> to vector<64x4xf32>
    %c1_14 = arith.constant 1 : index
    %c0_15 = arith.constant 0 : index
    %c0_16 = arith.constant 0 : index
    %c0_17 = arith.constant 0 : index
    %22 = vector.load %arg2[%c1_14, %c0_15, %c0_16, %c0_17] : memref<9x2x4x4xf32, #tpu.memory_space<vmem>>, vector<1x1x4x4xf32>
    %23 = vector.shape_cast %22 : vector<1x1x4x4xf32> to vector<4x4xf32>
    %cst_18 = arith.constant dense<0.000000e+00> : vector<64x4xf32>
    %24 = tpu.matmul %21, %23, %cst_18 {dimension_numbers = #tpu.dot_dimension_numbers<[1], [0], [0], [1], [0, 0, 1, 1], [], []>} : vector<64x4xf32>, vector<4x4xf32>, vector<64x4xf32> -> vector<64x4xf32>
    %25 = arith.addf %12, %24 : vector<64x4xf32>
    %26 = vector.extract_strided_slice %20 {offsets = [0, 4], sizes = [64, 4], strides = [1, 1]} : vector<64x8xf32> to vector<64x4xf32>
    %c1_19 = arith.constant 1 : index
    %c1_20 = arith.constant 1 : index
    %c0_21 = arith.constant 0 : index
    %c0_22 = arith.constant 0 : index
    %27 = vector.load %arg2[%c1_19, %c1_20, %c0_21, %c0_22] : memref<9x2x4x4xf32, #tpu.memory_space<vmem>>, vector<1x1x4x4xf32>
    %28 = vector.shape_cast %27 : vector<1x1x4x4xf32> to vector<4x4xf32>
    %cst_23 = arith.constant dense<0.000000e+00> : vector<64x4xf32>
    %29 = tpu.matmul %26, %28, %cst_23 {dimension_numbers = #tpu.dot_dimension_numbers<[1], [0], [0], [1], [0, 0, 1, 1], [], []>} : vector<64x4xf32>, vector<4x4xf32>, vector<64x4xf32> -> vector<64x4xf32>
    %30 = arith.addf %17, %29 : vector<64x4xf32>
    %31 = vector.extract_strided_slice %2 {offsets = [0, 0, 2, 0], sizes = [1, 8, 8, 8], strides = [1, 1, 1, 1]} : vector<1x10x10x8xf32> to vector<1x8x8x8xf32>
    %32 = vector.shape_cast %31 : vector<1x8x8x8xf32> to vector<8x8x8xf32>
    %33 = vector.shape_cast %32 : vector<8x8x8xf32> to vector<64x8xf32>
    %34 = vector.extract_strided_slice %33 {offsets = [0, 0], sizes = [64, 4], strides = [1, 1]} : vector<64x8xf32> to vector<64x4xf32>
    %c2 = arith.constant 2 : index
    %c0_24 = arith.constant 0 : index
    %c0_25 = arith.constant 0 : index
    %c0_26 = arith.constant 0 : index
    %35 = vector.load %arg2[%c2, %c0_24, %c0_25, %c0_26] : memref<9x2x4x4xf32, #tpu.memory_space<vmem>>, vector<1x1x4x4xf32>
    %36 = vector.shape_cast %35 : vector<1x1x4x4xf32> to vector<4x4xf32>
    %cst_27 = arith.constant dense<0.000000e+00> : vector<64x4xf32>
    %37 = tpu.matmul %34, %36, %cst_27 {dimension_numbers = #tpu.dot_dimension_numbers<[1], [0], [0], [1], [0, 0, 1, 1], [], []>} : vector<64x4xf32>, vector<4x4xf32>, vector<64x4xf32> -> vector<64x4xf32>
    %38 = arith.addf %25, %37 : vector<64x4xf32>
    %39 = vector.extract_strided_slice %33 {offsets = [0, 4], sizes = [64, 4], strides = [1, 1]} : vector<64x8xf32> to vector<64x4xf32>
    %c2_28 = arith.constant 2 : index
    %c1_29 = arith.constant 1 : index
    %c0_30 = arith.constant 0 : index
    %c0_31 = arith.constant 0 : index
    %40 = vector.load %arg2[%c2_28, %c1_29, %c0_30, %c0_31] : memref<9x2x4x4xf32, #tpu.memory_space<vmem>>, vector<1x1x4x4xf32>
    %41 = vector.shape_cast %40 : vector<1x1x4x4xf32> to vector<4x4xf32>
    %cst_32 = arith.constant dense<0.000000e+00> : vector<64x4xf32>
    %42 = tpu.matmul %39, %41, %cst_32 {dimension_numbers = #tpu.dot_dimension_numbers<[1], [0], [0], [1], [0, 0, 1, 1], [], []>} : vector<64x4xf32>, vector<4x4xf32>, vector<64x4xf32> -> vector<64x4xf32>
    %43 = arith.addf %30, %42 : vector<64x4xf32>
    %44 = vector.extract_strided_slice %2 {offsets = [0, 1, 0, 0], sizes = [1, 8, 8, 8], strides = [1, 1, 1, 1]} : vector<1x10x10x8xf32> to vector<1x8x8x8xf32>
    %45 = vector.shape_cast %44 : vector<1x8x8x8xf32> to vector<8x8x8xf32>
    %46 = vector.shape_cast %45 : vector<8x8x8xf32> to vector<64x8xf32>
    %47 = vector.extract_strided_slice %46 {offsets = [0, 0], sizes = [64, 4], strides = [1, 1]} : vector<64x8xf32> to vector<64x4xf32>
    %c3 = arith.constant 3 : index
    %c0_33 = arith.constant 0 : index
    %c0_34 = arith.constant 0 : index
    %c0_35 = arith.constant 0 : index
    %48 = vector.load %arg2[%c3, %c0_33, %c0_34, %c0_35] : memref<9x2x4x4xf32, #tpu.memory_space<vmem>>, vector<1x1x4x4xf32>
    %49 = vector.shape_cast %48 : vector<1x1x4x4xf32> to vector<4x4xf32>
    %cst_36 = arith.constant dense<0.000000e+00> : vector<64x4xf32>
    %50 = tpu.matmul %47, %49, %cst_36 {dimension_numbers = #tpu.dot_dimension_numbers<[1], [0], [0], [1], [0, 0, 1, 1], [], []>} : vector<64x4xf32>, vector<4x4xf32>, vector<64x4xf32> -> vector<64x4xf32>
    %51 = arith.addf %38, %50 : vector<64x4xf32>
    %52 = vector.extract_strided_slice %46 {offsets = [0, 4], sizes = [64, 4], strides = [1, 1]} : vector<64x8xf32> to vector<64x4xf32>
    %c3_37 = arith.constant 3 : index
    %c1_38 = arith.constant 1 : index
    %c0_39 = arith.constant 0 : index
    %c0_40 = arith.constant 0 : index
    %53 = vector.load %arg2[%c3_37, %c1_38, %c0_39, %c0_40] : memref<9x2x4x4xf32, #tpu.memory_space<vmem>>, vector<1x1x4x4xf32>
    %54 = vector.shape_cast %53 : vector<1x1x4x4xf32> to vector<4x4xf32>
    %cst_41 = arith.constant dense<0.000000e+00> : vector<64x4xf32>
    %55 = tpu.matmul %52, %54, %cst_41 {dimension_numbers = #tpu.dot_dimension_numbers<[1], [0], [0], [1], [0, 0, 1, 1], [], []>} : vector<64x4xf32>, vector<4x4xf32>, vector<64x4xf32> -> vector<64x4xf32>
    %56 = arith.addf %43, %55 : vector<64x4xf32>
    %57 = vector.extract_strided_slice %2 {offsets = [0, 1, 1, 0], sizes = [1, 8, 8, 8], strides = [1, 1, 1, 1]} : vector<1x10x10x8xf32> to vector<1x8x8x8xf32>
    %58 = vector.shape_cast %57 : vector<1x8x8x8xf32> to vector<8x8x8xf32>
    %59 = vector.shape_cast %58 : vector<8x8x8xf32> to vector<64x8xf32>
    %60 = vector.extract_strided_slice %59 {offsets = [0, 0], sizes = [64, 4], strides = [1, 1]} : vector<64x8xf32> to vector<64x4xf32>
    %c4 = arith.constant 4 : index
    %c0_42 = arith.constant 0 : index
    %c0_43 = arith.constant 0 : index
    %c0_44 = arith.constant 0 : index
    %61 = vector.load %arg2[%c4, %c0_42, %c0_43, %c0_44] : memref<9x2x4x4xf32, #tpu.memory_space<vmem>>, vector<1x1x4x4xf32>
    %62 = vector.shape_cast %61 : vector<1x1x4x4xf32> to vector<4x4xf32>
    %cst_45 = arith.constant dense<0.000000e+00> : vector<64x4xf32>
    %63 = tpu.matmul %60, %62, %cst_45 {dimension_numbers = #tpu.dot_dimension_numbers<[1], [0], [0], [1], [0, 0, 1, 1], [], []>} : vector<64x4xf32>, vector<4x4xf32>, vector<64x4xf32> -> vector<64x4xf32>
    %64 = arith.addf %51, %63 : vector<64x4xf32>
    %65 = vector.extract_strided_slice %59 {offsets = [0, 4], sizes = [64, 4], strides = [1, 1]} : vector<64x8xf32> to vector<64x4xf32>
    %c4_46 = arith.constant 4 : index
    %c1_47 = arith.constant 1 : index
    %c0_48 = arith.constant 0 : index
    %c0_49 = arith.constant 0 : index
    %66 = vector.load %arg2[%c4_46, %c1_47, %c0_48, %c0_49] : memref<9x2x4x4xf32, #tpu.memory_space<vmem>>, vector<1x1x4x4xf32>
    %67 = vector.shape_cast %66 : vector<1x1x4x4xf32> to vector<4x4xf32>
    %cst_50 = arith.constant dense<0.000000e+00> : vector<64x4xf32>
    %68 = tpu.matmul %65, %67, %cst_50 {dimension_numbers = #tpu.dot_dimension_numbers<[1], [0], [0], [1], [0, 0, 1, 1], [], []>} : vector<64x4xf32>, vector<4x4xf32>, vector<64x4xf32> -> vector<64x4xf32>
    %69 = arith.addf %56, %68 : vector<64x4xf32>
    %70 = vector.extract_strided_slice %2 {offsets = [0, 1, 2, 0], sizes = [1, 8, 8, 8], strides = [1, 1, 1, 1]} : vector<1x10x10x8xf32> to vector<1x8x8x8xf32>
    %71 = vector.shape_cast %70 : vector<1x8x8x8xf32> to vector<8x8x8xf32>
    %72 = vector.shape_cast %71 : vector<8x8x8xf32> to vector<64x8xf32>
    %73 = vector.extract_strided_slice %72 {offsets = [0, 0], sizes = [64, 4], strides = [1, 1]} : vector<64x8xf32> to vector<64x4xf32>
    %c5 = arith.constant 5 : index
    %c0_51 = arith.constant 0 : index
    %c0_52 = arith.constant 0 : index
    %c0_53 = arith.constant 0 : index
    %74 = vector.load %arg2[%c5, %c0_51, %c0_52, %c0_53] : memref<9x2x4x4xf32, #tpu.memory_space<vmem>>, vector<1x1x4x4xf32>
    %75 = vector.shape_cast %74 : vector<1x1x4x4xf32> to vector<4x4xf32>
    %cst_54 = arith.constant dense<0.000000e+00> : vector<64x4xf32>
    %76 = tpu.matmul %73, %75, %cst_54 {dimension_numbers = #tpu.dot_dimension_numbers<[1], [0], [0], [1], [0, 0, 1, 1], [], []>} : vector<64x4xf32>, vector<4x4xf32>, vector<64x4xf32> -> vector<64x4xf32>
    %77 = arith.addf %64, %76 : vector<64x4xf32>
    %78 = vector.extract_strided_slice %72 {offsets = [0, 4], sizes = [64, 4], strides = [1, 1]} : vector<64x8xf32> to vector<64x4xf32>
    %c5_55 = arith.constant 5 : index
    %c1_56 = arith.constant 1 : index
    %c0_57 = arith.constant 0 : index
    %c0_58 = arith.constant 0 : index
    %79 = vector.load %arg2[%c5_55, %c1_56, %c0_57, %c0_58] : memref<9x2x4x4xf32, #tpu.memory_space<vmem>>, vector<1x1x4x4xf32>
    %80 = vector.shape_cast %79 : vector<1x1x4x4xf32> to vector<4x4xf32>
    %cst_59 = arith.constant dense<0.000000e+00> : vector<64x4xf32>
    %81 = tpu.matmul %78, %80, %cst_59 {dimension_numbers = #tpu.dot_dimension_numbers<[1], [0], [0], [1], [0, 0, 1, 1], [], []>} : vector<64x4xf32>, vector<4x4xf32>, vector<64x4xf32> -> vector<64x4xf32>
    %82 = arith.addf %69, %81 : vector<64x4xf32>
    %83 = vector.extract_strided_slice %2 {offsets = [0, 2, 0, 0], sizes = [1, 8, 8, 8], strides = [1, 1, 1, 1]} : vector<1x10x10x8xf32> to vector<1x8x8x8xf32>
    %84 = vector.shape_cast %83 : vector<1x8x8x8xf32> to vector<8x8x8xf32>
    %85 = vector.shape_cast %84 : vector<8x8x8xf32> to vector<64x8xf32>
    %86 = vector.extract_strided_slice %85 {offsets = [0, 0], sizes = [64, 4], strides = [1, 1]} : vector<64x8xf32> to vector<64x4xf32>
    %c6 = arith.constant 6 : index
    %c0_60 = arith.constant 0 : index
    %c0_61 = arith.constant 0 : index
    %c0_62 = arith.constant 0 : index
    %87 = vector.load %arg2[%c6, %c0_60, %c0_61, %c0_62] : memref<9x2x4x4xf32, #tpu.memory_space<vmem>>, vector<1x1x4x4xf32>
    %88 = vector.shape_cast %87 : vector<1x1x4x4xf32> to vector<4x4xf32>
    %cst_63 = arith.constant dense<0.000000e+00> : vector<64x4xf32>
    %89 = tpu.matmul %86, %88, %cst_63 {dimension_numbers = #tpu.dot_dimension_numbers<[1], [0], [0], [1], [0, 0, 1, 1], [], []>} : vector<64x4xf32>, vector<4x4xf32>, vector<64x4xf32> -> vector<64x4xf32>
    %90 = arith.addf %77, %89 : vector<64x4xf32>
    %91 = vector.extract_strided_slice %85 {offsets = [0, 4], sizes = [64, 4], strides = [1, 1]} : vector<64x8xf32> to vector<64x4xf32>
    %c6_64 = arith.constant 6 : index
    %c1_65 = arith.constant 1 : index
    %c0_66 = arith.constant 0 : index
    %c0_67 = arith.constant 0 : index
    %92 = vector.load %arg2[%c6_64, %c1_65, %c0_66, %c0_67] : memref<9x2x4x4xf32, #tpu.memory_space<vmem>>, vector<1x1x4x4xf32>
    %93 = vector.shape_cast %92 : vector<1x1x4x4xf32> to vector<4x4xf32>
    %cst_68 = arith.constant dense<0.000000e+00> : vector<64x4xf32>
    %94 = tpu.matmul %91, %93, %cst_68 {dimension_numbers = #tpu.dot_dimension_numbers<[1], [0], [0], [1], [0, 0, 1, 1], [], []>} : vector<64x4xf32>, vector<4x4xf32>, vector<64x4xf32> -> vector<64x4xf32>
    %95 = arith.addf %82, %94 : vector<64x4xf32>
    %96 = vector.extract_strided_slice %2 {offsets = [0, 2, 1, 0], sizes = [1, 8, 8, 8], strides = [1, 1, 1, 1]} : vector<1x10x10x8xf32> to vector<1x8x8x8xf32>
    %97 = vector.shape_cast %96 : vector<1x8x8x8xf32> to vector<8x8x8xf32>
    %98 = vector.shape_cast %97 : vector<8x8x8xf32> to vector<64x8xf32>
    %99 = vector.extract_strided_slice %98 {offsets = [0, 0], sizes = [64, 4], strides = [1, 1]} : vector<64x8xf32> to vector<64x4xf32>
    %c7 = arith.constant 7 : index
    %c0_69 = arith.constant 0 : index
    %c0_70 = arith.constant 0 : index
    %c0_71 = arith.constant 0 : index
    %100 = vector.load %arg2[%c7, %c0_69, %c0_70, %c0_71] : memref<9x2x4x4xf32, #tpu.memory_space<vmem>>, vector<1x1x4x4xf32>
    %101 = vector.shape_cast %100 : vector<1x1x4x4xf32> to vector<4x4xf32>
    %cst_72 = arith.constant dense<0.000000e+00> : vector<64x4xf32>
    %102 = tpu.matmul %99, %101, %cst_72 {dimension_numbers = #tpu.dot_dimension_numbers<[1], [0], [0], [1], [0, 0, 1, 1], [], []>} : vector<64x4xf32>, vector<4x4xf32>, vector<64x4xf32> -> vector<64x4xf32>
    %103 = arith.addf %90, %102 : vector<64x4xf32>
    %104 = vector.extract_strided_slice %98 {offsets = [0, 4], sizes = [64, 4], strides = [1, 1]} : vector<64x8xf32> to vector<64x4xf32>
    %c7_73 = arith.constant 7 : index
    %c1_74 = arith.constant 1 : index
    %c0_75 = arith.constant 0 : index
    %c0_76 = arith.constant 0 : index
    %105 = vector.load %arg2[%c7_73, %c1_74, %c0_75, %c0_76] : memref<9x2x4x4xf32, #tpu.memory_space<vmem>>, vector<1x1x4x4xf32>
    %106 = vector.shape_cast %105 : vector<1x1x4x4xf32> to vector<4x4xf32>
    %cst_77 = arith.constant dense<0.000000e+00> : vector<64x4xf32>
    %107 = tpu.matmul %104, %106, %cst_77 {dimension_numbers = #tpu.dot_dimension_numbers<[1], [0], [0], [1], [0, 0, 1, 1], [], []>} : vector<64x4xf32>, vector<4x4xf32>, vector<64x4xf32> -> vector<64x4xf32>
    %108 = arith.addf %95, %107 : vector<64x4xf32>
    %109 = vector.extract_strided_slice %2 {offsets = [0, 2, 2, 0], sizes = [1, 8, 8, 8], strides = [1, 1, 1, 1]} : vector<1x10x10x8xf32> to vector<1x8x8x8xf32>
    %110 = vector.shape_cast %109 : vector<1x8x8x8xf32> to vector<8x8x8xf32>
    %111 = vector.shape_cast %110 : vector<8x8x8xf32> to vector<64x8xf32>
    %112 = vector.extract_strided_slice %111 {offsets = [0, 0], sizes = [64, 4], strides = [1, 1]} : vector<64x8xf32> to vector<64x4xf32>
    %c8 = arith.constant 8 : index
    %c0_78 = arith.constant 0 : index
    %c0_79 = arith.constant 0 : index
    %c0_80 = arith.constant 0 : index
    %113 = vector.load %arg2[%c8, %c0_78, %c0_79, %c0_80] : memref<9x2x4x4xf32, #tpu.memory_space<vmem>>, vector<1x1x4x4xf32>
    %114 = vector.shape_cast %113 : vector<1x1x4x4xf32> to vector<4x4xf32>
    %cst_81 = arith.constant dense<0.000000e+00> : vector<64x4xf32>
    %115 = tpu.matmul %112, %114, %cst_81 {dimension_numbers = #tpu.dot_dimension_numbers<[1], [0], [0], [1], [0, 0, 1, 1], [], []>} : vector<64x4xf32>, vector<4x4xf32>, vector<64x4xf32> -> vector<64x4xf32>
    %116 = arith.addf %103, %115 : vector<64x4xf32>
    %117 = vector.extract_strided_slice %111 {offsets = [0, 4], sizes = [64, 4], strides = [1, 1]} : vector<64x8xf32> to vector<64x4xf32>
    %c8_82 = arith.constant 8 : index
    %c1_83 = arith.constant 1 : index
    %c0_84 = arith.constant 0 : index
    %c0_85 = arith.constant 0 : index
    %118 = vector.load %arg2[%c8_82, %c1_83, %c0_84, %c0_85] : memref<9x2x4x4xf32, #tpu.memory_space<vmem>>, vector<1x1x4x4xf32>
    %119 = vector.shape_cast %118 : vector<1x1x4x4xf32> to vector<4x4xf32>
    %cst_86 = arith.constant dense<0.000000e+00> : vector<64x4xf32>
    %120 = tpu.matmul %117, %119, %cst_86 {dimension_numbers = #tpu.dot_dimension_numbers<[1], [0], [0], [1], [0, 0, 1, 1], [], []>} : vector<64x4xf32>, vector<4x4xf32>, vector<64x4xf32> -> vector<64x4xf32>
    %121 = arith.addf %108, %120 : vector<64x4xf32>
    %122 = tpu.concatenate %116, %121 in 1 : vector<64x4xf32>, vector<64x4xf32> -> vector<64x8xf32>
    %c0_87 = arith.constant 0 : index
    %c0_88 = arith.constant 0 : index
    %123 = vector.load %arg3[%c0_87, %c0_88] : memref<1x8xf32, #tpu.memory_space<vmem>>, vector<1x8xf32>
    %124 = vector.broadcast %123 : vector<1x8xf32> to vector<64x8xf32>
    %125 = arith.addf %122, %124 : vector<64x8xf32>
    %cst_89 = arith.constant 0.000000e+00 : f32
    %126 = vector.broadcast %cst_89 : f32 to vector<64x8xf32>
    %127 = arith.maximumf %125, %126 : vector<64x8xf32>
    %cst_90 = arith.constant dense<0.000000e+00> : vector<8xf32>
    %128 = vector.multi_reduction <add>, %127, %cst_90 [0] : vector<64x8xf32> to vector<8xf32>
    %129 = vector.shape_cast %128 : vector<8xf32> to vector<1x8xf32>
    %cst_91 = arith.constant 6.400000e+01 : f32
    %130 = vector.broadcast %cst_91 : f32 to vector<1x8xf32>
    %131 = arith.divf %129, %130 : vector<1x8xf32>
    %c0_92 = arith.constant 0 : index
    %c0_93 = arith.constant 0 : index
    %132 = vector.load %arg4[%c0_92, %c0_93] : memref<8x4xf32, #tpu.memory_space<vmem>>, vector<8x4xf32>
    %cst_94 = arith.constant dense<0.000000e+00> : vector<1x4xf32>
    %133 = tpu.matmul %131, %132, %cst_94 {dimension_numbers = #tpu.dot_dimension_numbers<[1], [0], [0], [1], [0, 0, 1, 1], [], []>} : vector<1x8xf32>, vector<8x4xf32>, vector<1x4xf32> -> vector<1x4xf32>
    %c0_95 = arith.constant 0 : index
    %c0_96 = arith.constant 0 : index
    %134 = vector.load %arg5[%c0_95, %c0_96] : memref<1x4xf32, #tpu.memory_space<vmem>>, vector<1x4xf32>
    %135 = arith.addf %133, %134 : vector<1x4xf32>
    %cst_97 = arith.constant 0.000000e+00 : f32
    %136 = vector.broadcast %cst_97 : f32 to vector<1x4xf32>
    %137 = arith.maximumf %135, %136 : vector<1x4xf32>
    %c0_98 = arith.constant 0 : index
    %c0_99 = arith.constant 0 : index
    %138 = vector.load %arg6[%c0_98, %c0_99] : memref<4x8xf32, #tpu.memory_space<vmem>>, vector<4x8xf32>
    %cst_100 = arith.constant dense<0.000000e+00> : vector<1x8xf32>
    %139 = tpu.matmul %137, %138, %cst_100 {dimension_numbers = #tpu.dot_dimension_numbers<[1], [0], [0], [1], [0, 0, 1, 1], [], []>} : vector<1x4xf32>, vector<4x8xf32>, vector<1x8xf32> -> vector<1x8xf32>
    %c0_101 = arith.constant 0 : index
    %c0_102 = arith.constant 0 : index
    %140 = vector.load %arg7[%c0_101, %c0_102] : memref<1x8xf32, #tpu.memory_space<vmem>>, vector<1x8xf32>
    %141 = arith.addf %139, %140 : vector<1x8xf32>
    %142 = arith.negf %141 : vector<1x8xf32>
    %143 = math.exp %142 : vector<1x8xf32>
    %cst_103 = arith.constant 1.000000e+00 : f32
    %144 = vector.broadcast %cst_103 : f32 to vector<1x8xf32>
    %145 = arith.addf %144, %143 : vector<1x8xf32>
    %146 = arith.divf %144, %145 : vector<1x8xf32>
    %147 = vector.broadcast %146 : vector<1x8xf32> to vector<64x8xf32>
    %148 = arith.mulf %127, %147 : vector<64x8xf32>
    %149 = arith.truncf %148 : vector<64x8xf32> to vector<64x8xbf16>
    %150 = vector.shape_cast %149 : vector<64x8xbf16> to vector<1x64x8xbf16>
    %c0_104 = arith.constant 0 : index
    %c0_105 = arith.constant 0 : index
    %c0_106 = arith.constant 0 : index
    %151 = vector.load %arg8[%c0_104, %c0_105, %c0_106] : memref<1x64x8xbf16, #tpu.memory_space<vmem>>, vector<1x64x8xbf16>
    tpu.vector_store %arg8[%c0_104, %c0_105, %c0_106], %150 {strides = array<i32>} : memref<1x64x8xbf16, #tpu.memory_space<vmem>>, vector<1x64x8xbf16>,
    return
  }
  func.func @transform_0(%arg0: i32) -> (i32, i32, i32, i32, i32) {
    %c0_i32 = arith.constant 0 : i32
    %c0_i32_0 = arith.constant 0 : i32
    %c0_i32_1 = arith.constant 0 : i32
    %c0_i32_2 = arith.constant 0 : i32
    %c0_i32_3 = arith.constant 0 : i32
    return %arg0, %c0_i32, %c0_i32_0, %c0_i32_1, %c0_i32_2 : i32, i32, i32, i32, i32
  }
  func.func @transform_1(%arg0: i32) -> (i32, i32, i32, i32) {
    %c0_i32 = arith.constant 0 : i32
    %c0_i32_0 = arith.constant 0 : i32
    %c0_i32_1 = arith.constant 0 : i32
    %c0_i32_2 = arith.constant 0 : i32
    %c0_i32_3 = arith.constant 0 : i32
    return %c0_i32, %c0_i32_0, %c0_i32_1, %c0_i32_2 : i32, i32, i32, i32
  }
  func.func @transform_2(%arg0: i32) -> (i32, i32) {
    %c0_i32 = arith.constant 0 : i32
    %c0_i32_0 = arith.constant 0 : i32
    %c0_i32_1 = arith.constant 0 : i32
    return %c0_i32, %c0_i32_0 : i32, i32
  }
  func.func @transform_3(%arg0: i32) -> (i32, i32) {
    %c0_i32 = arith.constant 0 : i32
    %c0_i32_0 = arith.constant 0 : i32
    %c0_i32_1 = arith.constant 0 : i32
    return %c0_i32, %c0_i32_0 : i32, i32
  }
  func.func @transform_4(%arg0: i32) -> (i32, i32) {
    %c0_i32 = arith.constant 0 : i32
    %c0_i32_0 = arith.constant 0 : i32
    %c0_i32_1 = arith.constant 0 : i32
    return %c0_i32, %c0_i32_0 : i32, i32
  }
  func.func @transform_5(%arg0: i32) -> (i32, i32) {
    %c0_i32 = arith.constant 0 : i32
    %c0_i32_0 = arith.constant 0 : i32
    %c0_i32_1 = arith.constant 0 : i32
    return %c0_i32, %c0_i32_0 : i32, i32
  }
  func.func @transform_6(%arg0: i32) -> (i32, i32) {
    %c0_i32 = arith.constant 0 : i32
    %c0_i32_0 = arith.constant 0 : i32
    %c0_i32_1 = arith.constant 0 : i32
    return %c0_i32, %c0_i32_0 : i32, i32
  }
  func.func @transform_7(%arg0: i32) -> (i32, i32, i32) {
    %c0_i32 = arith.constant 0 : i32
    %c0_i32_0 = arith.constant 0 : i32
    %c0_i32_1 = arith.constant 0 : i32
    return %arg0, %c0_i32, %c0_i32_0 : i32, i32, i32
  }
}

module attributes {stable_mosaic.version = 11 : i64} {
  func.func @_conv3_fused_kernel(%arg0: i32, %arg1: memref<64x8xbf16, #tpu.memory_space<vmem>>, %arg2: memref<64x16xbf16, #tpu.memory_space<vmem>>, %arg3: memref<8x16xbf16, #tpu.memory_space<vmem>>, %arg4: memref<1x16xf32, #tpu.memory_space<vmem>>, %arg5: memref<64x16xbf16, #tpu.memory_space<vmem>>) attributes {dimension_semantics = [#tpu.dimension_semantics<parallel>], iteration_bounds = array<i64: 2>, scalar_prefetch = 0 : i64, scratch_operands = 0 : i64, tpu.core_type = #tpu.core_type<tc>, window_params = [{transform_indices = @transform_0, window_bounds = array<i64: 64, 8>}, {transform_indices = @transform_1, window_bounds = array<i64: 64, 16>}, {pipeline_mode = #tpu.pipeline_mode<synchronous>, transform_indices = @transform_2, window_bounds = array<i64: 8, 16>}, {pipeline_mode = #tpu.pipeline_mode<synchronous>, transform_indices = @transform_3, window_bounds = array<i64: 1, 16>}, {transform_indices = @transform_4, window_bounds = array<i64: 64, 16>}]} {
    %c0 = arith.constant 0 : index
    %c0_0 = arith.constant 0 : index
    %0 = vector.load %arg1[%c0, %c0_0] : memref<64x8xbf16, #tpu.memory_space<vmem>>, vector<64x8xbf16>
    %c0_1 = arith.constant 0 : index
    %c0_2 = arith.constant 0 : index
    %1 = vector.load %arg3[%c0_1, %c0_2] : memref<8x16xbf16, #tpu.memory_space<vmem>>, vector<8x16xbf16>
    %cst = arith.constant dense<0.000000e+00> : vector<64x16xf32>
    %2 = tpu.matmul %0, %1, %cst {dimension_numbers = #tpu.dot_dimension_numbers<[1], [0], [0], [1], [0, 0, 1, 1], [], []>} : vector<64x8xbf16>, vector<8x16xbf16>, vector<64x16xf32> -> vector<64x16xf32>
    %c0_3 = arith.constant 0 : index
    %c0_4 = arith.constant 0 : index
    %3 = vector.load %arg4[%c0_3, %c0_4] : memref<1x16xf32, #tpu.memory_space<vmem>>, vector<1x16xf32>
    %4 = vector.broadcast %3 : vector<1x16xf32> to vector<64x16xf32>
    %5 = arith.addf %2, %4 : vector<64x16xf32>
    %c0_5 = arith.constant 0 : index
    %c0_6 = arith.constant 0 : index
    %6 = vector.load %arg2[%c0_5, %c0_6] : memref<64x16xbf16, #tpu.memory_space<vmem>>, vector<64x16xbf16>
    %7 = arith.extf %6 : vector<64x16xbf16> to vector<64x16xf32>
    %8 = arith.addf %5, %7 : vector<64x16xf32>
    %cst_7 = arith.constant 0.000000e+00 : f32
    %9 = vector.broadcast %cst_7 : f32 to vector<64x16xf32>
    %10 = arith.maximumf %8, %9 : vector<64x16xf32>
    %11 = arith.truncf %10 : vector<64x16xf32> to vector<64x16xbf16>
    %c0_8 = arith.constant 0 : index
    %c0_9 = arith.constant 0 : index
    %12 = vector.load %arg5[%c0_8, %c0_9] : memref<64x16xbf16, #tpu.memory_space<vmem>>, vector<64x16xbf16>
    tpu.vector_store %arg5[%c0_8, %c0_9], %11 {strides = array<i32>} : memref<64x16xbf16, #tpu.memory_space<vmem>>, vector<64x16xbf16>,
    return
  }
  func.func @transform_0(%arg0: i32) -> (i32, i32) {
    %c0_i32 = arith.constant 0 : i32
    %c0_i32_0 = arith.constant 0 : i32
    return %arg0, %c0_i32 : i32, i32
  }
  func.func @transform_1(%arg0: i32) -> (i32, i32) {
    %c0_i32 = arith.constant 0 : i32
    %c0_i32_0 = arith.constant 0 : i32
    return %arg0, %c0_i32 : i32, i32
  }
  func.func @transform_2(%arg0: i32) -> (i32, i32) {
    %c0_i32 = arith.constant 0 : i32
    %c0_i32_0 = arith.constant 0 : i32
    %c0_i32_1 = arith.constant 0 : i32
    return %c0_i32, %c0_i32_0 : i32, i32
  }
  func.func @transform_3(%arg0: i32) -> (i32, i32) {
    %c0_i32 = arith.constant 0 : i32
    %c0_i32_0 = arith.constant 0 : i32
    %c0_i32_1 = arith.constant 0 : i32
    return %c0_i32, %c0_i32_0 : i32, i32
  }
  func.func @transform_4(%arg0: i32) -> (i32, i32) {
    %c0_i32 = arith.constant 0 : i32
    %c0_i32_0 = arith.constant 0 : i32
    return %arg0, %c0_i32 : i32, i32
  }
}

</mosaic_0001>

<bundles_post_ra>
// kernel: _lambda_.6
= control target key start
LH: loop header
LB: loop body
LE: loop exit
PB: predicated region body
PF: predicated region fallthrough
CT: control target
= control target key end

     0   :  { %s973_s12 = smov 0   ;;  %s1137_s0 = inlined_call_operand.vmem [shape: bf16[512,8], index: 0, kind: input, shape index: {}]   ;;  %s1138_s1 = inlined_call_operand.vmem [shape: bf16[8,8], index: 1, kind: input, shape index: {}]   ;;  %s1139_s2 = inlined_call_operand.vmem [shape: f32[1,8], index: 2, kind: input, shape index: {}]   ;;  %s1140_s3 = inlined_call_operand.vmem [shape: bf16[512,8], index: 3, kind: output, shape index: {}]  }
   0x1 LB: > { %s758_s13 = sadd.s32 4294967295, %s951_s12   ;;  %p762_p0 = scmp.ge.s32.totalorder %s951_s12, 1  ;;  %s951_s12 = sphi %s973_s12, %s13_s12  }
   0x2   : > { %p138_p1 = scmp.lt.s32.totalorder %s951_s12, 3 }
   0x4   : > { %p139_p2 = pnand %p762_p0, %p138_p1 }
   0x5   : > { %s763_s16 = sshll.u32 (!%p139_p2), %s758_s13, 5 }
   0x6   : > { %142 = sbr.rel (%p139_p2) target bundleno = 247 (0xf7), region = 32  ;;  %p163_p3 = scmp.lt.s32.totalorder (!%p139_p2), %s763_s16, 63 }
   0xb   : > { %v207_v0 = vld [vmem:[%s1138_s1] sm:$0xf]  ;;  %vm344_vm0 = vcmask 1043456   ;;  %s1142_s16 = smov (!%p163_p3, %s763_s16), 63  ;;  %vm295_vm1 = vcmask 64512   ;;  %vm669_vm2 = vcmask 60416  }
   0xc   : > { %919 = vmatprep.subr.msk.bf16.mxu0 %vm344_vm0, %v207_v0  ;;  %920 = vmatprep.subr.msk.bf16.mxu1 %vm344_vm0, %v207_v0  ;;  %v346_v1 = vsel %vm344_vm0, %v207_v0, 0  ;;  %s764_s17 = sshll.u32 %s1142_s16, 2  ;;  %v1029_v18 = vld [vmem:[%s1139_s2] ss:$0 sm:$0xff] }
   0xd   : > { %884 = vmatpush3.bf16.msra.mxu0 %v346_v1  ;;  %918 = vmatpush3.bf16.msra.mxu1 %v346_v1  ;;  %s992_s20 = scalar_lea.vmem %s1137_s0, %s764_s17  ;;  %s1039_s25 = scalar_lea.vmem %s1140_s3, %s764_s17 }
   0xe   : > { %v929_v2 = vld [vmem:[%s992_s20] sm:$0xff]   ;;  %v931_v4 = vld [vmem:[%s992_s20 + $0x8] sm:$0xff]   ;;  %v933_v6 = vld [vmem:[%s992_s20 + $0x10] sm:$0xff]  }
   0xf   : > { %v930_v3 = vld [vmem:[%s992_s20 + $0x40] sm:$0xff]   ;;  %885 = vmatprep.mubr.msk.bf16.mxu0 %vm295_vm1, %v929_v2  ;;  %v932_v5 = vld [vmem:[%s992_s20 + $0x48] sm:$0xff]   ;;  %v934_v7 = vld [vmem:[%s992_s20 + $0x50] sm:$0xff]  }
  0x10   : > { %901 = vmatprep.mubr.msk.bf16.mxu1 %vm295_vm1, %v930_v3  ;;  %886 = vmatmul.mubr.msk.bf16.vlgmr.msra.gmra.mxu0 %vm295_vm1, %v931_v4  ;;  %v935_v8 = vld [vmem:[%s992_s20 + $0x18] sm:$0xff]   ;;  %v937_v10 = vld [vmem:[%s992_s20 + $0x20] sm:$0xff]   ;;  %v939_v12 = vld [vmem:[%s992_s20 + $0x28] sm:$0xff]  }
  0x11   : > { %902 = vmatmul.mubr.msk.bf16.vlgmr.msra.gmra.mxu1 %vm295_vm1, %v932_v5  ;;  %889 = vmatprep.mubr.msk.bf16.mxu0 %vm295_vm1, %v933_v6  ;;  %v936_v9 = vld [vmem:[%s992_s20 + $0x58] sm:$0xff]   ;;  %v938_v11 = vld [vmem:[%s992_s20 + $0x60] sm:$0xff]   ;;  %v940_v13 = vld [vmem:[%s992_s20 + $0x68] sm:$0xff]  }
  0x12   : > { %905 = vmatprep.mubr.msk.bf16.mxu1 %vm295_vm1, %v934_v7  ;;  %v941_v14 = vld [vmem:[%s992_s20 + $0x30] sm:$0xff]   ;;  %v943_v16 = vld [vmem:[%s992_s20 + $0x38] sm:$0xff]  }
  0x13   : > { %v942_v15 = vld [vmem:[%s992_s20 + $0x70] sm:$0xff]   ;;  %v944_v17 = vld [vmem:[%s992_s20 + $0x78] sm:$0xff]  }
  0x18   : > { %890 = vmatmul.mubr.msk.bf16.gmra.mxu0 %vm295_vm1, %v935_v8 }
  0x19   : > { %906 = vmatmul.mubr.msk.bf16.gmra.mxu1 %vm295_vm1, %v936_v9  ;;  %893 = vmatprep.mubr.msk.bf16.mxu0 %vm295_vm1, %v937_v10 }
  0x1a   : > { %909 = vmatprep.mubr.msk.bf16.mxu1 %vm295_vm1, %v938_v11 }
  0x20   : > { %894 = vmatmul.mubr.msk.bf16.gmra.mxu0 %vm295_vm1, %v939_v12 }
  0x21   : > { %910 = vmatmul.mubr.msk.bf16.gmra.mxu1 %vm295_vm1, %v940_v13  ;;  %897 = vmatprep.mubr.msk.bf16.mxu0 %vm295_vm1, %v941_v14 }
  0x22   : > { %913 = vmatprep.mubr.msk.bf16.mxu1 %vm295_vm1, %v942_v15 }
  0x28   : > { %898 = vmatmul.mubr.msk.bf16.gmra.mxu0 %vm295_vm1, %v943_v16 }
  0x29   : > { %914 = vmatmul.mubr.msk.bf16.gmra.mxu1 %vm295_vm1, %v944_v17 }
  0xd0   : > { %v887_v19 = vpop.f32.mrf.mxu0 }
  0xd1   : > { %v391_v20 = vadd.f32 %v887_v19, %v1029_v18  ;;  %v903_v21 = vpop.f32.mrf.mxu1 }
  0xd2   : > { %v455_v22 = vadd.f32 %v903_v21, %v1029_v18  ;;  %v382_v23 = vpop.f32.mrf.mxu0 }
  0xd3   : > { %v511_v24 = vmax.f32 %v391_v20, 0.0  ;;  %v383_v25 = vadd.f32 %v1029_v18, %v382_v23  ;;  %v446_v26 = vpop.f32.mrf.mxu1 }
  0xd4   : > { %v527_v27 = vmax.f32 %v455_v22, 0.0  ;;  %v447_v28 = vadd.f32 %v1029_v18, %v446_v26  ;;  %v888_v29 = vpop.f32.mrf.mxu0 }
  0xd5   : > { %v836_v30 = vpack.c.bf16 %v511_v24, %v511_v24  ;;  %v509_v31 = vmax.f32 %v383_v25, 0.0  ;;  %v394_v32 = vadd.f32 %v888_v29, %v1029_v18  ;;  %v904_v33 = vpop.f32.mrf.mxu1 }
  0xd6   : > { %v852_v34 = vpack.c.bf16 %v527_v27, %v527_v27  ;;  %v525_v35 = vmax.f32 %v447_v28, 0.0  ;;  %v458_v36 = vadd.f32 %v904_v33, %v1029_v18  ;;  %v385_v37 = vpop.f32.mrf.mxu0 }
  0xd7   : > { %672 = vst.msk [vmem:[%s1039_s25 + $0x8] sm:$0xf] %vm669_vm2, %v836_v30  ;;  %v834_v38 = vpack.c.bf16 %v509_v31, %v509_v31  ;;  %v512_v39 = vmax.f32 %v394_v32, 0.0  ;;  %v386_v40 = vadd.f32 %v1029_v18, %v385_v37  ;;  %v449_v41 = vpop.f32.mrf.mxu1 }
  0xd8   : > { %688 = vst.msk [vmem:[%s1039_s25 + $0x48] sm:$0xf] %vm669_vm2, %v852_v34  ;;  %v850_v42 = vpack.c.bf16 %v525_v35, %v525_v35  ;;  %v528_v43 = vmax.f32 %v458_v36, 0.0  ;;  %v450_v44 = vadd.f32 %v1029_v18, %v449_v41  ;;  %v891_v45 = vpop.f32.mrf.mxu0 }
  0xd9   : > { %670 = vst.msk [vmem:[%s1039_s25] sm:$0xf] %vm669_vm2, %v834_v38  ;;  %v837_v46 = vpack.c.bf16 %v512_v39, %v512_v39  ;;  %v510_v47 = vmax.f32 %v386_v40, 0.0  ;;  %v407_v48 = vadd.f32 %v891_v45, %v1029_v18  ;;  %v907_v49 = vpop.f32.mrf.mxu1 }
  0xda   : > { %686 = vst.msk [vmem:[%s1039_s25 + $0x40] sm:$0xf] %vm669_vm2, %v850_v42  ;;  %v853_v50 = vpack.c.bf16 %v528_v43, %v528_v43  ;;  %v526_v51 = vmax.f32 %v450_v44, 0.0  ;;  %v471_v52 = vadd.f32 %v907_v49, %v1029_v18  ;;  %v398_v53 = vpop.f32.mrf.mxu0 }
  0xdb   : > { %673 = vst.msk [vmem:[%s1039_s25 + $0xc] sm:$0xf] %vm669_vm2, %v837_v46  ;;  %v835_v54 = vpack.c.bf16 %v510_v47, %v510_v47  ;;  %v515_v55 = vmax.f32 %v407_v48, 0.0  ;;  %v399_v56 = vadd.f32 %v1029_v18, %v398_v53  ;;  %v462_v57 = vpop.f32.mrf.mxu1 }
  0xdc   : > { %689 = vst.msk [vmem:[%s1039_s25 + $0x4c] sm:$0xf] %vm669_vm2, %v853_v50  ;;  %v851_v58 = vpack.c.bf16 %v526_v51, %v526_v51  ;;  %v531_v59 = vmax.f32 %v471_v52, 0.0  ;;  %v463_v60 = vadd.f32 %v1029_v18, %v462_v57  ;;  %v892_v61 = vpop.f32.mrf.mxu0 }
  0xdd   : > { %671 = vst.msk [vmem:[%s1039_s25 + $0x4] sm:$0xf] %vm669_vm2, %v835_v54  ;;  %v840_v62 = vpack.c.bf16 %v515_v55, %v515_v55  ;;  %v513_v63 = vmax.f32 %v399_v56, 0.0  ;;  %v410_v0 = vadd.f32 %v892_v61, %v1029_v18  ;;  %v908_v1 = vpop.f32.mrf.mxu1 }
  0xde   : > { %687 = vst.msk [vmem:[%s1039_s25 + $0x44] sm:$0xf] %vm669_vm2, %v851_v58  ;;  %v856_v2 = vpack.c.bf16 %v531_v59, %v531_v59  ;;  %v529_v3 = vmax.f32 %v463_v60, 0.0  ;;  %v474_v4 = vadd.f32 %v908_v1, %v1029_v18  ;;  %v401_v5 = vpop.f32.mrf.mxu0 }
  0xdf   : > { %676 = vst.msk [vmem:[%s1039_s25 + $0x18] sm:$0xf] %vm669_vm2, %v840_v62  ;;  %v838_v6 = vpack.c.bf16 %v513_v63, %v513_v63  ;;  %v516_v7 = vmax.f32 %v410_v0, 0.0  ;;  %v402_v8 = vadd.f32 %v1029_v18, %v401_v5  ;;  %v465_v9 = vpop.f32.mrf.mxu1 }
  0xe0   : > { %692 = vst.msk [vmem:[%s1039_s25 + $0x58] sm:$0xf] %vm669_vm2, %v856_v2  ;;  %v854_v10 = vpack.c.bf16 %v529_v3, %v529_v3  ;;  %v532_v11 = vmax.f32 %v474_v4, 0.0  ;;  %v466_v12 = vadd.f32 %v1029_v18, %v465_v9  ;;  %v895_v13 = vpop.f32.mrf.mxu0 }
  0xe1   : > { %674 = vst.msk [vmem:[%s1039_s25 + $0x10] sm:$0xf] %vm669_vm2, %v838_v6  ;;  %v841_v14 = vpack.c.bf16 %v516_v7, %v516_v7  ;;  %v514_v15 = vmax.f32 %v402_v8, 0.0  ;;  %v423_v16 = vadd.f32 %v895_v13, %v1029_v18  ;;  %v911_v17 = vpop.f32.mrf.mxu1 }
  0xe2   : > { %690 = vst.msk [vmem:[%s1039_s25 + $0x50] sm:$0xf] %vm669_vm2, %v854_v10  ;;  %v857_v19 = vpack.c.bf16 %v532_v11, %v532_v11  ;;  %v530_v20 = vmax.f32 %v466_v12, 0.0  ;;  %v487_v21 = vadd.f32 %v911_v17, %v1029_v18  ;;  %v414_v22 = vpop.f32.mrf.mxu0 }
  0xe3   : > { %677 = vst.msk [vmem:[%s1039_s25 + $0x1c] sm:$0xf] %vm669_vm2, %v841_v14  ;;  %v839_v23 = vpack.c.bf16 %v514_v15, %v514_v15  ;;  %v519_v24 = vmax.f32 %v423_v16, 0.0  ;;  %v415_v25 = vadd.f32 %v1029_v18, %v414_v22  ;;  %v478_v26 = vpop.f32.mrf.mxu1 }
  0xe4   : > { %693 = vst.msk [vmem:[%s1039_s25 + $0x5c] sm:$0xf] %vm669_vm2, %v857_v19  ;;  %v855_v27 = vpack.c.bf16 %v530_v20, %v530_v20  ;;  %v535_v28 = vmax.f32 %v487_v21, 0.0  ;;  %v479_v29 = vadd.f32 %v1029_v18, %v478_v26  ;;  %v896_v30 = vpop.f32.mrf.mxu0 }
  0xe5   : > { %675 = vst.msk [vmem:[%s1039_s25 + $0x14] sm:$0xf] %vm669_vm2, %v839_v23  ;;  %v844_v31 = vpack.c.bf16 %v519_v24, %v519_v24  ;;  %v517_v32 = vmax.f32 %v415_v25, 0.0  ;;  %v426_v33 = vadd.f32 %v896_v30, %v1029_v18  ;;  %v912_v34 = vpop.f32.mrf.mxu1 }
  0xe6   : > { %691 = vst.msk [vmem:[%s1039_s25 + $0x54] sm:$0xf] %vm669_vm2, %v855_v27  ;;  %v860_v35 = vpack.c.bf16 %v535_v28, %v535_v28  ;;  %v533_v36 = vmax.f32 %v479_v29, 0.0  ;;  %v490_v37 = vadd.f32 %v912_v34, %v1029_v18  ;;  %v417_v38 = vpop.f32.mrf.mxu0 }
  0xe7   : > { %680 = vst.msk [vmem:[%s1039_s25 + $0x28] sm:$0xf] %vm669_vm2, %v844_v31  ;;  %v842_v39 = vpack.c.bf16 %v517_v32, %v517_v32  ;;  %v520_v40 = vmax.f32 %v426_v33, 0.0  ;;  %v418_v41 = vadd.f32 %v1029_v18, %v417_v38  ;;  %v481_v42 = vpop.f32.mrf.mxu1 }
  0xe8   : > { %696 = vst.msk [vmem:[%s1039_s25 + $0x68] sm:$0xf] %vm669_vm2, %v860_v35  ;;  %v858_v43 = vpack.c.bf16 %v533_v36, %v533_v36  ;;  %v536_v44 = vmax.f32 %v490_v37, 0.0  ;;  %v482_v45 = vadd.f32 %v1029_v18, %v481_v42  ;;  %v899_v46 = vpop.f32.mrf.mxu0 }
  0xe9   : > { %678 = vst.msk [vmem:[%s1039_s25 + $0x20] sm:$0xf] %vm669_vm2, %v842_v39  ;;  %v845_v47 = vpack.c.bf16 %v520_v40, %v520_v40  ;;  %v518_v48 = vmax.f32 %v418_v41, 0.0  ;;  %v439_v49 = vadd.f32 %v899_v46, %v1029_v18  ;;  %v915_v50 = vpop.f32.mrf.mxu1 }
  0xea   : > { %694 = vst.msk [vmem:[%s1039_s25 + $0x60] sm:$0xf] %vm669_vm2, %v858_v43  ;;  %v861_v51 = vpack.c.bf16 %v536_v44, %v536_v44  ;;  %v534_v52 = vmax.f32 %v482_v45, 0.0  ;;  %v503_v53 = vadd.f32 %v915_v50, %v1029_v18  ;;  %v430_v54 = vpop.f32.mrf.mxu0 }
  0xeb   : > { %681 = vst.msk [vmem:[%s1039_s25 + $0x2c] sm:$0xf] %vm669_vm2, %v845_v47  ;;  %v843_v55 = vpack.c.bf16 %v518_v48, %v518_v48  ;;  %v523_v56 = vmax.f32 %v439_v49, 0.0  ;;  %v431_v57 = vadd.f32 %v1029_v18, %v430_v54  ;;  %v494_v58 = vpop.f32.mrf.mxu1 }
  0xec   : > { %697 = vst.msk [vmem:[%s1039_s25 + $0x6c] sm:$0xf] %vm669_vm2, %v861_v51  ;;  %v859_v59 = vpack.c.bf16 %v534_v52, %v534_v52  ;;  %v539_v60 = vmax.f32 %v503_v53, 0.0  ;;  %v495_v61 = vadd.f32 %v1029_v18, %v494_v58  ;;  %v900_v62 = vpop.f32.mrf.mxu0 }
  0xed   : > { %679 = vst.msk [vmem:[%s1039_s25 + $0x24] sm:$0xf] %vm669_vm2, %v843_v55  ;;  %v848_v63 = vpack.c.bf16 %v523_v56, %v523_v56  ;;  %v521_v0 = vmax.f32 %v431_v57, 0.0  ;;  %v442_v1 = vadd.f32 %v900_v62, %v1029_v18  ;;  %v916_v2 = vpop.f32.mrf.mxu1 }
  0xee   : > { %695 = vst.msk [vmem:[%s1039_s25 + $0x64] sm:$0xf] %vm669_vm2, %v859_v59  ;;  %v864_v3 = vpack.c.bf16 %v539_v60, %v539_v60  ;;  %v537_v4 = vmax.f32 %v495_v61, 0.0  ;;  %v506_v5 = vadd.f32 %v916_v2, %v1029_v18  ;;  %v433_v6 = vpop.f32.mrf.mxu0 }
  0xef   : > { %684 = vst.msk [vmem:[%s1039_s25 + $0x38] sm:$0xf] %vm669_vm2, %v848_v63  ;;  %v846_v7 = vpack.c.bf16 %v521_v0, %v521_v0  ;;  %v524_v8 = vmax.f32 %v442_v1, 0.0  ;;  %v434_v9 = vadd.f32 %v1029_v18, %v433_v6  ;;  %v497_v10 = vpop.f32.mrf.mxu1 }
  0xf0   : > { %700 = vst.msk [vmem:[%s1039_s25 + $0x78] sm:$0xf] %vm669_vm2, %v864_v3  ;;  %v862_v11 = vpack.c.bf16 %v537_v4, %v537_v4  ;;  %v540_v12 = vmax.f32 %v506_v5, 0.0  ;;  %v498_v13 = vadd.f32 %v1029_v18, %v497_v10 }
  0xf1   : > { %682 = vst.msk [vmem:[%s1039_s25 + $0x30] sm:$0xf] %vm669_vm2, %v846_v7  ;;  %v849_v14 = vpack.c.bf16 %v524_v8, %v524_v8  ;;  %v522_v15 = vmax.f32 %v434_v9, 0.0 }
  0xf2   : > { %698 = vst.msk [vmem:[%s1039_s25 + $0x70] sm:$0xf] %vm669_vm2, %v862_v11  ;;  %v865_v16 = vpack.c.bf16 %v540_v12, %v540_v12  ;;  %v538_v17 = vmax.f32 %v498_v13, 0.0 }
  0xf3   : > { %685 = vst.msk [vmem:[%s1039_s25 + $0x3c] sm:$0xf] %vm669_vm2, %v849_v14  ;;  %v847_v19 = vpack.c.bf16 %v522_v15, %v522_v15 }
  0xf4   : > { %701 = vst.msk [vmem:[%s1039_s25 + $0x7c] sm:$0xf] %vm669_vm2, %v865_v16  ;;  %v863_v20 = vpack.c.bf16 %v538_v17, %v538_v17 }
  0xf5   : > { %683 = vst.msk [vmem:[%s1039_s25 + $0x34] sm:$0xf] %vm669_vm2, %v847_v19 }
  0xf6   : > { %699 = vst.msk [vmem:[%s1039_s25 + $0x74] sm:$0xf] %vm669_vm2, %v863_v20 }
  0xf7 PF: > { %s13_s12 = sadd.s32 1, %s951_s12  }
  0xf8   : > { %p10_p4 = scmp.ge.s32.totalorder %s13_s12, 4  }
  0xfa   :  { %12 = sbr.rel (!%p10_p4) target bundleno = 1 (0x1), region = 62 }

// kernel: _lambda_.9
= control target key start
LH: loop header
LB: loop body
LE: loop exit
PB: predicated region body
PF: predicated region fallthrough
CT: control target
= control target key end

     0   :  { %s496_s12 = smov 0   ;;  %s537_s0 = inlined_call_operand.vmem [shape: bf16[128,16], index: 0, kind: input, shape index: {}]   ;;  %s538_s1 = inlined_call_operand.vmem [shape: bf16[16,8], index: 1, kind: input, shape index: {}]   ;;  %s539_s2 = inlined_call_operand.vmem [shape: f32[1,8], index: 2, kind: input, shape index: {}]   ;;  %s540_s3 = inlined_call_operand.vmem [shape: bf16[128,8], index: 3, kind: output, shape index: {}]  }
   0x1 LB: > { %s401_s13 = sadd.s32 4294967295, %s474_s12   ;;  %p405_p0 = scmp.ge.s32.totalorder %s474_s12, 1  ;;  %s474_s12 = sphi %s496_s12, %s13_s12  }
   0x2   : > { %p138_p1 = scmp.lt.s32.totalorder %s474_s12, 3 }
   0x4   : > { %p139_p2 = pnand %p405_p0, %p138_p1 }
   0x5   : > { %s406_s16 = sshll.u32 (!%p139_p2), %s401_s13, 3 }
   0x6   : > { %142 = sbr.rel (%p139_p2) target bundleno = 222 (0xde), region = 32  ;;  %p163_p3 = scmp.lt.s32.totalorder (!%p139_p2), %s406_s16, 15 }
   0xb   : > { %v463_v0 = vld [vmem:[%s538_s1] sm:$0xff]   ;;  %s542_s16 = smov (!%p163_p3, %s406_s16), 15  ;;  %vm218_vm0 = vcmask 130048   ;;  %vm336_vm1 = vcmask 60416  }
   0xc   : > { %443 = vmatprep.subr.bf16.mxu0 %v463_v0  ;;  %453 = vmatprep.subr.bf16.mxu1 %v463_v0  ;;  %s407_s17 = sshll.u32 %s542_s16, 2  ;;  %v410_v5 = vld [vmem:[%s539_s2] ss:$0 sm:$0xff] }
   0xd   : > { %444 = vmatpush3.bf16.msra.mxu0 %v463_v0  ;;  %454 = vmatpush3.bf16.msra.mxu1 %v463_v0  ;;  %s166_s20 = scalar_lea.vmem %s537_s0, %s407_s17  ;;  %s516_s25 = scalar_lea.vmem %s540_s3, %s407_s17 }
   0xe   : > { %v464_v1 = vld [vmem:[%s166_s20] sm:$0xff]   ;;  %v465_v2 = vld [vmem:[%s166_s20 + $0x10] sm:$0xff]   ;;  %v466_v3 = vld [vmem:[%s166_s20 + $0x8] sm:$0xff]  }
   0xf   : > { %445 = vmatprep.mubr.msk.bf16.mxu0 %vm218_vm0, %v464_v1  ;;  %449 = vmatprep.mubr.msk.bf16.mxu1 %vm218_vm0, %v465_v2  ;;  %v467_v4 = vld [vmem:[%s166_s20 + $0x18] sm:$0xff]  }
  0x10   : > { %446 = vmatmul.mubr.msk.bf16.vlgmr.msra.gmra.mxu0 %vm218_vm0, %v466_v3  ;;  %450 = vmatmul.mubr.msk.bf16.vlgmr.msra.gmra.mxu1 %vm218_vm0, %v467_v4 }
  0xd0   : > { %v447_v6 = vpop.f32.mrf.mxu0  ;;  %v451_v8 = vpop.f32.mrf.mxu1 }
  0xd1   : > { %v274_v7 = vadd.f32 %v447_v6, %v410_v5  ;;  %v290_v9 = vadd.f32 %v451_v8, %v410_v5 }
  0xd2   : > { %v265_v10 = vpop.f32.mrf.mxu0  ;;  %v281_v13 = vpop.f32.mrf.mxu1 }
  0xd3   : > { %v298_v11 = vmax.f32 %v274_v7, 0.0  ;;  %v266_v12 = vadd.f32 %v410_v5, %v265_v10  ;;  %v302_v14 = vmax.f32 %v290_v9, 0.0  ;;  %v282_v15 = vadd.f32 %v410_v5, %v281_v13 }
  0xd4   : > { %v448_v16 = vpop.f32.mrf.mxu0  ;;  %v452_v20 = vpop.f32.mrf.mxu1 }
  0xd5   : > { %v432_v17 = vpack.c.bf16 %v298_v11, %v298_v11  ;;  %v296_v18 = vmax.f32 %v266_v12, 0.0  ;;  %v277_v19 = vadd.f32 %v448_v16, %v410_v5  ;;  %v436_v21 = vpack.c.bf16 %v302_v14, %v302_v14 }
  0xd6   : > { %v300_v22 = vmax.f32 %v282_v15, 0.0  ;;  %v293_v23 = vadd.f32 %v452_v20, %v410_v5  ;;  %v268_v24 = vpop.f32.mrf.mxu0  ;;  %v284_v28 = vpop.f32.mrf.mxu1 }
  0xd7   : > { %339 = vst.msk [vmem:[%s516_s25 + $0x8] sm:$0xf] %vm336_vm1, %v432_v17  ;;  %v430_v25 = vpack.c.bf16 %v296_v18, %v296_v18  ;;  %v299_v26 = vmax.f32 %v277_v19, 0.0  ;;  %v269_v27 = vadd.f32 %v410_v5, %v268_v24  ;;  %343 = vst.msk [vmem:[%s516_s25 + $0x18] sm:$0xf] %vm336_vm1, %v436_v21  ;;  %v285_v31 = vadd.f32 %v410_v5, %v284_v28 }
  0xd8   : > { %v434_v29 = vpack.c.bf16 %v300_v22, %v300_v22  ;;  %v303_v30 = vmax.f32 %v293_v23, 0.0 }
  0xd9   : > { %337 = vst.msk [vmem:[%s516_s25] sm:$0xf] %vm336_vm1, %v430_v25  ;;  %v433_v32 = vpack.c.bf16 %v299_v26, %v299_v26  ;;  %v297_v33 = vmax.f32 %v269_v27, 0.0  ;;  %v301_v35 = vmax.f32 %v285_v31, 0.0 }
  0xda   : > { %341 = vst.msk [vmem:[%s516_s25 + $0x10] sm:$0xf] %vm336_vm1, %v434_v29  ;;  %v437_v34 = vpack.c.bf16 %v303_v30, %v303_v30 }
  0xdb   : > { %340 = vst.msk [vmem:[%s516_s25 + $0xc] sm:$0xf] %vm336_vm1, %v433_v32  ;;  %v431_v36 = vpack.c.bf16 %v297_v33, %v297_v33  ;;  %v435_v37 = vpack.c.bf16 %v301_v35, %v301_v35 }
  0xdc   : > { %344 = vst.msk [vmem:[%s516_s25 + $0x1c] sm:$0xf] %vm336_vm1, %v437_v34 }
  0xdd   : > { %338 = vst.msk [vmem:[%s516_s25 + $0x4] sm:$0xf] %vm336_vm1, %v431_v36  ;;  %342 = vst.msk [vmem:[%s516_s25 + $0x14] sm:$0xf] %vm336_vm1, %v435_v37 }
  0xde PF: > { %s13_s12 = sadd.s32 1, %s474_s12  }
  0xdf   : > { %p10_p4 = scmp.ge.s32.totalorder %s13_s12, 4  }
  0xe1   :  { %12 = sbr.rel (!%p10_p4) target bundleno = 1 (0x1), region = 62 }

// kernel: _lambda_.8
= control target key start
LH: loop header
LB: loop body
LE: loop exit
PB: predicated region body
PF: predicated region fallthrough
CT: control target
= control target key end

     0   :  { %s783_s21 = smov 0   ;;  %s846_s0 = inlined_call_operand.vmem [shape: bf16[128,8], index: 0, kind: input, shape index: {}]   ;;  %s847_s1 = inlined_call_operand.vmem [shape: bf16[128,8], index: 1, kind: input, shape index: {}]   ;;  %s848_s2 = inlined_call_operand.vmem [shape: bf16[8,16], index: 2, kind: input, shape index: {}]   ;;  %s849_s3 = inlined_call_operand.vmem [shape: f32[1,16], index: 3, kind: input, shape index: {}]   ;;  %s850_s4 = inlined_call_operand.vmem [shape: bf16[8,16], index: 4, kind: input, shape index: {}]   ;;  %s851_s5 = inlined_call_operand.vmem [shape: f32[1,16], index: 5, kind: input, shape index: {}]   ;;  %s852_s6 = inlined_call_operand.vmem [shape: bf16[128,16], index: 6, kind: output, shape index: {}]  }
   0x1 LB: > { %s645_s22 = sadd.s32 4294967295, %s746_s21   ;;  %p649_p0 = scmp.ge.s32.totalorder %s746_s21, 1  ;;  %s746_s21 = sphi %s783_s21, %s16_s21  }
   0x2   : > { %p224_p1 = scmp.lt.s32.totalorder %s746_s21, 3 }
   0x4   : > { %p225_p2 = pnand %p649_p0, %p224_p1 }
   0x5   : > { %s650_s27 = sshll.u32 (!%p225_p2), %s645_s22, 3 }
   0x6   : > { %228 = sbr.rel (%p225_p2) target bundleno = 234 (0xea), region = 44  ;;  %p260_p3 = scmp.lt.s32.totalorder (!%p225_p2), %s650_s27, 15 }
   0xb   : > { %v286_v0 = vld [vmem:[%s848_s2] sm:$0xf]  ;;  %vm327_vm0 = vcmask 1043456   ;;  %s854_s27 = smov (!%p260_p3, %s650_s27), 15  ;;  %vm314_vm1 = vcmask 64512   ;;  %vm568_vm2 = vcmask 125952  }
   0xc   : > { %v404_v1 = vld [vmem:[%s850_s4] sm:$0xf]  ;;  %722 = vmatprep.subr.msk.bf16.mxu0 %vm327_vm0, %v286_v0  ;;  %v329_v2 = vsel %vm327_vm0, %v286_v0, 0  ;;  %s797_s28 = sshll.u32 %s854_s27, 2 }
   0xd   : > { %723 = vmatprep.subr.msk.bf16.mxu1 %vm327_vm0, %v404_v1  ;;  %v438_v3 = vsel %vm327_vm0, %v404_v1, 0  ;;  %703 = vmatpush3.bf16.msra.mxu0 %v329_v2  ;;  %s263_s7 = scalar_lea.vmem %s846_s0, %s797_s28  ;;  %s269_s10 = scalar_lea.vmem %s847_s1, %s797_s28  ;;  %v656_v12 = vld [vmem:[%s849_s3] ss:$0 sm:$0xff] }
   0xe   : > { %713 = vmatpush3.bf16.msra.mxu1 %v438_v3  ;;  %v732_v4 = vld [vmem:[%s263_s7] sm:$0xff]   ;;  %v734_v6 = vld [vmem:[%s263_s7 + $0x8] sm:$0xff]   ;;  %v736_v8 = vld [vmem:[%s263_s7 + $0x10] sm:$0xff]   ;;  %s825_s17 = scalar_lea.vmem %s852_s6, %s797_s28 }
   0xf   : > { %v733_v5 = vld [vmem:[%s269_s10] sm:$0xff]   ;;  %704 = vmatprep.mubr.msk.bf16.mxu0 %vm314_vm1, %v732_v4  ;;  %v735_v7 = vld [vmem:[%s269_s10 + $0x8] sm:$0xff]   ;;  %v737_v9 = vld [vmem:[%s269_s10 + $0x10] sm:$0xff]  }
  0x10   : > { %714 = vmatprep.mubr.msk.bf16.mxu1 %vm314_vm1, %v733_v5  ;;  %705 = vmatmul.mubr.msk.bf16.vlgmr.msra.gmra.mxu0 %vm314_vm1, %v734_v6  ;;  %v738_v10 = vld [vmem:[%s263_s7 + $0x18] sm:$0xff]   ;;  %v673_v16 = vld [vmem:[%s851_s5] ss:$0 sm:$0xff] }
  0x11   : > { %715 = vmatmul.mubr.msk.bf16.vlgmr.msra.gmra.mxu1 %vm314_vm1, %v735_v7  ;;  %708 = vmatprep.mubr.msk.bf16.mxu0 %vm314_vm1, %v736_v8  ;;  %v739_v11 = vld [vmem:[%s269_s10 + $0x18] sm:$0xff]  }
  0x12   : > { %718 = vmatprep.mubr.msk.bf16.mxu1 %vm314_vm1, %v737_v9 }
  0x18   : > { %709 = vmatmul.mubr.msk.bf16.gmra.mxu0 %vm314_vm1, %v738_v10 }
  0x19   : > { %719 = vmatmul.mubr.msk.bf16.gmra.mxu1 %vm314_vm1, %v739_v11 }
  0xd0   : > { %v706_v13 = vpop.f32.mrf.mxu0 }
  0xd1   : > { %v374_v14 = vadd.f32 %v706_v13, %v656_v12  ;;  %v716_v15 = vpop.f32.mrf.mxu1 }
  0xd2   : > { %v365_v17 = vpop.f32.mrf.mxu0 }
  0xd3   : > { %v507_v18 = vadd.f32 %v716_v15, %v374_v14  ;;  %v366_v19 = vadd.f32 %v656_v12, %v365_v17  ;;  %v474_v20 = vpop.f32.mrf.mxu1 }
  0xd4   : > { %v707_v21 = vpop.f32.mrf.mxu0 }
  0xd5   : > { %v522_v22 = vadd.f32 %v673_v16, %v507_v18  ;;  %v505_v23 = vadd.f32 %v474_v20, %v366_v19  ;;  %v377_v24 = vadd.f32 %v707_v21, %v656_v12  ;;  %v717_v25 = vpop.f32.mrf.mxu1 }
  0xd6   : > { %v368_v26 = vpop.f32.mrf.mxu0 }
  0xd7   : > { %v530_v27 = vmax.f32 %v522_v22, 0.0  ;;  %v520_v28 = vadd.f32 %v673_v16, %v505_v23  ;;  %v508_v29 = vadd.f32 %v717_v25, %v377_v24  ;;  %v369_v30 = vadd.f32 %v656_v12, %v368_v26  ;;  %v477_v31 = vpop.f32.mrf.mxu1 }
  0xd8   : > { %v710_v32 = vpop.f32.mrf.mxu0 }
  0xd9   : > { %v686_v33 = vpack.c.bf16 %v530_v27, %v530_v27  ;;  %v528_v34 = vmax.f32 %v520_v28, 0.0  ;;  %v523_v35 = vadd.f32 %v673_v16, %v508_v29  ;;  %v506_v36 = vadd.f32 %v477_v31, %v369_v30  ;;  %v720_v37 = vpop.f32.mrf.mxu1 }
  0xda   : > { %v390_v38 = vadd.f32 %v710_v32, %v656_v12  ;;  %v381_v39 = vpop.f32.mrf.mxu0 }
  0xdb   : > { %571 = vst.msk [vmem:[%s825_s17 + $0x8] sm:$0xf] %vm568_vm2, %v686_v33  ;;  %v684_v40 = vpack.c.bf16 %v528_v34, %v528_v34  ;;  %v531_v41 = vmax.f32 %v523_v35, 0.0  ;;  %v521_v42 = vadd.f32 %v673_v16, %v506_v36  ;;  %v382_v43 = vadd.f32 %v656_v12, %v381_v39  ;;  %v490_v44 = vpop.f32.mrf.mxu1 }
  0xdc   : > { %v511_v45 = vadd.f32 %v720_v37, %v390_v38  ;;  %v711_v46 = vpop.f32.mrf.mxu0 }
  0xdd   : > { %569 = vst.msk [vmem:[%s825_s17] sm:$0xf] %vm568_vm2, %v684_v40  ;;  %v687_v47 = vpack.c.bf16 %v531_v41, %v531_v41  ;;  %v529_v48 = vmax.f32 %v521_v42, 0.0  ;;  %v509_v49 = vadd.f32 %v490_v44, %v382_v43  ;;  %v393_v50 = vadd.f32 %v711_v46, %v656_v12  ;;  %v721_v51 = vpop.f32.mrf.mxu1 }
  0xde   : > { %v526_v52 = vadd.f32 %v673_v16, %v511_v45  ;;  %v384_v53 = vpop.f32.mrf.mxu0 }
  0xdf   : > { %572 = vst.msk [vmem:[%s825_s17 + $0xc] sm:$0xf] %vm568_vm2, %v687_v47  ;;  %v685_v54 = vpack.c.bf16 %v529_v48, %v529_v48  ;;  %v524_v55 = vadd.f32 %v673_v16, %v509_v49  ;;  %v512_v56 = vadd.f32 %v721_v51, %v393_v50  ;;  %v385_v57 = vadd.f32 %v656_v12, %v384_v53  ;;  %v493_v59 = vpop.f32.mrf.mxu1 }
  0xe0   : > { %v534_v58 = vmax.f32 %v526_v52, 0.0 }
  0xe1   : > { %570 = vst.msk [vmem:[%s825_s17 + $0x4] sm:$0xf] %vm568_vm2, %v685_v54  ;;  %v532_v60 = vmax.f32 %v524_v55, 0.0  ;;  %v527_v61 = vadd.f32 %v673_v16, %v512_v56  ;;  %v510_v62 = vadd.f32 %v493_v59, %v385_v57 }
  0xe2   : > { %v690_v63 = vpack.c.bf16 %v534_v58, %v534_v58 }
  0xe3   : > { %v688_v0 = vpack.c.bf16 %v532_v60, %v532_v60  ;;  %v535_v1 = vmax.f32 %v527_v61, 0.0  ;;  %v525_v2 = vadd.f32 %v673_v16, %v510_v62 }
  0xe4   : > { %575 = vst.msk [vmem:[%s825_s17 + $0x18] sm:$0xf] %vm568_vm2, %v690_v63 }
  0xe5   : > { %573 = vst.msk [vmem:[%s825_s17 + $0x10] sm:$0xf] %vm568_vm2, %v688_v0  ;;  %v691_v3 = vpack.c.bf16 %v535_v1, %v535_v1  ;;  %v533_v4 = vmax.f32 %v525_v2, 0.0 }
  0xe7   : > { %576 = vst.msk [vmem:[%s825_s17 + $0x1c] sm:$0xf] %vm568_vm2, %v691_v3  ;;  %v689_v5 = vpack.c.bf16 %v533_v4, %v533_v4 }
  0xe9   : > { %574 = vst.msk [vmem:[%s825_s17 + $0x14] sm:$0xf] %vm568_vm2, %v689_v5 }
  0xea PF: > { %s16_s21 = sadd.s32 1, %s746_s21  }
  0xeb   : > { %p13_p4 = scmp.ge.s32.totalorder %s16_s21, 4  }
  0xed   :  { %15 = sbr.rel (!%p13_p4) target bundleno = 1 (0x1), region = 77 }

// kernel: _lambda_.11
= control target key start
LH: loop header
LB: loop body
LE: loop exit
PB: predicated region body
PF: predicated region fallthrough
CT: control target
= control target key end

     0   :  { %s604_s15 = smov 0   ;;  %s653_s0 = inlined_call_operand.vmem [shape: bf16[128,8], index: 0, kind: input, shape index: {}]   ;;  %s654_s1 = inlined_call_operand.vmem [shape: bf16[128,16], index: 1, kind: input, shape index: {}]   ;;  %s655_s2 = inlined_call_operand.vmem [shape: bf16[8,16], index: 2, kind: input, shape index: {}]   ;;  %s656_s3 = inlined_call_operand.vmem [shape: f32[1,16], index: 3, kind: input, shape index: {}]   ;;  %s657_s4 = inlined_call_operand.vmem [shape: bf16[128,16], index: 4, kind: output, shape index: {}]  }
   0x1 LB: > { %s483_s16 = sadd.s32 4294967295, %s577_s15   ;;  %p487_p0 = scmp.ge.s32.totalorder %s577_s15, 1  ;;  %s577_s15 = sphi %s604_s15, %s14_s15  }
   0x2   : > { %p174_p1 = scmp.lt.s32.totalorder %s577_s15, 3 }
   0x4   : > { %p175_p2 = pnand %p487_p0, %p174_p1 }
   0x5   : > { %s488_s19 = sshll.u32 (!%p175_p2), %s483_s16, 3 }
   0x6   : > { %178 = sbr.rel (%p175_p2) target bundleno = 225 (0xe1), region = 36  ;;  %p206_p3 = scmp.lt.s32.totalorder (!%p175_p2), %s488_s19, 15 }
   0xb   : > { %v232_v0 = vld [vmem:[%s655_s2] sm:$0xf]  ;;  %vm273_vm0 = vcmask 1043456   ;;  %s659_s19 = smov (!%p206_p3, %s488_s19), 15  ;;  %vm260_vm1 = vcmask 64512   ;;  %vm406_vm2 = vcmask 125952  }
   0xc   : > { %557 = vmatprep.subr.msk.bf16.mxu0 %vm273_vm0, %v232_v0  ;;  %558 = vmatprep.subr.msk.bf16.mxu1 %vm273_vm0, %v232_v0  ;;  %v275_v1 = vsel %vm273_vm0, %v232_v0, 0  ;;  %s615_s20 = sshll.u32 %s659_s19, 2  ;;  %v494_v8 = vld [vmem:[%s656_s3] ss:$0 sm:$0xff] }
   0xd   : > { %546 = vmatpush3.bf16.msra.mxu0 %v275_v1  ;;  %556 = vmatpush3.bf16.msra.mxu1 %v275_v1  ;;  %s209_s23 = scalar_lea.vmem %s653_s0, %s615_s20  ;;  %s215_s26 = scalar_lea.vmem %s654_s1, %s615_s20 }
   0xe   : > { %v567_v2 = vld [vmem:[%s209_s23] sm:$0xff]   ;;  %v568_v3 = vld [vmem:[%s209_s23 + $0x10] sm:$0xff]   ;;  %v569_v4 = vld [vmem:[%s209_s23 + $0x8] sm:$0xff]   ;;  %s632_s5 = scalar_lea.vmem %s657_s4, %s615_s20 }
   0xf   : > { %547 = vmatprep.mubr.msk.bf16.mxu0 %vm260_vm1, %v567_v2  ;;  %551 = vmatprep.mubr.msk.bf16.mxu1 %vm260_vm1, %v568_v3  ;;  %v570_v5 = vld [vmem:[%s209_s23 + $0x18] sm:$0xff]   ;;  %v537_v6 = vld [vmem:[%s215_s26 + $0x8] sm:$0xff]   ;;  %v522_v9 = vld [vmem:[%s215_s26] sm:$0xff]  }
  0x10   : > { %548 = vmatmul.mubr.msk.bf16.vlgmr.msra.gmra.mxu0 %vm260_vm1, %v569_v4  ;;  %552 = vmatmul.mubr.msk.bf16.vlgmr.msra.gmra.mxu1 %vm260_vm1, %v570_v5  ;;  %v539_v7 = vld [vmem:[%s215_s26 + $0x18] sm:$0xff]   ;;  %v527_v10 = vunpack.c.l.bf16 %v537_v6  ;;  %v538_v11 = vld [vmem:[%s215_s26 + $0x10] sm:$0xff]   ;;  %v523_v16 = vunpack.c.l.bf16 %v522_v9  ;;  %v528_v23 = vunpack.c.h.bf16 %v537_v6  ;;  %v524_v32 = vunpack.c.h.bf16 %v522_v9 }
  0x11   : > { %v535_v13 = vunpack.c.l.bf16 %v539_v7  ;;  %v531_v19 = vunpack.c.l.bf16 %v538_v11  ;;  %v536_v27 = vunpack.c.h.bf16 %v539_v7  ;;  %v532_v37 = vunpack.c.h.bf16 %v538_v11 }
  0xd0   : > { %v549_v12 = vpop.f32.mrf.mxu0  ;;  %v553_v15 = vpop.f32.mrf.mxu1 }
  0xd1   : > { %v320_v14 = vadd.f32 %v549_v12, %v494_v8  ;;  %v336_v17 = vadd.f32 %v553_v15, %v494_v8 }
  0xd2   : > { %v311_v18 = vpop.f32.mrf.mxu0  ;;  %v327_v22 = vpop.f32.mrf.mxu1 }
  0xd3   : > { %v360_v20 = vadd.f32 %v527_v10, %v320_v14  ;;  %v312_v21 = vadd.f32 %v494_v8, %v311_v18  ;;  %v364_v24 = vadd.f32 %v535_v13, %v336_v17  ;;  %v328_v25 = vadd.f32 %v494_v8, %v327_v22 }
  0xd4   : > { %v550_v26 = vpop.f32.mrf.mxu0  ;;  %v554_v31 = vpop.f32.mrf.mxu1 }
  0xd5   : > { %v368_v28 = vmax.f32 %v360_v20, 0.0  ;;  %v358_v29 = vadd.f32 %v523_v16, %v312_v21  ;;  %v323_v30 = vadd.f32 %v550_v26, %v494_v8  ;;  %v372_v33 = vmax.f32 %v364_v24, 0.0 }
  0xd6   : > { %v362_v34 = vadd.f32 %v531_v19, %v328_v25  ;;  %v339_v35 = vadd.f32 %v554_v31, %v494_v8  ;;  %v314_v36 = vpop.f32.mrf.mxu0  ;;  %v330_v42 = vpop.f32.mrf.mxu1 }
  0xd7   : > { %v515_v38 = vpack.c.bf16 %v368_v28, %v368_v28  ;;  %v366_v39 = vmax.f32 %v358_v29, 0.0  ;;  %v361_v40 = vadd.f32 %v528_v23, %v323_v30  ;;  %v315_v41 = vadd.f32 %v494_v8, %v314_v36 }
  0xd8   : > { %v519_v43 = vpack.c.bf16 %v372_v33, %v372_v33  ;;  %v370_v44 = vmax.f32 %v362_v34, 0.0  ;;  %v365_v45 = vadd.f32 %v536_v27, %v339_v35  ;;  %v331_v46 = vadd.f32 %v494_v8, %v330_v42 }
  0xd9   : > { %409 = vst.msk [vmem:[%s632_s5 + $0x8] sm:$0xf] %vm406_vm2, %v515_v38  ;;  %v513_v47 = vpack.c.bf16 %v366_v39, %v366_v39  ;;  %v369_v48 = vmax.f32 %v361_v40, 0.0  ;;  %v359_v49 = vadd.f32 %v524_v32, %v315_v41 }
  0xda   : > { %413 = vst.msk [vmem:[%s632_s5 + $0x18] sm:$0xf] %vm406_vm2, %v519_v43  ;;  %v517_v50 = vpack.c.bf16 %v370_v44, %v370_v44  ;;  %v373_v51 = vmax.f32 %v365_v45, 0.0  ;;  %v363_v52 = vadd.f32 %v532_v37, %v331_v46 }
  0xdb   : > { %407 = vst.msk [vmem:[%s632_s5] sm:$0xf] %vm406_vm2, %v513_v47  ;;  %v516_v53 = vpack.c.bf16 %v369_v48, %v369_v48  ;;  %v367_v54 = vmax.f32 %v359_v49, 0.0 }
  0xdc   : > { %411 = vst.msk [vmem:[%s632_s5 + $0x10] sm:$0xf] %vm406_vm2, %v517_v50  ;;  %v520_v55 = vpack.c.bf16 %v373_v51, %v373_v51  ;;  %v371_v56 = vmax.f32 %v363_v52, 0.0 }
  0xdd   : > { %410 = vst.msk [vmem:[%s632_s5 + $0xc] sm:$0xf] %vm406_vm2, %v516_v53  ;;  %v514_v57 = vpack.c.bf16 %v367_v54, %v367_v54 }
  0xde   : > { %414 = vst.msk [vmem:[%s632_s5 + $0x1c] sm:$0xf] %vm406_vm2, %v520_v55  ;;  %v518_v58 = vpack.c.bf16 %v371_v56, %v371_v56 }
  0xdf   : > { %408 = vst.msk [vmem:[%s632_s5 + $0x4] sm:$0xf] %vm406_vm2, %v514_v57 }
  0xe0   : > { %412 = vst.msk [vmem:[%s632_s5 + $0x14] sm:$0xf] %vm406_vm2, %v518_v58 }
  0xe1 PF: > { %s14_s15 = sadd.s32 1, %s577_s15  }
  0xe2   : > { %p11_p4 = scmp.ge.s32.totalorder %s14_s15, 4  }
  0xe4   :  { %13 = sbr.rel (!%p11_p4) target bundleno = 1 (0x1), region = 69 }

// kernel: _lambda_.7
= control target key start
LH: loop header
LB: loop body
LE: loop exit
PB: predicated region body
PF: predicated region fallthrough
CT: control target
= control target key end

     0   :  { %s4068_s24 = smov 0   ;;  %s5038_s0 = inlined_call_operand.vmem [shape: bf16[2,4,9,9,8], index: 0, kind: input, shape index: {}]   ;;  %s5039_s1 = inlined_call_operand.vmem [shape: f32[9,2,4,4], index: 1, kind: input, shape index: {}]   ;;  %s5040_s2 = inlined_call_operand.vmem [shape: f32[1,8], index: 2, kind: input, shape index: {}]   ;;  %s5041_s3 = inlined_call_operand.vmem [shape: f32[8,2], index: 3, kind: input, shape index: {}]   ;;  %s5042_s4 = inlined_call_operand.vmem [shape: f32[1,2], index: 4, kind: input, shape index: {}]   ;;  %s5043_s5 = inlined_call_operand.vmem [shape: f32[2,8], index: 5, kind: input, shape index: {}]   ;;  %s5044_s6 = inlined_call_operand.vmem [shape: f32[1,8], index: 6, kind: input, shape index: {}]   ;;  %s5045_s7 = inlined_call_operand.vmem [shape: bf16[2,64,8], index: 7, kind: output, shape index: {}]  }
   0x1 LB: > { %s3240_s25 = sadd.s32 4294967295, %s4022_s24   ;;  %p3244_p0 = scmp.ge.s32.totalorder %s4022_s24, 1  ;;  %s4022_s24 = sphi %s4068_s24, %s17_s24  }
   0x2   : > { %p237_p1 = scmp.lt.s32.totalorder %s4022_s24, 3 }
   0x4   : > { %p238_p2 = pnand %p3244_p0, %p237_p1 }
   0x6   : > { %241 = sbr.rel (%p238_p2) target bundleno = 1035 (0x40b), region = 48 }
   0xb   : > { %p269_p3 = scmp.lt.s32.totalorder %s3240_s25, 1  ;;  %v3249_v0 = vld [vmem:[%s5039_s1 + $0x8] sm:$0xf]  ;;  %vm411_vm0 = vcmask 1043456   ;;  %v381_v1 = vld [vmem:[%s5039_s1] sm:$0xf] }
   0xc   : > { %3617 = vmatprep.subr.msk.mxu0 %vm411_vm0, %v3249_v0  ;;  %v3248_v2 = vld [vmem:[%s5039_s1 + $0x4] sm:$0xf]  ;;  %3631 = vmatprep.subr.msk.mxu1 %vm411_vm0, %v381_v1  ;;  %vm942_vm1 = vcmask 1046528   ;;  %vm386_vm2 = vcmask 31744   ;;  %v4135_v27 = vld [vmem:[%s5039_s1 + $0x14] sm:$0xf] }
   0xd   : > { %s5129_s25 = smov (!%p269_p3, %s3240_s25), 1  ;;  %3618 = vmatpush3.msk.msra.mxu0 %vm411_vm0, %v3249_v0  ;;  %3632 = vmatpush3.msk.msra.mxu1 %vm411_vm0, %v381_v1  ;;  %s4024_s15 = smov 124   ;;  %vm4027_vm3 = vmmov 0   ;;  %vm3052_vm4 = vcmask 1041408   ;;  %vm2946_vm5 = vcmask 64512   ;;  %vm3048_vm6 = vcmask 15360  }
   0xe   : > { %s3879_s9 = smul.u32 288, %s5129_s25  ;;  %3659 = vmatprep.subr.msk.mxu1 %vm411_vm0, %v3248_v2  ;;  %s4025_s23 = smov 4   ;;  %vm3176_vm7 = vcmask 60416  }
   0xf   : > { %s3442_s13 = sshll.u32 %s5129_s25, 5 }
  0x10   : > { %s4096_s12 = scalar_lea.vmem %s5038_s0, %s3879_s9  ;;  %s278_s16 = scalar_lea.vmem %s5045_s7, %s3442_s13 }
  0x11   : > { %v287_v3 = vld [vmem:[%s4096_s12 + $0x20] ss:$8 sps:$4 sm:$0xff]   ;;  %v291_v5 = vld [vmem:[%s4096_s12 + $0x30] ss:$8 sps:$4 sm:$0xff]   ;;  %v284_v11 = vld [vmem:[%s4096_s12 + $0x14] sm:$0x1] }
  0x12   : > { %v279_v4 = vld [vmem:[%s4096_s12] ss:$8 sps:$4 sm:$0xff]   ;;  %v4101_v6 = vunpack.c.l.bf16 %v287_v3  ;;  %v4103_v7 = vunpack.c.h.bf16 %v287_v3  ;;  %v283_v10 = vld [vmem:[%s4096_s12 + $0x10] ss:$8 sps:$4 sm:$0xff]   ;;  %v286_v12 = vld [vmem:[%s4096_s12 + $0x1c] sm:$0x1]  ;;  %v4110_v13 = vunpack.c.l.bf16 %v291_v5  ;;  %v4112_v14 = vunpack.c.h.bf16 %v291_v5 }
  0x13   : > { %v330_v8 = vunpack.c.l.bf16 %v279_v4  ;;  %v4105_v9 = vunpack.c.h.bf16 %v279_v4  ;;  %v4114_v15 = vunpack.c.l.bf16 %v283_v10  ;;  %v4116_v16 = vunpack.c.h.bf16 %v283_v10  ;;  %v292_v17 = vld [vmem:[%s4096_s12 + $0x34] sm:$0x1]  ;;  %v294_v18 = vld [vmem:[%s4096_s12 + $0x3c] sm:$0x1]  ;;  %v280_v32 = vld [vmem:[%s4096_s12 + $0x4] sm:$0x1] }
  0x14   : > { %v3902_v19 = vpack.i.bf16 %v4103_v7, %v4101_v6  ;;  %v335_v21 = vunpack.c.l.bf16 %v284_v11  ;;  %v337_v22 = vunpack.c.l.bf16 %v286_v12  ;;  %v3907_v23 = vpack.i.bf16 %v4112_v14, %v4110_v13  ;;  %v282_v33 = vld [vmem:[%s4096_s12 + $0xc] sm:$0x1]  ;;  %v310_v40 = vld [vmem:[%s4096_s12 + $0xa0] ss:$8 sps:$4 sm:$0xff]   ;;  %v288_v43 = vld [vmem:[%s4096_s12 + $0x24] sm:$0x1] }
  0x15   : > { %v3892_v20 = vpack.i.bf16 %v4105_v9, %v330_v8  ;;  %3633 = vmatprep.mubr.msk.f32.mxu1 %vm386_vm2, %v330_v8  ;;  %v3897_v24 = vpack.i.bf16 %v4116_v16, %v4114_v15  ;;  %v949_v25 = vrot.slane %v4114_v15, 1  ;;  %v952_v26 = vrot.slane %v4116_v16, 1  ;;  %v290_v47 = vld [vmem:[%s4096_s12 + $0x2c] sm:$0x1]  ;;  %v4175_v54 = vld [vmem:[%s4096_s12 + $0x48] ss:$8 sps:$4 sm:$0xff]  }
  0x16   : > { %3634 = vmatmul.mubr.msk.f32.vlgmr.msra.gmra.mxu1 %vm386_vm2, %v4105_v9  ;;  %3903 = vrot.lane.b32.xlu1 %v3902_v19, %s4024_s15  ;;  %v950_v28 = vrot.slane %v335_v21, 1  ;;  %v953_v29 = vrot.slane %v337_v22, 1  ;;  %v343_v30 = vunpack.c.l.bf16 %v292_v17  ;;  %v345_v31 = vunpack.c.l.bf16 %v294_v18  ;;  %v306_v59 = vld [vmem:[%s4096_s12 + $0x90] ss:$8 sps:$4 sm:$0xff]   ;;  %v318_v1 = vld [vmem:[%s4096_s12 + $0xc0] ss:$8 sps:$4 sm:$0xff]  }
  0x17   : > { %3893 = vrot.lane.b32.xlu0 %v3892_v20, %s4024_s15  ;;  %v961_v34 = vrot.slane %v4110_v13, 1  ;;  %v964_v35 = vrot.slane %v4112_v14, 1  ;;  %3660 = vmatpush3.msk.msra.mxu1 %vm411_vm0, %v3248_v2  ;;  %v331_v41 = vunpack.c.l.bf16 %v280_v32  ;;  %v333_v42 = vunpack.c.l.bf16 %v282_v33  ;;  %v299_v0 = vld [vmem:[%s4096_s12 + $0x58] ss:$8 sps:$4 sm:$0xff]   ;;  %v3268_v32 = vld [vmem:[%s5039_s1 + $0xc] sm:$0xf] }
  0x18   : > { %3636 = vmatprep.mubr.msk.f32.mxu1 %vm386_vm2, %v4114_v15  ;;  %v4147_v36 = vsel %vm942_vm1, %v949_v25, %v950_v28  ;;  %v4150_v37 = vsel %vm942_vm1, %v952_v26, %v953_v29  ;;  %v962_v38 = vrot.slane %v343_v30, 1  ;;  %v965_v39 = vrot.slane %v345_v31, 1  ;;  %3687 = vmatprep.subr.msk.mxu1 %vm411_vm0, %v4135_v27  ;;  %v314_v18 = vld [vmem:[%s4096_s12 + $0xb0] ss:$8 sps:$4 sm:$0xff]  }
  0x19   : > { %v3917_v44 = vpack.i.bf16 %v4150_v37, %v4147_v36  ;;  %v943_v45 = vrot.slane %v330_v8, 1  ;;  %v946_v46 = vrot.slane %v4105_v9, 1  ;;  %v944_v50 = vrot.slane %v331_v41, 1  ;;  %v4249_v31 = vld [vmem:[%s4096_s12 + $0xd8] ss:$8 sps:$4 sm:$0xff]   ;;  %3645 = vmatprep.subr.msk.mxu0 %vm411_vm0, %v3268_v32 }
  0x1a   : > { %3637 = vmatmul.mubr.msk.f32.gmra.mxu1 %vm386_vm2, %v4116_v16  ;;  %3908 = vrot.lane.b32.xlu1 %v3907_v23, %s4024_s15  ;;  %v4165_v48 = vsel %vm942_vm1, %v961_v34, %v962_v38  ;;  %v4168_v49 = vsel %vm942_vm1, %v964_v35, %v965_v39  ;;  %v947_v51 = vrot.slane %v333_v42, 1  ;;  %v4172_v52 = vunpack.c.l.bf16 %v310_v40  ;;  %v301_v23 = vld [vmem:[%s4096_s12 + $0x68] ss:$8 sps:$4 sm:$0xff]   ;;  %v303_v38 = vld [vmem:[%s4096_s12 + $0x78] ss:$8 sps:$4 sm:$0xff]  }
  0x1b   : > { %3898 = vrot.lane.b32.xlu0 %v3897_v24, %s4024_s15  ;;  %3639 = vmatprep.mubr.msk.f32.mxu1 %vm386_vm2, %v4101_v6  ;;  %v339_v53 = vunpack.c.l.bf16 %v288_v43  ;;  %v4178_v55 = vsel %vm942_vm1, %v943_v45, %v944_v50  ;;  %v341_v57 = vunpack.c.l.bf16 %v290_v47  ;;  %v955_v58 = vrot.slane %v4101_v6, 1  ;;  %v4233_v24 = vld [vmem:[%s4096_s12 + $0xe8] ss:$8 sps:$4 sm:$0xff]   ;;  %v309_v47 = vld [vmem:[%s4096_s12 + $0x9c] sm:$0x1] }
  0x1c   : > { %v4181_v56 = vsel %vm942_vm1, %v946_v46, %v947_v51  ;;  %v3927_v60 = vpack.i.bf16 %v4168_v49, %v4165_v48  ;;  %v4190_v61 = vunpack.c.h.bf16 %v310_v40  ;;  %v958_v2 = vrot.slane %v4103_v7, 1  ;;  %v307_v46 = vld [vmem:[%s4096_s12 + $0x94] sm:$0x1] }
  0x1d   : > { %v3912_v62 = vpack.i.bf16 %v4181_v56, %v4178_v55  ;;  %v956_v63 = vrot.slane %v339_v53, 1  ;;  %v959_v3 = vrot.slane %v341_v57, 1  ;;  %v348_v4 = vunpack.c.l.bf16 %v4175_v54  ;;  %v4299_v57 = vld [vmem:[%s4096_s12 + $0x108] ss:$8 sps:$4 sm:$0xff]  }
  0x1e   : > { %3640 = vmatmul.mubr.msk.f32.gmra.mxu1 %vm386_vm2, %v4103_v7  ;;  %3918 = vrot.lane.b32.xlu1 %v3917_v44, %s4024_s15  ;;  %v4205_v8 = vunpack.c.h.bf16 %v4175_v54  ;;  %v4207_v10 = vunpack.c.l.bf16 %v306_v59  ;;  %v4212_v12 = vunpack.c.l.bf16 %v299_v0  ;;  %v4214_v17 = vunpack.c.h.bf16 %v306_v59  ;;  %v4276_v44 = vld [vmem:[%s4096_s12 + $0xf8] ss:$8 sps:$4 sm:$0xff]  }
  0x1f   : > { %3642 = vmatprep.mubr.msk.f32.mxu1 %vm386_vm2, %v4110_v13  ;;  %3913 = vrot.lane.b32.xlu0 %v3912_v62, %s4024_s15  ;;  %v4202_v5 = vsel %vm942_vm1, %v955_v58, %v956_v63  ;;  %v4210_v11 = vsel %vm942_vm1, %v958_v2, %v959_v3  ;;  %v3937_v19 = vpack.i.bf16 %v4190_v61, %v4172_v52  ;;  %v4223_v20 = vunpack.c.l.bf16 %v318_v1  ;;  %v313_v63 = vld [vmem:[%s4096_s12 + $0xac] sm:$0x1] }
  0x20   : > { %5080 = vst [vmem:[#allocation2_spill] sm:$0xff] %v4212_v12  ;;  %3619 = vmatprep.mubr.msk.f32.mxu0 %vm386_vm2, %v348_v4  ;;  %v4225_v21 = vunpack.c.h.bf16 %v318_v1  ;;  %v3922_v22 = vpack.i.bf16 %v4210_v11, %v4202_v5  ;;  %v4238_v25 = vunpack.c.h.bf16 %v299_v0  ;;  %v3932_v26 = vpack.i.bf16 %v4214_v17, %v4207_v10 }
  0x21   : > { %3620 = vmatmul.mubr.msk.f32.vlgmr.msra.gmra.mxu0 %vm386_vm2, %v4205_v8  ;;  %v4242_v28 = vunpack.c.l.bf16 %v314_v18  ;;  %v4244_v29 = vunpack.c.h.bf16 %v314_v18  ;;  %v4246_v30 = vunpack.c.l.bf16 %v301_v23  ;;  %v5054_v34 = vunpack.c.l.bf16 %v4233_v24 }
  0x22   : > { %3643 = vmatmul.mubr.msk.f32.gmra.mxu1 %vm386_vm2, %v4112_v14  ;;  %3928 = vrot.lane.b32.xlu1 %v3927_v60, %s4024_s15  ;;  %5081 = vst [vmem:[#allocation3_spill] sm:$0xff] %v4238_v25  ;;  %v3947_v33 = vpack.i.bf16 %v4225_v21, %v4223_v20  ;;  %v5051_v35 = vunpack.c.h.bf16 %v4233_v24  ;;  %v4266_v39 = vunpack.c.h.bf16 %v301_v23  ;;  %v5061_v41 = vunpack.c.l.bf16 %v4249_v31  ;;  %v311_v60 = vld [vmem:[%s4096_s12 + $0xa4] sm:$0x1] }
  0x23   : > { %3622 = vmatprep.mubr.msk.f32.mxu0 %vm386_vm2, %v4212_v12  ;;  %3923 = vrot.lane.b32.xlu0 %v3922_v22, %s4024_s15  ;;  %5082 = vst [vmem:[#allocation4_spill] sm:$0xff] %v4246_v30  ;;  %v3942_v40 = vpack.i.bf16 %v4244_v29, %v4242_v28  ;;  %v5059_v42 = vunpack.c.h.bf16 %v4249_v31  ;;  %v4273_v43 = vunpack.c.l.bf16 %v303_v38  ;;  %v4289_v50 = vunpack.c.h.bf16 %v303_v38 }
  0x24   : > { %5083 = vst [vmem:[#allocation5_spill] sm:$0xff] %v4266_v39  ;;  %3646 = vmatpush3.msk.msra.mxu0 %vm411_vm0, %v3268_v32  ;;  %v3957_v45 = vpack.i.bf16 %v5051_v35, %v5054_v34  ;;  %v5050_v53 = vunpack.c.l.bf16 %v4276_v44  ;;  %v5049_v54 = vunpack.c.h.bf16 %v4276_v44  ;;  %v358_v58 = vunpack.c.l.bf16 %v307_v46 }
  0x25   : > { %3623 = vmatmul.mubr.msk.f32.gmra.mxu0 %vm386_vm2, %v4238_v25  ;;  %5084 = vst [vmem:[#allocation6_spill] sm:$0xff] %v4273_v43  ;;  %5085 = vst [vmem:[#allocation7_spill] sm:$0xff] %v4289_v50  ;;  %v3952_v51 = vpack.i.bf16 %v5059_v42, %v5061_v41  ;;  %v360_v59 = vunpack.c.l.bf16 %v309_v47  ;;  %v3967_v62 = vpack.i.bf16 %v4205_v8, %v348_v4  ;;  %v5047_v0 = vunpack.c.l.bf16 %v4299_v57  ;;  %v319_v4 = vld [vmem:[%s4096_s12 + $0xc4] sm:$0x1] }
  0x26   : > { %3938 = vrot.lane.b32.xlu1 %v3937_v19, %s4024_s15  ;;  %3625 = vmatprep.mubr.msk.f32.mxu0 %vm386_vm2, %v4246_v30  ;;  %v5046_v1 = vunpack.c.h.bf16 %v4299_v57  ;;  %v3962_v2 = vpack.i.bf16 %v5049_v54, %v5050_v53  ;;  %v1843_v3 = vrot.slane %v4207_v10, 1  ;;  %v362_v18 = vunpack.c.l.bf16 %v311_v60  ;;  %v321_v19 = vld [vmem:[%s4096_s12 + $0xcc] sm:$0x1] }
  0x27   : > { %3933 = vrot.lane.b32.xlu0 %v3932_v26, %s4024_s15  ;;  %v1844_v22 = vrot.slane %v358_v58, 1  ;;  %v1846_v23 = vrot.slane %v4214_v17, 1  ;;  %v1847_v26 = vrot.slane %v360_v59, 1  ;;  %v364_v32 = vunpack.c.l.bf16 %v313_v63 }
  0x28   : > { %v3977_v38 = vpack.i.bf16 %v4238_v25, %v4212_v12  ;;  %v370_v46 = vunpack.c.l.bf16 %v319_v4  ;;  %v372_v47 = vunpack.c.l.bf16 %v321_v19  ;;  %v1850_v58 = vrot.slane %v362_v18, 1 }
  0x29   : > { %3626 = vmatmul.mubr.msk.f32.gmra.mxu0 %vm386_vm2, %v4266_v39  ;;  %v1852_v59 = vrot.slane %v4190_v61, 1  ;;  %v4336_v63 = vsel %vm942_vm1, %v1843_v3, %v1844_v22  ;;  %v1853_v4 = vrot.slane %v364_v32, 1  ;;  %v1861_v18 = vrot.slane %v4223_v20, 1 }
  0x2a   : > { %3948 = vrot.lane.b32.xlu1 %v3947_v33, %s4024_s15  ;;  %3628 = vmatprep.mubr.msk.f32.mxu0 %vm386_vm2, %v4273_v43  ;;  %v315_v33 = vld [vmem:[%s4096_s12 + $0xb4] sm:$0x1]  ;;  %v1865_v3 = vrot.slane %v372_v47, 1 }
  0x2b   : > { %3943 = vrot.lane.b32.xlu0 %v3942_v40, %s4024_s15  ;;  %v317_v40 = vld [vmem:[%s4096_s12 + $0xbc] sm:$0x1]  ;;  %v366_v60 = vunpack.c.l.bf16 %v315_v33  ;;  %v1862_v33 = vrot.slane %v370_v46, 1  ;;  %v4356_v32 = vsel %vm942_vm1, %v1852_v59, %v1853_v4 }
  0x2c   : > { %v368_v19 = vunpack.c.l.bf16 %v317_v40  ;;  %v1858_v40 = vrot.slane %v4244_v29, 1 }
  0x2d   : > { %3629 = vmatmul.mubr.msk.f32.gmra.mxu0 %vm386_vm2, %v4289_v50  ;;  %v4363_v47 = vsel %vm942_vm1, %v1861_v18, %v1862_v33 }
  0x2e   : > { %3958 = vrot.lane.b32.xlu1 %v3957_v45, %s4024_s15  ;;  %v3972_v45 = vpack.i.bf16 %v5046_v1, %v5047_v0  ;;  %v4339_v1 = vsel %vm942_vm1, %v1846_v23, %v1847_v26  ;;  %v1864_v0 = vrot.slane %v4225_v21, 1  ;;  %v1855_v26 = vrot.slane %v4242_v28, 1 }
  0x2f   : > { %3953 = vrot.lane.b32.xlu0 %v3952_v51, %s4024_s15  ;;  %v1849_v51 = vrot.slane %v4172_v52, 1  ;;  %v3982_v22 = vpack.i.bf16 %v4339_v1, %v4336_v63  ;;  %v1859_v46 = vrot.slane %v368_v19, 1  ;;  %v296_v19 = vld [vmem:[%s4096_s12 + $0x44] sm:$0x1] }
  0x30   : > { %v347_v18 = vunpack.c.l.bf16 %v296_v19 }
  0x31   : > { %v4352_v23 = vsel %vm942_vm1, %v1849_v51, %v1850_v58  ;;  %v4366_v51 = vsel %vm942_vm1, %v1864_v0, %v1865_v3 }
  0x32   : > { %3968 = vrot.lane.b32.xlu1 %v3967_v62, %s4024_s15  ;;  %v4333_v62 = vld [vmem:[%s5039_s1 + $0x10] sm:$0xf]  ;;  %v3992_v58 = vpack.i.bf16 %v4356_v32, %v4352_v23  ;;  %v4007_v4 = vpack.i.bf16 %v4366_v51, %v4363_v47 }
  0x33   : > { %3963 = vrot.lane.b32.xlu0 %v3962_v2, %s4024_s15  ;;  %3673 = vmatprep.subr.msk.mxu0 %vm411_vm0, %v4333_v62  ;;  %v3987_v2 = vpack.i.bf16 %v4266_v39, %v4246_v30 }
  0x36   : > { %3978 = vrot.lane.b32.xlu1 %v3977_v38, %s4024_s15  ;;  %v1856_v38 = vrot.slane %v366_v60, 1  ;;  %v4375_v60 = vsel %vm942_vm1, %v1858_v40, %v1859_v46 }
  0x37   : > { %3973 = vrot.lane.b32.xlu0 %v3972_v45, %s4024_s15  ;;  %v3997_v45 = vpack.i.bf16 %v4289_v50, %v4273_v43 }
  0x38   : > { %v4372_v59 = vsel %vm942_vm1, %v1855_v26, %v1856_v38  ;;  %v2639_v26 = vrot.slane %v347_v18, 1 }
  0x39   : > { %v4002_v0 = vpack.i.bf16 %v4375_v60, %v4372_v59 }
  0x3a   : > { %3988 = vrot.lane.b32.xlu1 %v3987_v2, %s4024_s15  ;;  %v4385_v2 = vld [vmem:[%s4096_s12 + $0x40] ss:$72 sps:$4 sm:$0xff]  }
  0x3b   : > { %3983 = vrot.lane.b32.xlu0 %v3982_v22, %s4024_s15  ;;  %5086 = vst [vmem:[#allocation8_spill] sm:$0xff] %v4385_v2  ;;  %v5048_v33 = vunpack.c.h.bf16 %v4385_v2  ;;  %v4390_v3 = vunpack.c.l.bf16 %v4385_v2 }
  0x3d   : > { %v2638_v22 = vrot.slane %v4390_v3, 1 }
  0x3e   : > { %3998 = vrot.lane.b32.xlu1 %v3997_v45, %s4024_s15 }
  0x3f   : > { %3993 = vrot.lane.b32.xlu0 %v3992_v58, %s4024_s15  ;;  %v4400_v38 = vsel %vm942_vm1, %v2638_v22, %v2639_v26 }
  0x40   : > { %5087 = vst [vmem:[#allocation9_spill] sm:$0xff] %v4400_v38 }
  0x42   : > { %4008 = vrot.lane.b32.xlu1 %v4007_v4, %s4024_s15  ;;  %v3317_v4 = vld [vmem:[%s5039_s1 + $0x1c] sm:$0xf] }
  0x43   : > { %4003 = vrot.lane.b32.xlu0 %v4002_v0, %s4024_s15 }
  0x46   : > { %2517 = vrot.lane.b32.xlu1 %v5048_v33, %s4024_s15 }
  0x47   : > { %2274 = vrot.lane.b32.xlu0 %v4390_v3, %s4024_s15 }
  0x4b   : > { %2763 = vrot.lane.b32.xlu0 %v4400_v38, %s4024_s15 }
  0x88   : > { %v4404_v40 = vpop.permute.xlu1 %3903 }
  0x89   : > { %v4406_v46 = vpop.permute.xlu0 %3893  ;;  %v5055_v18 = vunpack.i.l.bf16 %v4404_v40 }
  0x8a   : > { %v5056_v45 = vunpack.i.h.bf16 %v4406_v46  ;;  %v3895_v58 = vunpack.i.l.bf16 %v4406_v46 }
  0x8c   : > { %3661 = vmatprep.mubr.msk.f32.mxu1 %vm386_vm2, %v3895_v58  ;;  %v4414_v19 = vpop.permute.xlu1 %3908  ;;  %v5057_v58 = vunpack.i.h.bf16 %v4404_v40 }
  0x8d   : > { %v4416_v0 = vpop.permute.xlu0 %3898  ;;  %3662 = vmatmul.mubr.msk.f32.vlgmr.msra.gmra.mxu1 %vm386_vm2, %v5056_v45  ;;  %v5058_v54 = vunpack.i.l.bf16 %v4414_v19  ;;  %v5060_v53 = vunpack.i.h.bf16 %v4414_v19 }
  0x8e   : > { %v5052_v22 = vunpack.i.h.bf16 %v4416_v0  ;;  %v5053_v26 = vunpack.i.l.bf16 %v4416_v0  ;;  %3688 = vmatpush3.msk.msra.mxu1 %vm411_vm0, %v4135_v27 }
  0x8f   : > { %3715 = vmatprep.subr.msk.mxu1 %vm411_vm0, %v3317_v4 }
  0x90   : > { %3664 = vmatprep.mubr.msk.f32.mxu1 %vm386_vm2, %v5053_v26  ;;  %v4431_v33 = vpop.permute.xlu1 %3918 }
  0x91   : > { %3665 = vmatmul.mubr.msk.f32.gmra.mxu1 %vm386_vm2, %v5052_v22  ;;  %v4440_v27 = vpop.permute.xlu0 %3913 }
  0x92   : > { %3667 = vmatprep.mubr.msk.f32.mxu1 %vm386_vm2, %v5055_v18  ;;  %v3915_v22 = vunpack.i.l.bf16 %v4440_v27  ;;  %v5062_v34 = vunpack.i.h.bf16 %v4440_v27  ;;  %v5063_v18 = vunpack.i.l.bf16 %v4431_v33 }
  0x94   : > { %v4443_v35 = vpop.permute.xlu1 %3928 }
  0x95   : > { %3668 = vmatmul.mubr.msk.f32.gmra.mxu1 %vm386_vm2, %v5057_v58  ;;  %v4458_v45 = vpop.permute.xlu0 %3923  ;;  %v3337_v58 = vld [vmem:[%s5039_s1 + $0x24] sm:$0xf]  ;;  %v5088_v43 = vunpack.i.h.bf16 %v4443_v35 }
  0x96   : > { %3670 = vmatprep.mubr.msk.f32.mxu1 %vm386_vm2, %v5058_v54  ;;  %v5067_v54 = vunpack.i.h.bf16 %v4431_v33  ;;  %v5069_v41 = vunpack.i.h.bf16 %v4458_v45 }
  0x98   : > { %v3939_v26 = vpop.permute.xlu1 %3938 }
  0x99   : > { %3671 = vmatmul.mubr.msk.f32.gmra.mxu1 %vm386_vm2, %v5060_v53  ;;  %v3940_v39 = vunpack.i.l.bf16 %v3939_v26 }
  0x9a   : > { %3689 = vmatprep.mubr.msk.f32.mxu1 %vm386_vm2, %v3915_v22  ;;  %v5068_v22 = vunpack.i.l.bf16 %v4458_v45 }
  0x9c   : > { %v4464_v42 = vpop.permute.xlu1 %3948 }
  0x9d   : > { %3690 = vmatmul.mubr.msk.f32.vlgmr.msra.gmra.mxu1 %vm386_vm2, %v5062_v34  ;;  %v5072_v34 = vunpack.i.l.bf16 %v4443_v35 }
  0x9e   : > { %3716 = vmatpush3.msk.msra.mxu1 %vm411_vm0, %v3317_v4  ;;  %3692 = vmatprep.mubr.msk.f32.mxu1 %vm386_vm2, %v5063_v18  ;;  %v3934_v4 = vpop.permute.xlu0 %3933 }
  0x9f   : > { %3743 = vmatprep.subr.msk.mxu1 %vm411_vm0, %v3337_v58 }
  0xa0   : > { %v4475_v53 = vpop.permute.xlu1 %3958 }
  0xa1   : > { %3693 = vmatmul.mubr.msk.f32.gmra.mxu1 %vm386_vm2, %v5067_v54  ;;  %v3935_v54 = vunpack.i.l.bf16 %v3934_v4 }
  0xa2   : > { %3695 = vmatprep.mubr.msk.f32.mxu1 %vm386_vm2, %v5068_v22  ;;  %v3307_v22 = vld [vmem:[%s5039_s1 + $0x18] sm:$0xf]  ;;  %v3944_v30 = vpop.permute.xlu0 %3943 }
  0xa4   : > { %v4486_v38 = vpop.permute.xlu1 %3968 }
  0xa5   : > { %3696 = vmatmul.mubr.msk.f32.gmra.mxu1 %vm386_vm2, %v5069_v41  ;;  %v5074_v2 = vunpack.i.h.bf16 %v4486_v38  ;;  %v3970_v50 = vunpack.i.l.bf16 %v4486_v38  ;;  %v3936_v41 = vunpack.i.h.bf16 %v3934_v4  ;;  %v3941_v4 = vunpack.i.h.bf16 %v3939_v26 }
  0xa6   : > { %3698 = vmatprep.mubr.msk.f32.mxu1 %vm386_vm2, %v5072_v34  ;;  %v3954_v25 = vpop.permute.xlu0 %3953 }
  0xa7   : > { %3647 = vmatprep.mubr.msk.f32.mxu0 %vm386_vm2, %v3970_v50 }
  0xa8   : > { %v4500_v18 = vpop.permute.xlu1 %3978  ;;  %3648 = vmatmul.mubr.msk.f32.vlgmr.msra.gmra.mxu0 %vm386_vm2, %v5074_v2 }
  0xa9   : > { %3699 = vmatmul.mubr.msk.f32.gmra.mxu1 %vm386_vm2, %v5088_v43  ;;  %v5077_v34 = vunpack.i.h.bf16 %v4500_v18  ;;  %v5075_v50 = vunpack.i.l.bf16 %v4500_v18  ;;  %3674 = vmatpush3.msk.msra.mxu0 %vm411_vm0, %v4333_v62  ;;  %v3357_v43 = vld [vmem:[%s5039_s1 + $0x2c] sm:$0xf] }
  0xaa   : > { %3717 = vmatprep.mubr.msk.f32.mxu1 %vm386_vm2, %v3935_v54  ;;  %3701 = vmatprep.subr.msk.mxu0 %vm411_vm0, %v3307_v22  ;;  %v3964_v12 = vpop.permute.xlu0 %3963 }
  0xab   : > { %3650 = vmatprep.mubr.msk.f32.mxu0 %vm386_vm2, %v5075_v50  ;;  %v3945_v50 = vunpack.i.l.bf16 %v3944_v30 }
  0xac   : > { %v4520_v2 = vpop.permute.xlu1 %3988  ;;  %3651 = vmatmul.mubr.msk.f32.gmra.mxu0 %vm386_vm2, %v5077_v34 }
  0xad   : > { %3718 = vmatmul.mubr.msk.f32.vlgmr.msra.gmra.mxu1 %vm386_vm2, %v3936_v41  ;;  %v3991_v54 = vunpack.i.h.bf16 %v4520_v2  ;;  %v5079_v62 = vunpack.i.l.bf16 %v4520_v2  ;;  %v3946_v41 = vunpack.i.h.bf16 %v3944_v30  ;;  %v3955_v30 = vunpack.i.l.bf16 %v3954_v25 }
  0xae   : > { %3744 = vmatpush3.msk.msra.mxu1 %vm411_vm0, %v3337_v58  ;;  %3720 = vmatprep.mubr.msk.f32.mxu1 %vm386_vm2, %v3940_v39  ;;  %v3950_v58 = vunpack.i.l.bf16 %v4464_v42 }
  0xaf   : > { %3771 = vmatprep.subr.msk.mxu1 %vm411_vm0, %v3357_v43  ;;  %3653 = vmatprep.mubr.msk.f32.mxu0 %vm386_vm2, %v5079_v62  ;;  %v3951_v62 = vunpack.i.h.bf16 %v4464_v42  ;;  %v3327_v42 = vld [vmem:[%s5039_s1 + $0x20] sm:$0xf] }
  0xb0   : > { %v4534_v26 = vpop.permute.xlu1 %3998  ;;  %3654 = vmatmul.mubr.msk.f32.gmra.mxu0 %vm386_vm2, %v3991_v54 }
  0xb1   : > { %3721 = vmatmul.mubr.msk.f32.gmra.mxu1 %vm386_vm2, %v3941_v4  ;;  %v4001_v39 = vunpack.i.h.bf16 %v4534_v26  ;;  %v4000_v34 = vunpack.i.l.bf16 %v4534_v26  ;;  %v3974_v4 = vpop.permute.xlu0 %3973 }
  0xb2   : > { %3723 = vmatprep.mubr.msk.f32.mxu1 %vm386_vm2, %v3945_v50  ;;  %v3956_v50 = vunpack.i.h.bf16 %v3954_v25  ;;  %v3377_v25 = vld [vmem:[%s5039_s1 + $0x34] sm:$0xf] }
  0xb3   : > { %3656 = vmatprep.mubr.msk.f32.mxu0 %vm386_vm2, %v4000_v34 }
  0xb4   : > { %3657 = vmatmul.mubr.msk.f32.gmra.mxu0 %vm386_vm2, %v4001_v39 }
  0xb5   : > { %3724 = vmatmul.mubr.msk.f32.gmra.mxu1 %vm386_vm2, %v3946_v41  ;;  %3675 = vmatprep.mubr.msk.f32.mxu0 %vm386_vm2, %v4178_v55  ;;  %v3960_v55 = vunpack.i.l.bf16 %v4475_v53  ;;  %v3965_v41 = vunpack.i.l.bf16 %v3964_v12 }
  0xb6   : > { %3726 = vmatprep.mubr.msk.f32.mxu1 %vm386_vm2, %v3950_v58  ;;  %v3966_v58 = vunpack.i.h.bf16 %v3964_v12 }
  0xb8   : > { %3676 = vmatmul.mubr.msk.f32.vlgmr.msra.gmra.mxu0 %vm386_vm2, %v4181_v56 }
  0xb9   : > { %3727 = vmatmul.mubr.msk.f32.gmra.mxu1 %vm386_vm2, %v3951_v62  ;;  %3678 = vmatprep.mubr.msk.f32.mxu0 %vm386_vm2, %v4147_v36  ;;  %v3961_v62 = vunpack.i.h.bf16 %v4475_v53  ;;  %v3975_v53 = vunpack.i.l.bf16 %v3974_v4 }
  0xba   : > { %3745 = vmatprep.mubr.msk.f32.mxu1 %vm386_vm2, %v3955_v30  ;;  %3702 = vmatpush3.msk.msra.mxu0 %vm411_vm0, %v3307_v22  ;;  %v3984_v22 = vpop.permute.xlu0 %3983 }
  0xbb   : > { %3729 = vmatprep.subr.msk.mxu0 %vm411_vm0, %v3327_v42  ;;  %v3985_v12 = vunpack.i.l.bf16 %v3984_v22 }
  0xbc   : > { %3679 = vmatmul.mubr.msk.f32.gmra.mxu0 %vm386_vm2, %v4150_v37 }
  0xbd   : > { %3746 = vmatmul.mubr.msk.f32.vlgmr.msra.gmra.mxu1 %vm386_vm2, %v3956_v50  ;;  %3681 = vmatprep.mubr.msk.f32.mxu0 %vm386_vm2, %v4202_v5  ;;  %v3986_v50 = vunpack.i.h.bf16 %v3984_v22  ;;  %v5090_v22 = vunpack.c.h.bf16 %v4249_v31 }
  0xbe   : > { %3772 = vmatpush3.msk.msra.mxu1 %vm411_vm0, %v3357_v43  ;;  %3748 = vmatprep.mubr.msk.f32.mxu1 %vm386_vm2, %v3960_v55  ;;  %v3976_v43 = vunpack.i.h.bf16 %v3974_v4  ;;  %v3994_v30 = vpop.permute.xlu0 %3993  ;;  %v3347_v4 = vld [vmem:[%s5039_s1 + $0x28] sm:$0xf] }
  0xbf   : > { %3799 = vmatprep.subr.msk.mxu1 %vm411_vm0, %v3377_v25  ;;  %v3995_v55 = vunpack.i.l.bf16 %v3994_v30 }
  0xc0   : > { %3682 = vmatmul.mubr.msk.f32.gmra.mxu0 %vm386_vm2, %v4210_v11 }
  0xc1   : > { %3749 = vmatmul.mubr.msk.f32.gmra.mxu1 %vm386_vm2, %v3961_v62  ;;  %3684 = vmatprep.mubr.msk.f32.mxu0 %vm386_vm2, %v4165_v48  ;;  %v3397_v62 = vld [vmem:[%s5039_s1 + $0x3c] sm:$0xf] }
  0xc2   : > { %3751 = vmatprep.mubr.msk.f32.mxu1 %vm386_vm2, %v3965_v41 }
  0xc4   : > { %3685 = vmatmul.mubr.msk.f32.gmra.mxu0 %vm386_vm2, %v4168_v49 }
  0xc5   : > { %3752 = vmatmul.mubr.msk.f32.gmra.mxu1 %vm386_vm2, %v3966_v58  ;;  %3703 = vmatprep.mubr.msk.f32.mxu0 %vm386_vm2, %v4207_v10  ;;  %v4004_v10 = vpop.permute.xlu0 %4003  ;;  %v5092_v58 = vunpack.c.l.bf16 %v4233_v24 }
  0xc6   : > { %3754 = vmatprep.mubr.msk.f32.mxu1 %vm386_vm2, %v3975_v53  ;;  %v4006_v41 = vunpack.i.h.bf16 %v4004_v10 }
  0xc8   : > { %3704 = vmatmul.mubr.msk.f32.vlgmr.msra.gmra.mxu0 %vm386_vm2, %v4214_v17  ;;  %v3996_v17 = vunpack.i.h.bf16 %v3994_v30  ;;  %v5095_v30 = vunpack.i.h.bf16 %v4416_v0 }
  0xc9   : > { %3755 = vmatmul.mubr.msk.f32.gmra.mxu1 %vm386_vm2, %v3976_v43  ;;  %3706 = vmatprep.mubr.msk.f32.mxu0 %vm386_vm2, %v4172_v52  ;;  %v4005_v52 = vunpack.i.l.bf16 %v4004_v10  ;;  %v5093_v43 = vunpack.c.h.bf16 %v4233_v24  ;;  %v5097_v24 = vunpack.c.h.bf16 %v4276_v44 }
  0xca   : > { %3773 = vmatprep.mubr.msk.f32.mxu1 %vm386_vm2, %v3985_v12  ;;  %3730 = vmatpush3.msk.msra.mxu0 %vm411_vm0, %v3327_v42  ;;  %v4009_v42 = vpop.permute.xlu1 %4008  ;;  %v5096_v12 = vunpack.c.l.bf16 %v4276_v44  ;;  %v5101_v44 = vunpack.c.h.bf16 %v4299_v57 }
  0xcb   : > { %3757 = vmatprep.subr.msk.mxu0 %vm411_vm0, %v3347_v4 }
  0xcc   : > { %3707 = vmatmul.mubr.msk.f32.gmra.mxu0 %vm386_vm2, %v4190_v61  ;;  %v4010_v61 = vunpack.i.l.bf16 %v4009_v42 }
  0xcd   : > { %3774 = vmatmul.mubr.msk.f32.vlgmr.msra.gmra.mxu1 %vm386_vm2, %v3986_v50  ;;  %3709 = vmatprep.mubr.msk.f32.mxu0 %vm386_vm2, %v4242_v28  ;;  %v5089_v28 = vunpack.c.l.bf16 %v4249_v31  ;;  %v3417_v31 = vld [vmem:[%s5039_s1 + $0x44] sm:$0xf] }
  0xce   : > { %3800 = vmatpush3.msk.msra.mxu1 %vm411_vm0, %v3377_v25  ;;  %3776 = vmatprep.mubr.msk.f32.mxu1 %vm386_vm2, %v3995_v55  ;;  %v4011_v25 = vunpack.i.h.bf16 %v4009_v42  ;;  %v5099_v55 = vunpack.i.h.bf16 %v4404_v40 }
  0xcf   : > { %3827 = vmatprep.subr.msk.mxu1 %vm411_vm0, %v3397_v62 }
  0xd0   : > { %3710 = vmatmul.mubr.msk.f32.gmra.mxu0 %vm386_vm2, %v4244_v29 }
  0xd1   : > { %3777 = vmatmul.mubr.msk.f32.gmra.mxu1 %vm386_vm2, %v3996_v17  ;;  %3712 = vmatprep.mubr.msk.f32.mxu0 %vm386_vm2, %v4223_v20  ;;  %v3367_v20 = vld [vmem:[%s5039_s1 + $0x30] sm:$0xf] }
  0xd2   : > { %3779 = vmatprep.mubr.msk.f32.mxu1 %vm386_vm2, %v4005_v52  ;;  %v5102_v52 = vunpack.i.l.bf16 %v4414_v19 }
  0xd4   : > { %3713 = vmatmul.mubr.msk.f32.gmra.mxu0 %vm386_vm2, %v4225_v21  ;;  %v5091_v21 = vunpack.i.h.bf16 %v4406_v46  ;;  %v5094_v46 = vunpack.i.l.bf16 %v4416_v0  ;;  %v5100_v0 = vunpack.c.l.bf16 %v4299_v57 }
  0xd5   : > { %3780 = vmatmul.mubr.msk.f32.gmra.mxu1 %vm386_vm2, %v4006_v41  ;;  %3731 = vmatprep.mubr.msk.f32.mxu0 %vm386_vm2, %v5089_v28  ;;  %v2275_v41 = vpop.permute.xlu0 %2274 }
  0xd6   : > { %3782 = vmatprep.mubr.msk.f32.mxu1 %vm386_vm2, %v4010_v61  ;;  %v3635_v29 = vpop.f32.mrf.mxu1 }
  0xd8   : > { %3732 = vmatmul.mubr.msk.f32.vlgmr.msra.gmra.mxu0 %vm386_vm2, %v5090_v22  ;;  %v613_v53 = vpop.f32.mrf.mxu1  ;;  %v5104_v22 = vunpack.i.h.bf16 %v4486_v38  ;;  %v5105_v38 = vunpack.i.l.bf16 %v4500_v18 }
  0xd9   : > { %3783 = vmatmul.mubr.msk.f32.gmra.mxu1 %vm386_vm2, %v4011_v25  ;;  %3734 = vmatprep.mubr.msk.f32.mxu0 %vm386_vm2, %v5092_v58 }
  0xda   : > { %3801 = vmatprep.mubr.msk.f32.mxu1 %vm386_vm2, %v5091_v21  ;;  %3758 = vmatpush3.msk.msra.mxu0 %vm411_vm0, %v3347_v4  ;;  %v3638_v50 = vpop.f32.mrf.mxu1  ;;  %v5098_v4 = vunpack.i.l.bf16 %v4404_v40  ;;  %v5103_v40 = vunpack.i.h.bf16 %v4414_v19  ;;  %v3387_v19 = vld [vmem:[%s5039_s1 + $0x38] sm:$0xf] }
  0xdb   : > { %3785 = vmatprep.subr.msk.mxu0 %vm411_vm0, %v3367_v20 }
  0xdc   : > { %3735 = vmatmul.mubr.msk.f32.gmra.mxu0 %vm386_vm2, %v5093_v43 }
  0xdd   : > { %3802 = vmatmul.mubr.msk.f32.vlgmr.msra.gmra.mxu1 %vm386_vm2, %v5094_v46  ;;  %3737 = vmatprep.mubr.msk.f32.mxu0 %vm386_vm2, %v5096_v12 }
  0xde   : > { %3828 = vmatpush3.msk.msra.mxu1 %vm411_vm0, %v3397_v62  ;;  %3804 = vmatprep.mubr.msk.f32.mxu1 %vm386_vm2, %v5095_v30  ;;  %v623_v62 = vpop.f32.mrf.mxu1 }
  0xdf   : > { %3855 = vmatprep.subr.msk.mxu1 %vm411_vm0, %v3417_v31 }
  0xe0   : > { %3738 = vmatmul.mubr.msk.f32.gmra.mxu0 %vm386_vm2, %v5097_v24  ;;  %v3641_v28 = vpop.f32.mrf.mxu1 }
  0xe1   : > { %3805 = vmatmul.mubr.msk.f32.gmra.mxu1 %vm386_vm2, %v5098_v4  ;;  %3740 = vmatprep.mubr.msk.f32.mxu0 %vm386_vm2, %v5100_v0  ;;  %v3621_v10 = vpop.f32.mrf.mxu0 }
  0xe2   : > { %3807 = vmatprep.mubr.msk.f32.mxu1 %vm386_vm2, %v5099_v55  ;;  %v4670_v17 = vadd.f32 %v3635_v29, %v3621_v10 }
  0xe3   : > { %v481_v42 = vpop.f32.mrf.mxu0 }
  0xe4   : > { %3741 = vmatmul.mubr.msk.f32.gmra.mxu0 %vm386_vm2, %v5101_v44  ;;  %v4683_v61 = vadd.f32 %v613_v53, %v481_v42 }
  0xe5   : > { %3808 = vmatmul.mubr.msk.f32.gmra.mxu1 %vm386_vm2, %v5102_v52  ;;  %3759 = vmatprep.mubr.msk.f32.mxu0 %vm386_vm2, %v4336_v63  ;;  %v3624_v25 = vpop.f32.mrf.mxu0 }
  0xe6   : > { %3810 = vmatprep.mubr.msk.f32.mxu1 %vm386_vm2, %v5103_v40  ;;  %v4685_v57 = vadd.f32 %v3638_v50, %v3624_v25 }
  0xe7   : > { %v491_v29 = vpop.f32.mrf.mxu0 }
  0xe8   : > { %3760 = vmatmul.mubr.msk.f32.vlgmr.msra.gmra.mxu0 %vm386_vm2, %v4339_v1  ;;  %v4698_v63 = vadd.f32 %v623_v62, %v491_v29  ;;  %v633_v1 = vpop.f32.mrf.mxu1 }
  0xe9   : > { %3811 = vmatmul.mubr.msk.f32.gmra.mxu1 %vm386_vm2, %v2275_v41  ;;  %3762 = vmatprep.mubr.msk.f32.mxu0 %vm386_vm2, %v4352_v23  ;;  %v3627_v21 = vpop.f32.mrf.mxu0  ;;  %v5106_v23 = vunpack.i.h.bf16 %v4500_v18  ;;  %v5123_v18 = vld [vmem:[#allocation9_spill] sm:$0xff] }
  0xea   : > { %3829 = vmatprep.mubr.msk.f32.mxu1 %vm386_vm2, %v5104_v22  ;;  %3786 = vmatpush3.msk.msra.mxu0 %vm411_vm0, %v3367_v20  ;;  %v4702_v58 = vadd.f32 %v3641_v28, %v3627_v21  ;;  %v3644_v46 = vpop.f32.mrf.mxu1 }
  0xeb   : > { %3813 = vmatprep.subr.msk.mxu0 %vm411_vm0, %v3387_v19  ;;  %v501_v53 = vpop.f32.mrf.mxu0 }
  0xec   : > { %3763 = vmatmul.mubr.msk.f32.gmra.mxu0 %vm386_vm2, %v4356_v32  ;;  %v4713_v20 = vadd.f32 %v633_v1, %v501_v53  ;;  %v5107_v32 = vunpack.i.l.bf16 %v4520_v2  ;;  %v5117_v2 = vld [vmem:[#allocation4_spill] sm:$0xff] }
  0xed   : > { %3830 = vmatmul.mubr.msk.f32.vlgmr.msra.gmra.mxu1 %vm386_vm2, %v5105_v38  ;;  %3765 = vmatprep.mubr.msk.f32.mxu0 %vm386_vm2, %v4372_v59  ;;  %v3630_v43 = vpop.f32.mrf.mxu0  ;;  %v2518_v59 = vpop.permute.xlu1 %2517 }
  0xee   : > { %3856 = vmatpush3.msk.msra.mxu1 %vm411_vm0, %v3417_v31  ;;  %3832 = vmatprep.mubr.msk.f32.mxu1 %vm386_vm2, %v5106_v23  ;;  %v4717_v30 = vadd.f32 %v3644_v46, %v3630_v43 }
  0xef   : > { %v4817_v4 = vpop.f32.mrf.mxu0 }
  0xf0   : > { %3766 = vmatmul.mubr.msk.f32.gmra.mxu0 %vm386_vm2, %v4375_v60  ;;  %v5115_v60 = vld [vmem:[#allocation2_spill] sm:$0xff] }
  0xf1   : > { %3833 = vmatmul.mubr.msk.f32.gmra.mxu1 %vm386_vm2, %v5107_v32  ;;  %3768 = vmatprep.mubr.msk.f32.mxu0 %vm386_vm2, %v4363_v47  ;;  %v3407_v47 = vld [vmem:[%s5039_s1 + $0x40] sm:$0xf] }
  0xf2   : > { %3835 = vmatprep.mubr.msk.f32.mxu1 %vm386_vm2, %v3991_v54 }
  0xf4   : > { %3769 = vmatmul.mubr.msk.f32.gmra.mxu0 %vm386_vm2, %v4366_v51  ;;  %v5108_v51 = vunpack.i.h.bf16 %v4440_v27 }
  0xf5   : > { %3836 = vmatmul.mubr.msk.f32.gmra.mxu1 %vm386_vm2, %v4000_v34  ;;  %3787 = vmatprep.mubr.msk.f32.mxu0 %vm386_vm2, %v4105_v9  ;;  %v5109_v9 = vunpack.i.l.bf16 %v4431_v33  ;;  %v5113_v34 = vunpack.i.l.bf16 %v4443_v35 }
  0xf6   : > { %3838 = vmatprep.mubr.msk.f32.mxu1 %vm386_vm2, %v4001_v39 }
  0xf8   : > { %3788 = vmatmul.mubr.msk.f32.vlgmr.msra.gmra.mxu0 %vm386_vm2, %v4114_v15  ;;  %v5110_v15 = vunpack.i.h.bf16 %v4431_v33  ;;  %v5119_v33 = vld [vmem:[#allocation6_spill] sm:$0xff] }
  0xf9   : > { %3839 = vmatmul.mubr.msk.f32.gmra.mxu1 %vm386_vm2, %v2518_v59  ;;  %3790 = vmatprep.mubr.msk.f32.mxu0 %vm386_vm2, %v4116_v16  ;;  %v5111_v16 = vunpack.i.l.bf16 %v4458_v45 }
  0xfa   : > { %3857 = vmatprep.mubr.msk.f32.mxu1 %vm386_vm2, %v5108_v51  ;;  %3814 = vmatpush3.msk.msra.mxu0 %vm411_vm0, %v3387_v19 }
  0xfb   : > { %3841 = vmatprep.subr.msk.mxu0 %vm411_vm0, %v3407_v47 }
  0xfc   : > { %3791 = vmatmul.mubr.msk.f32.gmra.mxu0 %vm386_vm2, %v4101_v6  ;;  %v5112_v6 = vunpack.i.h.bf16 %v4458_v45 }
  0xfd   : > { %3858 = vmatmul.mubr.msk.f32.vlgmr.msra.gmra.mxu1 %vm386_vm2, %v5109_v9  ;;  %3793 = vmatprep.mubr.msk.f32.mxu0 %vm386_vm2, %v4103_v7  ;;  %v5114_v7 = vunpack.i.h.bf16 %v4443_v35  ;;  %v5118_v35 = vld [vmem:[#allocation5_spill] sm:$0xff] }
  0xfe   : > { %3860 = vmatprep.mubr.msk.f32.mxu1 %vm386_vm2, %v5110_v15 }
 0x100   : > { %3794 = vmatmul.mubr.msk.f32.gmra.mxu0 %vm386_vm2, %v4110_v13  ;;  %v2764_v13 = vpop.permute.xlu0 %2763 }
 0x101   : > { %3861 = vmatmul.mubr.msk.f32.gmra.mxu1 %vm386_vm2, %v5111_v16  ;;  %3796 = vmatprep.mubr.msk.f32.mxu0 %vm386_vm2, %v4112_v14  ;;  %v5116_v14 = vld [vmem:[#allocation3_spill] sm:$0xff] }
 0x102   : > { %3863 = vmatprep.mubr.msk.f32.mxu1 %vm386_vm2, %v5112_v6 }
 0x104   : > { %3797 = vmatmul.mubr.msk.f32.gmra.mxu0 %vm386_vm2, %v4390_v3  ;;  %v5121_v3 = vld [vmem:[#allocation8_spill] sm:$0xff] }
 0x105   : > { %3864 = vmatmul.mubr.msk.f32.gmra.mxu1 %vm386_vm2, %v5113_v34  ;;  %3815 = vmatprep.mubr.msk.f32.mxu0 %vm386_vm2, %v4205_v8  ;;  %v5120_v8 = vld [vmem:[#allocation7_spill] sm:$0xff]  ;;  %v5122_v45 = vunpack.c.h.bf16 %v5121_v3 }
 0x106   : > { %3866 = vmatprep.mubr.msk.f32.mxu1 %vm386_vm2, %v5114_v7 }
 0x108   : > { %3816 = vmatmul.mubr.msk.f32.vlgmr.msra.gmra.mxu0 %vm386_vm2, %v5115_v60 }
 0x109   : > { %3867 = vmatmul.mubr.msk.f32.gmra.mxu1 %vm386_vm2, %v2764_v13  ;;  %3818 = vmatprep.mubr.msk.f32.mxu0 %vm386_vm2, %v5116_v14 }
 0x10a   : > { %3842 = vmatpush3.msk.msra.mxu0 %vm411_vm0, %v3407_v47 }
 0x10c   : > { %3819 = vmatmul.mubr.msk.f32.gmra.mxu0 %vm386_vm2, %v5117_v2 }
 0x10d   : > { %3821 = vmatprep.mubr.msk.f32.mxu0 %vm386_vm2, %v5118_v35 }
 0x110   : > { %3822 = vmatmul.mubr.msk.f32.gmra.mxu0 %vm386_vm2, %v5119_v33 }
 0x111   : > { %3824 = vmatprep.mubr.msk.f32.mxu0 %vm386_vm2, %v5120_v8 }
 0x114   : > { %3825 = vmatmul.mubr.msk.f32.gmra.mxu0 %vm386_vm2, %v5122_v45 }
 0x115   : > { %3843 = vmatprep.mubr.msk.f32.mxu0 %vm386_vm2, %v4181_v56  ;;  %v4815_v56 = vpop.f32.mrf.mxu1 }
 0x118   : > { %3844 = vmatmul.mubr.msk.f32.vlgmr.msra.gmra.mxu0 %vm386_vm2, %v4147_v36 }
 0x119   : > { %3846 = vmatprep.mubr.msk.f32.mxu0 %vm386_vm2, %v4150_v37 }
 0x11c   : > { %3847 = vmatmul.mubr.msk.f32.gmra.mxu0 %vm386_vm2, %v4202_v5 }
 0x11d   : > { %3849 = vmatprep.mubr.msk.f32.mxu0 %vm386_vm2, %v4210_v11 }
 0x120   : > { %3850 = vmatmul.mubr.msk.f32.gmra.mxu0 %vm386_vm2, %v4165_v48 }
 0x121   : > { %3852 = vmatprep.mubr.msk.f32.mxu0 %vm386_vm2, %v4168_v49 }
 0x124   : > { %3853 = vmatmul.mubr.msk.f32.gmra.mxu0 %vm386_vm2, %v5123_v18 }
 0x14d   : > { %v3663_v36 = vpop.f32.mrf.mxu1 }
 0x14f   : > { %v895_v27 = vpop.f32.mrf.mxu1 }
 0x151   : > { %v3666_v37 = vpop.f32.mrf.mxu1 }
 0x153   : > { %v905_v54 = vpop.f32.mrf.mxu1 }
 0x155   : > { %v3669_v26 = vpop.f32.mrf.mxu1 }
 0x157   : > { %v915_v5 = vpop.f32.mrf.mxu1 }
 0x159   : > { %v3672_v39 = vpop.f32.mrf.mxu1 }
 0x15b   : > { %v925_v31 = vpop.f32.mrf.mxu1 }
 0x15d   : > { %v3691_v11 = vpop.f32.mrf.mxu1 }
 0x15f   : > { %v1204_v12 = vpop.f32.mrf.mxu1 }
 0x161   : > { %v3694_v50 = vpop.f32.mrf.mxu1 }
 0x163   : > { %v1214_v48 = vpop.f32.mrf.mxu1 }
 0x165   : > { %v3697_v24 = vpop.f32.mrf.mxu1 }
 0x167   : > { %v1224_v49 = vpop.f32.mrf.mxu1 }
 0x168   : > { %v3649_v55 = vpop.f32.mrf.mxu0 }
 0x169   : > { %v3700_v0 = vpop.f32.mrf.mxu1  ;;  %v901_v10 = vadd.f32 %v3663_v36, %v3649_v55 }
 0x16a   : > { %v755_v62 = vpop.f32.mrf.mxu0 }
 0x16b   : > { %v1234_v44 = vpop.f32.mrf.mxu1  ;;  %v896_v52 = vadd.f32 %v895_v27, %v755_v62  ;;  %v1244_v42 = vadd.f32 %v3691_v11, %v901_v10 }
 0x16c   : > { %v3652_v40 = vpop.f32.mrf.mxu0 }
 0x16d   : > { %v3719_v41 = vpop.f32.mrf.mxu1  ;;  %v911_v25 = vadd.f32 %v3666_v37, %v3652_v40  ;;  %v1243_v19 = vadd.f32 %v1204_v12, %v896_v52 }
 0x16e   : > { %v4819_v28 = vadd.f32 %v3719_v41, %v1244_v42  ;;  %v765_v29 = vpop.f32.mrf.mxu0 }
 0x16f   : > { %v1496_v22 = vpop.f32.mrf.mxu1  ;;  %v906_v21 = vadd.f32 %v905_v54, %v765_v29  ;;  %v1246_v38 = vadd.f32 %v3694_v50, %v911_v25 }
 0x170   : > { %v4821_v1 = vadd.f32 %v1496_v22, %v1243_v19  ;;  %v3655_v53 = vpop.f32.mrf.mxu0 }
 0x171   : > { %v3722_v23 = vpop.f32.mrf.mxu1  ;;  %v921_v43 = vadd.f32 %v3669_v26, %v3655_v53  ;;  %v1245_v32 = vadd.f32 %v1214_v48, %v906_v21 }
 0x172   : > { %v4823_v46 = vadd.f32 %v3722_v23, %v1246_v38  ;;  %v775_v59 = vpop.f32.mrf.mxu0 }
 0x173   : > { %v1506_v47 = vpop.f32.mrf.mxu1  ;;  %v916_v51 = vadd.f32 %v915_v5, %v775_v59  ;;  %v1248_v15 = vadd.f32 %v3697_v24, %v921_v43 }
 0x174   : > { %v4825_v9 = vadd.f32 %v1506_v47, %v1245_v32  ;;  %v3658_v16 = vpop.f32.mrf.mxu0  ;;  %v644_v32 = vadd.f32 %v4815_v56, %v4817_v4 }
 0x175   : > { %v3725_v6 = vpop.f32.mrf.mxu1  ;;  %v931_v34 = vadd.f32 %v3672_v39, %v3658_v16  ;;  %v1247_v13 = vadd.f32 %v1224_v49, %v916_v51 }
 0x176   : > { %v4827_v7 = vadd.f32 %v3725_v6, %v1248_v15  ;;  %v785_v60 = vpop.f32.mrf.mxu0 }
 0x177   : > { %v1516_v14 = vpop.f32.mrf.mxu1  ;;  %v926_v2 = vadd.f32 %v925_v31, %v785_v60  ;;  %v1250_v33 = vadd.f32 %v3700_v0, %v931_v34 }
 0x178   : > { %v4829_v35 = vadd.f32 %v1516_v14, %v1247_v13  ;;  %v3677_v8 = vpop.f32.mrf.mxu0 }
 0x179   : > { %v3728_v3 = vpop.f32.mrf.mxu1  ;;  %v1094_v45 = vadd.f32 %v3677_v8, %v4670_v17  ;;  %v1249_v36 = vadd.f32 %v1234_v44, %v926_v2 }
 0x17a   : > { %v4832_v18 = vadd.f32 %v3728_v3, %v1250_v33  ;;  %v1054_v27 = vpop.f32.mrf.mxu0 }
 0x17b   : > { %v1526_v37 = vpop.f32.mrf.mxu1  ;;  %v1093_v54 = vadd.f32 %v1054_v27, %v4683_v61 }
 0x17c   : > { %v4835_v26 = vadd.f32 %v1526_v37, %v1249_v36  ;;  %v3680_v5 = vpop.f32.mrf.mxu0 }
 0x17d   : > { %v4837_v39 = vpop.f32.mrf.mxu1  ;;  %v1096_v31 = vadd.f32 %v3680_v5, %v4685_v57 }
 0x17e   : > { %v1064_v11 = vpop.f32.mrf.mxu0 }
 0x17f   : > { %v1788_v12 = vpop.f32.mrf.mxu1  ;;  %v1095_v50 = vadd.f32 %v1064_v11, %v4698_v63 }
 0x180   : > { %v3683_v48 = vpop.f32.mrf.mxu0 }
 0x181   : > { %v4841_v17 = vpop.f32.mrf.mxu1  ;;  %v1098_v24 = vadd.f32 %v3683_v48, %v4702_v58 }
 0x182   : > { %v1074_v49 = vpop.f32.mrf.mxu0 }
 0x183   : > { %v4844_v55 = vpop.f32.mrf.mxu1  ;;  %v1097_v61 = vadd.f32 %v1074_v49, %v4713_v20 }
 0x184   : > { %v3686_v0 = vpop.f32.mrf.mxu0 }
 0x185   : > { %v4847_v10 = vpop.f32.mrf.mxu1  ;;  %v1100_v62 = vadd.f32 %v3686_v0, %v4717_v30  ;;  %v1828_v0 = vadd.f32 %v4837_v39, %v4819_v28 }
 0x186   : > { %v1084_v57 = vpop.f32.mrf.mxu0 }
 0x187   : > { %v4850_v44 = vpop.f32.mrf.mxu1  ;;  %v1099_v15 = vadd.f32 %v1084_v57, %v644_v32  ;;  %v1827_v57 = vadd.f32 %v1788_v12, %v4821_v1  ;;  %v1832_v1 = vadd.f32 %v4847_v10, %v4827_v7 }
 0x188   : > { %v3705_v52 = vpop.f32.mrf.mxu0 }
 0x189   : > { %v4852_v63 = vpop.f32.mrf.mxu1  ;;  %v4854_v42 = vadd.f32 %v3705_v52, %v1094_v45 }
 0x18a   : > { %v1346_v40 = vpop.f32.mrf.mxu0  ;;  %v1834_v7 = vadd.f32 %v4852_v63, %v4832_v18 }
 0x18b   : > { %v4856_v58 = vpop.f32.mrf.mxu1  ;;  %v4858_v41 = vadd.f32 %v1346_v40, %v1093_v54 }
 0x18c   : > { %v3708_v25 = vpop.f32.mrf.mxu0 }
 0x18d   : > { %v3775_v20 = vpop.f32.mrf.mxu1  ;;  %v4860_v19 = vadd.f32 %v3708_v25, %v1096_v31 }
 0x18e   : > { %v1356_v29 = vpop.f32.mrf.mxu0  ;;  %v2144_v52 = vadd.f32 %v3775_v20, %v1828_v0 }
 0x18f   : > { %v2104_v22 = vpop.f32.mrf.mxu1  ;;  %v4862_v30 = vadd.f32 %v1356_v29, %v1095_v50  ;;  %v1830_v29 = vadd.f32 %v4841_v17, %v4823_v46  ;;  %v1831_v46 = vadd.f32 %v4850_v44, %v4829_v35  ;;  %v1833_v35 = vadd.f32 %v4856_v58, %v4835_v26 }
 0x190   : > { %v3711_v21 = vpop.f32.mrf.mxu0 }
 0x191   : > { %v3778_v38 = vpop.f32.mrf.mxu1  ;;  %v4864_v53 = vadd.f32 %v3711_v21, %v1098_v24  ;;  %v2143_v21 = vadd.f32 %v2104_v22, %v1827_v57 }
 0x192   : > { %v1366_v23 = vpop.f32.mrf.mxu0 }
 0x193   : > { %v2114_v43 = vpop.f32.mrf.mxu1  ;;  %v4868_v59 = vadd.f32 %v1366_v23, %v1097_v61 }
 0x194   : > { %v3714_v47 = vpop.f32.mrf.mxu0 }
 0x195   : > { %v3781_v51 = vpop.f32.mrf.mxu1  ;;  %v4870_v16 = vadd.f32 %v3714_v47, %v1100_v62  ;;  %v1829_v47 = vadd.f32 %v4844_v55, %v4825_v9 }
 0x196   : > { %v1376_v6 = vpop.f32.mrf.mxu0  ;;  %v2148_v22 = vadd.f32 %v3781_v51, %v1832_v1 }
 0x197   : > { %v2124_v34 = vpop.f32.mrf.mxu1  ;;  %v4872_v13 = vadd.f32 %v1376_v6, %v1099_v15  ;;  %v2146_v15 = vadd.f32 %v3778_v38, %v1830_v29  ;;  %v2145_v12 = vadd.f32 %v2114_v43, %v1829_v47  ;;  %v3046_v47 = vld [vmem:[%s5043_s5] sm:$0x3] }
 0x198   : > { %v4876_v8 = vpop.f32.mrf.mxu0  ;;  %v2147_v43 = vadd.f32 %v2124_v34, %v1831_v46 }
 0x199   : > { %5124 = vst [vmem:[#allocation2_spill] sm:$0xff] %v4872_v13  ;;  %v3784_v60 = vpop.f32.mrf.mxu1 }
 0x19a   : > { %v4878_v4 = vpop.f32.mrf.mxu0  ;;  %v2150_v51 = vadd.f32 %v3784_v60, %v1834_v7 }
 0x19b   : > { %v4874_v14 = vpop.f32.mrf.mxu1 }
 0x19c   : > { %v4880_v27 = vpop.f32.mrf.mxu0  ;;  %v2149_v63 = vadd.f32 %v4874_v14, %v1833_v35  ;;  %v1678_v35 = vadd.f32 %v4876_v8, %v4854_v42 }
 0x19d   : > { %v3803_v2 = vpop.f32.mrf.mxu1 }
 0x19e   : > { %v4882_v5 = vpop.f32.mrf.mxu0  ;;  %v2387_v23 = vadd.f32 %v3803_v2, %v2144_v52 }
 0x19f   : > { %v2347_v33 = vpop.f32.mrf.mxu1 }
 0x1a0   : > { %v4884_v50 = vpop.f32.mrf.mxu0  ;;  %v2386_v6 = vadd.f32 %v2347_v33, %v2143_v21 }
 0x1a1   : > { %v3806_v3 = vpop.f32.mrf.mxu1  ;;  %v1682_v42 = vadd.f32 %v4884_v50, %v4864_v53 }
 0x1a2   : > { %v4886_v49 = vpop.f32.mrf.mxu0  ;;  %v2389_v20 = vadd.f32 %v3806_v3, %v2146_v15 }
 0x1a3   : > { %v2357_v56 = vpop.f32.mrf.mxu1 }
 0x1a4   : > { %v4891_v40 = vpop.f32.mrf.mxu0  ;;  %v2388_v2 = vadd.f32 %v2357_v56, %v2145_v12 }
 0x1a5   : > { %v3809_v45 = vpop.f32.mrf.mxu1  ;;  %5125 = vst [vmem:[#allocation3_spill] sm:$0xff] %v4891_v40 }
 0x1a6   : > { %v4897_v13 = vpop.f32.mrf.mxu0  ;;  %v2391_v33 = vadd.f32 %v3809_v45, %v2148_v22 }
 0x1a7   : > { %v2367_v36 = vpop.f32.mrf.mxu1 }
 0x1a8   : > { %v4903_v9 = vpop.f32.mrf.mxu0  ;;  %v2390_v56 = vadd.f32 %v2367_v36, %v2147_v43 }
 0x1a9   : > { %v3812_v37 = vpop.f32.mrf.mxu1 }
 0x1aa   : > { %v2393_v34 = vadd.f32 %v3812_v37, %v2150_v51  ;;  %v1994_v51 = vadd.f32 %v4903_v9, %v1678_v35 }
 0x1ab   : > { %v2377_v54 = vpop.f32.mrf.mxu1 }
 0x1ac   : > { %v5126_v50 = vld [vmem:[#allocation3_spill] sm:$0xff] }
 0x1ad   : > { %v3831_v31 = vpop.f32.mrf.mxu1 }
 0x1ae   : > { %v2630_v28 = vadd.f32 %v3831_v31, %v2387_v23 }
 0x1af   : > { %v2590_v11 = vpop.f32.mrf.mxu1 }
 0x1b0   : > { %v2629_v0 = vadd.f32 %v2590_v11, %v2386_v6  ;;  %v4911_v11 = vpop.f32.mrf.mxu0 }
 0x1b1   : > { %v3834_v48 = vpop.f32.mrf.mxu1 }
 0x1b2   : > { %v2632_v55 = vadd.f32 %v3834_v48, %v2389_v20  ;;  %v3764_v26 = vpop.f32.mrf.mxu0 }
 0x1b3   : > { %v2600_v24 = vpop.f32.mrf.mxu1 }
 0x1b4   : > { %v2631_v3 = vadd.f32 %v2600_v24, %v2388_v2  ;;  %v1964_v23 = vpop.f32.mrf.mxu0 }
 0x1b5   : > { %v3837_v61 = vpop.f32.mrf.mxu1 }
 0x1b6   : > { %v2634_v48 = vadd.f32 %v3837_v61, %v2391_v33  ;;  %v3767_v37 = vpop.f32.mrf.mxu0 }
 0x1b7   : > { %v2610_v62 = vpop.f32.mrf.mxu1 }
 0x1b8   : > { %v2633_v45 = vadd.f32 %v2610_v62, %v2390_v56  ;;  %v1974_v62 = vpop.f32.mrf.mxu0 }
 0x1b9   : > { %v3840_v25 = vpop.f32.mrf.mxu1 }
 0x1ba   : > { %v2636_v58 = vadd.f32 %v3840_v25, %v2393_v34  ;;  %v2970_v25 = vld [vmem:[%s5041_s3] sm:$0xff] }
 0x1bb   : > { %v2620_v32 = vpop.f32.mrf.mxu1 }
 0x1bd   : > { %v3859_v39 = vpop.f32.mrf.mxu1 }
 0x1be   : > { %v2876_v40 = vadd.f32 %v3859_v39, %v2630_v28 }
 0x1bf   : > { %v2836_v17 = vpop.f32.mrf.mxu1 }
 0x1c0   : > { %v2875_v38 = vadd.f32 %v2836_v17, %v2629_v0  ;;  %2893 = vrot.lane.b32.xlu0 %v2876_v40, %s4025_s23  ;;  %v2392_v40 = vadd.f32 %v2377_v54, %v2149_v63  ;;  %v4026_v54 = vmov 0.0   ;;  %v1679_v63 = vadd.f32 %v4882_v5, %v4862_v30 }
 0x1c1   : > { %v3862_v10 = vpop.f32.mrf.mxu1  ;;  %3869 = vmatprep.subr.mxu0 %v4026_v54  ;;  %3874 = vmatprep.subr.mxu1 %v4026_v54  ;;  %v1998_v30 = vadd.f32 %v3767_v37, %v1682_v42 }
 0x1c2   : > { %v2878_v31 = vadd.f32 %v3862_v10, %v2632_v55  ;;  %2891 = vrot.lane.b32.xlu1 %v2875_v38, %s4025_s23  ;;  %v2635_v61 = vadd.f32 %v2620_v32, %v2392_v40  ;;  %v4923_v32 = vpop.f32.mrf.mxu0  ;;  %3870 = vmatpush3.msra.mxu0 %v2970_v25 }
 0x1c3   : > { %v2846_v44 = vpop.f32.mrf.mxu1  ;;  %3871 = vmatprep.mubr.msk.f32.mxu0 %vm4027_vm3, %v4026_v54  ;;  %3876 = vmatprep.mubr.msk.f32.mxu1 %vm4027_vm3, %v4026_v54 }
 0x1c4   : > { %v2877_v57 = vadd.f32 %v2846_v44, %v2631_v3  ;;  %2897 = vrot.lane.b32.xlu0 %v2878_v31, %s4025_s23  ;;  %3875 = vmatpush3.msk.msra.mxu1 %vm3052_vm4, %v3046_v47  ;;  %v4928_v15 = vpop.f32.mrf.mxu0  ;;  %v1677_v44 = vadd.f32 %v4878_v4, %v4858_v41  ;;  %v1995_v41 = vadd.f32 %v1964_v23, %v1679_v63 }
 0x1c5   : > { %v3865_v18 = vpop.f32.mrf.mxu1 }
 0x1c6   : > { %v2880_v24 = vadd.f32 %v3865_v18, %v2634_v48  ;;  %2895 = vrot.lane.b32.xlu1 %v2877_v57, %s4025_s23  ;;  %v3789_v6 = vpop.f32.mrf.mxu0  ;;  %v1680_v48 = vadd.f32 %v4880_v27, %v4860_v19  ;;  %v1993_v57 = vadd.f32 %v4911_v11, %v1677_v44  ;;  %v4949_v19 = vld [vmem:[%s5040_s2] ss:$0 sm:$0xff]  ;;  %v1681_v27 = vadd.f32 %v4886_v49, %v4868_v59 }
 0x1c7   : > { %v2856_v52 = vpop.f32.mrf.mxu1  ;;  %v2265_v18 = vadd.f32 %v3789_v6, %v1994_v51  ;;  %v5127_v49 = vld [vmem:[#allocation2_spill] sm:$0xff] }
 0x1c8   : > { %v2879_v60 = vadd.f32 %v2856_v52, %v2633_v45  ;;  %2901 = vrot.lane.b32.xlu0 %v2880_v24, %s4025_s23  ;;  %v2225_v28 = vpop.f32.mrf.mxu0  ;;  %v1996_v34 = vadd.f32 %v3764_v26, %v1680_v48  ;;  %v1683_v37 = vadd.f32 %v4897_v13, %v5127_v49 }
 0x1c9   : > { %v3868_v36 = vpop.f32.mrf.mxu1  ;;  %v2264_v45 = vadd.f32 %v2225_v28, %v1993_v57 }
 0x1ca   : > { %v2882_v29 = vadd.f32 %v3868_v36, %v2636_v58  ;;  %2899 = vrot.lane.b32.xlu1 %v2879_v60, %s4025_s23  ;;  %v3792_v1 = vpop.f32.mrf.mxu0  ;;  %v1684_v58 = vadd.f32 %v5126_v50, %v4870_v16  ;;  %v1997_v60 = vadd.f32 %v1974_v62, %v1681_v27 }
 0x1cb   : > { %v2866_v21 = vpop.f32.mrf.mxu1  ;;  %v2267_v4 = vadd.f32 %v3792_v1, %v1996_v34  ;;  %v1999_v1 = vadd.f32 %v4928_v15, %v1683_v37 }
 0x1cc   : > { %v2881_v14 = vadd.f32 %v2866_v21, %v2635_v61  ;;  %2905 = vrot.lane.b32.xlu0 %v2882_v29, %s4025_s23  ;;  %v2235_v39 = vpop.f32.mrf.mxu0  ;;  %v2000_v54 = vadd.f32 %v4923_v32, %v1684_v58 }
 0x1cd   : > { %v2266_v11 = vadd.f32 %v2235_v39, %v1995_v41 }
 0x1ce   : > { %2903 = vrot.lane.b32.xlu1 %v2881_v14, %s4025_s23  ;;  %v3795_v12 = vpop.f32.mrf.mxu0 }
 0x1cf   : > { %v2269_v21 = vadd.f32 %v3795_v12, %v1998_v30 }
 0x1d0   : > { %v2245_v20 = vpop.f32.mrf.mxu0 }
 0x1d1   : > { %v2268_v62 = vadd.f32 %v2245_v20, %v1997_v60 }
 0x1d2   : > { %v3798_v0 = vpop.f32.mrf.mxu0 }
 0x1d4   : > { %v4930_v46 = vpop.f32.mrf.mxu0 }
 0x1d6   : > { %v3817_v17 = vpop.f32.mrf.mxu0 }
 0x1d7   : > { %v2508_v24 = vadd.f32 %v3817_v17, %v2265_v18 }
 0x1d8   : > { %v2468_v22 = vpop.f32.mrf.mxu0 }
 0x1d9   : > { %v2507_v9 = vadd.f32 %v2468_v22, %v2264_v45  ;;  %v2271_v22 = vadd.f32 %v3798_v0, %v2000_v54 }
 0x1da   : > { %v3820_v2 = vpop.f32.mrf.mxu0 }
 0x1db   : > { %v2510_v40 = vadd.f32 %v3820_v2, %v2267_v4 }
 0x1dc   : > { %v2478_v55 = vpop.f32.mrf.mxu0 }
 0x1dd   : > { %v2509_v23 = vadd.f32 %v2478_v55, %v2266_v11 }
 0x1de   : > { %v3823_v38 = vpop.f32.mrf.mxu0 }
 0x1df   : > { %v2512_v47 = vadd.f32 %v3823_v38, %v2269_v21 }
 0x1e0   : > { %v2488_v7 = vpop.f32.mrf.mxu0 }
 0x1e1   : > { %v2511_v2 = vadd.f32 %v2488_v7, %v2268_v62 }
 0x1e2   : > { %v3826_v10 = vpop.f32.mrf.mxu0 }
 0x1e4   : > { %v4932_v43 = vpop.f32.mrf.mxu0 }
 0x1e6   : > { %v3845_v33 = vpop.f32.mrf.mxu0 }
 0x1e7   : > { %v2754_v52 = vadd.f32 %v3845_v33, %v2508_v24 }
 0x1e8   : > { %v2714_v3 = vpop.f32.mrf.mxu0 }
 0x1e9   : > { %v2753_v26 = vadd.f32 %v2714_v3, %v2507_v9  ;;  %v2270_v3 = vadd.f32 %v4930_v46, %v1999_v1 }
 0x1ea   : > { %v3848_v31 = vpop.f32.mrf.mxu0 }
 0x1eb   : > { %v2756_v14 = vadd.f32 %v3848_v31, %v2510_v40  ;;  %v2514_v31 = vadd.f32 %v3826_v10, %v2271_v22  ;;  %v2513_v18 = vadd.f32 %v4932_v43, %v2270_v3 }
 0x1ec   : > { %v2724_v56 = vpop.f32.mrf.mxu0 }
 0x1ed   : > { %v2755_v6 = vadd.f32 %v2724_v56, %v2509_v23 }
 0x1ee   : > { %v3851_v8 = vpop.f32.mrf.mxu0 }
 0x1ef   : > { %v2758_v55 = vadd.f32 %v3851_v8, %v2512_v47 }
 0x1f0   : > { %v2734_v36 = vpop.f32.mrf.mxu0 }
 0x1f1   : > { %v2757_v35 = vadd.f32 %v2734_v36, %v2511_v2 }
 0x1f2   : > { %v3854_v39 = vpop.f32.mrf.mxu0 }
 0x1f3   : > { %v2760_v46 = vadd.f32 %v3854_v39, %v2514_v31  ;;  %v3047_v39 = vld [vmem:[%s5044_s6] sm:$0x1] }
 0x1f4   : > { %v2744_v51 = vpop.f32.mrf.mxu0 }
 0x1f5   : > { %v2759_v42 = vadd.f32 %v2744_v51, %v2513_v18 }
 0x232   : > { %v2894_v5 = vpop.permute.xlu0 %2893 }
 0x233   : > { %v2916_v53 = vsel %vm386_vm2, %v2754_v52, %v2894_v5 }
 0x234   : > { %v4957_v61 = vadd.f32 %v4949_v19, %v2916_v53  ;;  %v2892_v29 = vpop.permute.xlu1 %2891 }
 0x235   : > { %v2915_v59 = vsel %vm386_vm2, %v2753_v26, %v2892_v29 }
 0x236   : > { %v4964_v25 = vadd.f32 %v4949_v19, %v2915_v59  ;;  %v2898_v16 = vpop.permute.xlu0 %2897  ;;  %v2939_v12 = vmax.f32 %v4957_v61, 0.0 }
 0x237   : > { %v2918_v28 = vsel %vm386_vm2, %v2756_v14, %v2898_v16 }
 0x238   : > { %v2938_v17 = vmax.f32 %v4964_v25, 0.0  ;;  %v4971_v13 = vadd.f32 %v4949_v19, %v2918_v28  ;;  %v2896_v32 = vpop.permute.xlu1 %2895  ;;  %v2948_v0 = vsel %vm2946_vm5, %v2939_v12, 0.0 }
 0x239   : > { %v2917_v20 = vsel %vm386_vm2, %v2755_v6, %v2896_v32 }
 0x23a   : > { %v2947_v38 = vsel %vm2946_vm5, %v2938_v17, 0.0  ;;  %v4978_v15 = vadd.f32 %v4949_v19, %v2917_v20  ;;  %v2902_v33 = vpop.permute.xlu0 %2901  ;;  %v2941_v7 = vmax.f32 %v4971_v13, 0.0 }
 0x23b   : > { %v2920_v44 = vsel %vm386_vm2, %v2758_v55, %v2902_v33  ;;  %v2949_v10 = vadd.f32 %v2948_v0, %v2947_v38  ;;  %v3132_v33 = vlaneseq }
 0x23c   : > { %v2940_v56 = vmax.f32 %v4978_v15, 0.0  ;;  %v4988_v48 = vadd.f32 %v4949_v19, %v2920_v44  ;;  %v2900_v57 = vpop.permute.xlu1 %2899  ;;  %v2952_v4 = vsel %vm2946_vm5, %v2941_v7, 0.0 }
 0x23d   : > { %v2919_v63 = vsel %vm386_vm2, %v2757_v35, %v2900_v57  ;;  %v3133_v3 = vshrl.u32 %v3132_v33, 7 }
 0x23e   : > { %v2950_v34 = vsel %vm2946_vm5, %v2940_v56, 0.0  ;;  %v2934_v45 = vadd.f32 %v4949_v19, %v2919_v63  ;;  %v2906_v24 = vpop.permute.xlu0 %2905  ;;  %v2943_v43 = vmax.f32 %v4988_v48, 0.0 }
 0x23f   : > { %v2951_v8 = vadd.f32 %v2950_v34, %v2949_v10  ;;  %v2922_v41 = vsel %vm386_vm2, %v2760_v46, %v2906_v24  ;;  %v3134_v31 = vsub.s32 0, %v3133_v3 }
 0x240   : > { %v2942_v9 = vmax.f32 %v2934_v45, 0.0  ;;  %v2937_v52 = vadd.f32 %v4949_v19, %v2922_v41  ;;  %v2904_v27 = vpop.permute.xlu1 %2903  ;;  %v2956_v53 = vsel %vm2946_vm5, %v2943_v43, 0.0 }
 0x241   : > { %v2953_v30 = vadd.f32 %v2952_v4, %v2951_v8  ;;  %v2921_v5 = vsel %vm386_vm2, %v2759_v42, %v2904_v27 }
 0x242   : > { %v2954_v11 = vsel %vm2946_vm5, %v2942_v9, 0.0  ;;  %v2936_v40 = vadd.f32 %v4949_v19, %v2921_v5  ;;  %v2945_v50 = vmax.f32 %v2937_v52, 0.0  ;;  %v2971_v19 = vld [vmem:[%s5042_s4] sm:$0x1] }
 0x243   : > { %v2955_v26 = vadd.f32 %v2954_v11, %v2953_v30 }
 0x244   : > { %v2944_v58 = vmax.f32 %v2936_v40, 0.0  ;;  %v2960_v21 = vsel %vm2946_vm5, %v2945_v50, 0.0 }
 0x245   : > { %v2957_v60 = vadd.f32 %v2956_v53, %v2955_v26 }
 0x246   : > { %v2958_v36 = vsel %vm2946_vm5, %v2944_v58, 0.0 }
 0x247   : > { %v2959_v29 = vadd.f32 %v2958_v36, %v2957_v60 }
 0x249   : > { %v2961_v23 = vadd.f32 %v2960_v21, %v2959_v29 }
 0x24b   : > { %v2962_v14 = vrot.slane %v2961_v23, 4 }
 0x24d   : > { %v2963_v59 = vadd.f32 %v2962_v14, %v2961_v23 }
 0x24f   : > { %v2964_v49 = vrot.slane %v2963_v59, 2 }
 0x251   : > { %v2965_v37 = vadd.f32 %v2964_v49, %v2963_v59 }
 0x253   : > { %v2966_v54 = vrot.slane %v2965_v37, 1 }
 0x255   : > { %v2967_v16 = vadd.f32 %v2966_v54, %v2965_v37 }
 0x257   : > { %v2969_v62 = vmul.f32 0.015625, %v2967_v16 }
 0x259   : > { %3872 = vmatmul.mubr.msk.f32.vlgmr.msra.gmra.mxu0 %vm2946_vm5, %v2969_v62 }
 0x319   : > { %v3041_v47 = vpop.f32.mrf.mxu0 }
 0x31a   : > { %v3042_v6 = vadd.f32 %v3041_v47, %v2971_v19 }
 0x31b   : > { %v3873_v28 = vpop.f32.mrf.mxu0 }
 0x31c   : > { %v3045_v1 = vmax.f32 %v3042_v6, 0.0 }
 0x31e   : > { %3877 = vmatmul.mubr.msk.f32.vlgmr.msra.gmra.mxu1 %vm3048_vm6, %v3045_v1 }
 0x3de   : > { %v3122_v32 = vpop.f32.mrf.mxu1 }
 0x3df   : > { %v3123_v22 = vadd.f32 %v3122_v32, %v3047_v39 }
 0x3e0   : > { %v3878_v2 = vpop.f32.mrf.mxu1 }
 0x3e1   : > { %v3431_v55 = vmul.f32 -1.442695, %v3123_v22 }
 0x3e3   : > { %4012 = vpow2.f32 %v3431_v55 }
 0x3f0   : > { %v4013_v20 = vpop.eup %4012 }
 0x3f1   : > { %v3129_v38 = vadd.f32 1.0, %v4013_v20 }
 0x3f3   : > { %4014 = vrcp.f32 %v3129_v38 }
 0x400   : > { %v4015_v35 = vpop.eup %4014 }
 0x401   : > { %v3135_v44 = vrot.slane %v4015_v35, %v3134_v31 }
 0x403   : > { %v3136_v51 = vmul.f32 %v3135_v44, %v2938_v17  ;;  %v3137_v0 = vmul.f32 %v3135_v44, %v2939_v12  ;;  %v3138_v48 = vmul.f32 %v3135_v44, %v2940_v56  ;;  %v3139_v57 = vmul.f32 %v3135_v44, %v2941_v7 }
 0x404   : > { %v3140_v18 = vmul.f32 %v3135_v44, %v2942_v9  ;;  %v3141_v46 = vmul.f32 %v3135_v44, %v2943_v43  ;;  %v3142_v10 = vmul.f32 %v3135_v44, %v2944_v58  ;;  %v3143_v63 = vmul.f32 %v3135_v44, %v2945_v50 }
 0x405   : > { %v3443_v34 = vpack.c.bf16 %v3136_v51, %v3136_v51  ;;  %v3444_v25 = vpack.c.bf16 %v3137_v0, %v3137_v0  ;;  %v3445_v17 = vpack.c.bf16 %v3138_v48, %v3138_v48  ;;  %v3446_v45 = vpack.c.bf16 %v3139_v57, %v3139_v57 }
 0x406   : > { %v3447_v61 = vpack.c.bf16 %v3140_v18, %v3140_v18  ;;  %v3448_v12 = vpack.c.bf16 %v3141_v46, %v3141_v46  ;;  %v3449_v24 = vpack.c.bf16 %v3142_v10, %v3142_v10  ;;  %v3450_v15 = vpack.c.bf16 %v3143_v63, %v3143_v63 }
 0x407   : > { %3177 = vst.msk [vmem:[%s278_s16] sm:$0xf] %vm3176_vm7, %v3443_v34  ;;  %3178 = vst.msk [vmem:[%s278_s16 + $0x4] sm:$0xf] %vm3176_vm7, %v3444_v25 }
 0x408   : > { %3179 = vst.msk [vmem:[%s278_s16 + $0x8] sm:$0xf] %vm3176_vm7, %v3445_v17  ;;  %3180 = vst.msk [vmem:[%s278_s16 + $0xc] sm:$0xf] %vm3176_vm7, %v3446_v45 }
 0x409   : > { %3181 = vst.msk [vmem:[%s278_s16 + $0x10] sm:$0xf] %vm3176_vm7, %v3447_v61  ;;  %3182 = vst.msk [vmem:[%s278_s16 + $0x14] sm:$0xf] %vm3176_vm7, %v3448_v12 }
 0x40a   : > { %3183 = vst.msk [vmem:[%s278_s16 + $0x18] sm:$0xf] %vm3176_vm7, %v3449_v24  ;;  %3184 = vst.msk [vmem:[%s278_s16 + $0x1c] sm:$0xf] %vm3176_vm7, %v3450_v15 }
 0x40b PF: > { %s17_s24 = sadd.s32 1, %s4022_s24  }
 0x40c   : > { %p14_p4 = scmp.ge.s32.totalorder %s17_s24, 4  }
 0x40e   :  { %16 = sbr.rel (!%p14_p4) target bundleno = 1 (0x1), region = 95 }

// kernel: _lambda_.10
= control target key start
LH: loop header
LB: loop body
LE: loop exit
PB: predicated region body
PF: predicated region fallthrough
CT: control target
= control target key end

     0   :  { %s3802_s24 = smov 0   ;;  %s4653_s0 = inlined_call_operand.vmem [shape: bf16[2,1,10,10,8], index: 0, kind: input, shape index: {}]   ;;  %s4654_s1 = inlined_call_operand.vmem [shape: f32[9,2,4,4], index: 1, kind: input, shape index: {}]   ;;  %s4655_s2 = inlined_call_operand.vmem [shape: f32[1,8], index: 2, kind: input, shape index: {}]   ;;  %s4656_s3 = inlined_call_operand.vmem [shape: f32[8,4], index: 3, kind: input, shape index: {}]   ;;  %s4657_s4 = inlined_call_operand.vmem [shape: f32[1,4], index: 4, kind: input, shape index: {}]   ;;  %s4658_s5 = inlined_call_operand.vmem [shape: f32[4,8], index: 5, kind: input, shape index: {}]   ;;  %s4659_s6 = inlined_call_operand.vmem [shape: f32[1,8], index: 6, kind: input, shape index: {}]   ;;  %s4660_s7 = inlined_call_operand.vmem [shape: bf16[2,64,8], index: 7, kind: output, shape index: {}]  }
   0x1 LB: > { %s3029_s25 = sadd.s32 4294967295, %s3756_s24   ;;  %p3033_p0 = scmp.ge.s32.totalorder %s3756_s24, 1  ;;  %s3756_s24 = sphi %s3802_s24, %s17_s24  }
   0x2   : > { %p237_p1 = scmp.lt.s32.totalorder %s3756_s24, 3 }
   0x4   : > { %p238_p2 = pnand %p3033_p0, %p237_p1 }
   0x6   : > { %241 = sbr.rel (%p238_p2) target bundleno = 1035 (0x40b), region = 48 }
   0xb   : > { %p269_p3 = scmp.lt.s32.totalorder %s3029_s25, 1  ;;  %v3038_v0 = vld [vmem:[%s4654_s1 + $0x8] sm:$0xf]  ;;  %vm382_vm0 = vcmask 1043456   ;;  %v319_v1 = vld [vmem:[%s4654_s1] sm:$0xf] }
   0xc   : > { %v3037_v2 = vld [vmem:[%s4654_s1 + $0x4] sm:$0xf]  ;;  %3406 = vmatprep.subr.msk.mxu0 %vm382_vm0, %v3038_v0  ;;  %3420 = vmatprep.subr.msk.mxu1 %vm382_vm0, %v319_v1  ;;  %vm897_vm1 = vcmask 1045504   ;;  %vm365_vm2 = vcmask 31744   ;;  %vm338_vm3 = vcmask 1046528   ;;  %s3758_s15 = smov 124  }
   0xd   : > { %s4668_s25 = smov (!%p269_p3, %s3029_s25), 1  ;;  %3407 = vmatpush3.msk.msra.mxu0 %vm382_vm0, %v3038_v0  ;;  %3421 = vmatpush3.msk.msra.mxu1 %vm382_vm0, %v319_v1  ;;  %v3883_v29 = vld [vmem:[%s4654_s1 + $0x14] sm:$0xf]  ;;  %v3057_v1 = vld [vmem:[%s4654_s1 + $0xc] sm:$0xf]  ;;  %s3759_s23 = smov 4  }
   0xe   : > { %s3668_s9 = smul.u32 80, %s4668_s25  ;;  %3448 = vmatprep.subr.msk.mxu1 %vm382_vm0, %v3037_v2  ;;  %3434 = vmatprep.subr.msk.mxu0 %vm382_vm0, %v3057_v1  ;;  %vm3761_vm4 = vmmov 0   ;;  %vm2737_vm5 = vcmask 64512   ;;  %s3231_s13 = sshll.u32 %s4668_s25, 5  ;;  %vm2965_vm6 = vcmask 60416  }
   0xf   : > { %s278_s16 = scalar_lea.vmem %s4660_s7, %s3231_s13 }
  0x10   : > { %s3830_s12 = scalar_lea.vmem %s4653_s0, %s3668_s9 }
  0x11   : > { %v287_v3 = vld [vmem:[%s3830_s12 + $0x20] ss:$8 sps:$4 sm:$0xff]   ;;  %v291_v5 = vld [vmem:[%s3830_s12 + $0x30] ss:$8 sps:$4 sm:$0xff]   ;;  %v284_v11 = vld [vmem:[%s3830_s12 + $0x14] sm:$0x1] }
  0x12   : > { %v279_v4 = vld [vmem:[%s3830_s12] ss:$8 sps:$4 sm:$0xff]   ;;  %v3835_v6 = vunpack.c.l.bf16 %v287_v3  ;;  %v3837_v7 = vunpack.c.h.bf16 %v287_v3  ;;  %v283_v10 = vld [vmem:[%s3830_s12 + $0x10] ss:$8 sps:$4 sm:$0xff]   ;;  %v286_v12 = vld [vmem:[%s3830_s12 + $0x1c] sm:$0x1]  ;;  %v3846_v13 = vunpack.c.l.bf16 %v291_v5  ;;  %v3848_v14 = vunpack.c.h.bf16 %v291_v5 }
  0x13   : > { %v3839_v8 = vunpack.c.l.bf16 %v279_v4  ;;  %v3841_v9 = vunpack.c.h.bf16 %v279_v4  ;;  %v3850_v15 = vunpack.c.l.bf16 %v283_v10  ;;  %v3852_v16 = vunpack.c.h.bf16 %v283_v10  ;;  %v3855_v17 = vld [vmem:[%s3830_s12 + $0x34] sm:$0x1]  ;;  %v3858_v18 = vld [vmem:[%s3830_s12 + $0x3c] sm:$0x1]  ;;  %v3865_v23 = vld [vmem:[%s3830_s12 + $0x4] sm:$0x1] }
  0x14   : > { %v3691_v19 = vpack.i.bf16 %v3837_v7, %v3835_v6  ;;  %v304_v21 = vunpack.c.l.bf16 %v284_v11  ;;  %v306_v22 = vunpack.c.l.bf16 %v286_v12  ;;  %v3868_v24 = vld [vmem:[%s3830_s12 + $0xc] sm:$0x1]  ;;  %v3696_v25 = vpack.i.bf16 %v3848_v14, %v3846_v13  ;;  %v288_v42 = vld [vmem:[%s3830_s12 + $0x24] sm:$0x1]  ;;  %v295_v0 = vld [vmem:[%s3830_s12 + $0x40] ss:$8 sps:$4 sm:$0xff]  }
  0x15   : > { %v3681_v20 = vpack.i.bf16 %v3841_v9, %v3839_v8  ;;  %3422 = vmatprep.mubr.msk.f32.mxu1 %vm365_vm2, %v3839_v8  ;;  %v3686_v26 = vpack.i.bf16 %v3852_v16, %v3850_v15  ;;  %v904_v27 = vrot.slane %v3850_v15, 2  ;;  %v907_v28 = vrot.slane %v3852_v16, 2  ;;  %v290_v47 = vld [vmem:[%s3830_s12 + $0x2c] sm:$0x1] }
  0x16   : > { %3423 = vmatmul.mubr.msk.f32.vlgmr.msra.gmra.mxu1 %vm365_vm2, %v3841_v9  ;;  %3692 = vrot.lane.b32.xlu1 %v3691_v19, %s3758_s15  ;;  %v905_v30 = vrot.slane %v304_v21, 2  ;;  %v908_v31 = vrot.slane %v306_v22, 2  ;;  %v312_v32 = vunpack.c.l.bf16 %v3855_v17  ;;  %v314_v33 = vunpack.c.l.bf16 %v3858_v18 }
  0x17   : > { %3682 = vrot.lane.b32.xlu0 %v3681_v20, %s3758_s15  ;;  %v916_v34 = vrot.slane %v3846_v13, 2  ;;  %v919_v35 = vrot.slane %v3848_v14, 2  ;;  %v300_v36 = vunpack.c.l.bf16 %v3865_v23  ;;  %v302_v37 = vunpack.c.l.bf16 %v3868_v24  ;;  %3449 = vmatpush3.msk.msra.mxu1 %vm382_vm0, %v3037_v2 }
  0x18   : > { %3425 = vmatprep.mubr.msk.f32.mxu1 %vm365_vm2, %v3850_v15  ;;  %v3897_v38 = vsel %vm897_vm1, %v904_v27, %v905_v30  ;;  %v3900_v39 = vsel %vm897_vm1, %v907_v28, %v908_v31  ;;  %v917_v40 = vrot.slane %v312_v32, 2  ;;  %v920_v41 = vrot.slane %v314_v33, 2  ;;  %3476 = vmatprep.subr.msk.mxu1 %vm382_vm0, %v3883_v29 }
  0x19   : > { %v3706_v43 = vpack.i.bf16 %v3900_v39, %v3897_v38  ;;  %v898_v44 = vrot.slane %v3839_v8, 2  ;;  %v899_v45 = vrot.slane %v300_v36, 2  ;;  %v901_v46 = vrot.slane %v3841_v9, 2 }
  0x1a   : > { %3426 = vmatmul.mubr.msk.f32.gmra.mxu1 %vm365_vm2, %v3852_v16  ;;  %3697 = vrot.lane.b32.xlu1 %v3696_v25, %s3758_s15  ;;  %v3917_v48 = vsel %vm897_vm1, %v916_v34, %v917_v40  ;;  %v3920_v49 = vsel %vm897_vm1, %v919_v35, %v920_v41  ;;  %v902_v50 = vrot.slane %v302_v37, 2  ;;  %v345_v51 = vrot.slane %v3850_v15, 1 }
  0x1b   : > { %3687 = vrot.lane.b32.xlu0 %v3686_v26, %s3758_s15  ;;  %v3716_v52 = vpack.i.bf16 %v3920_v49, %v3917_v48  ;;  %v3926_v53 = vsel %vm897_vm1, %v898_v44, %v899_v45  ;;  %v346_v54 = vrot.slane %v304_v21, 1  ;;  %v348_v55 = vrot.slane %v3852_v16, 1  ;;  %3428 = vmatprep.mubr.msk.f32.mxu1 %vm365_vm2, %v3835_v6  ;;  %v296_v21 = vld [vmem:[%s3830_s12 + $0x44] sm:$0x1] }
  0x1c   : > { %v3932_v56 = vsel %vm897_vm1, %v901_v46, %v902_v50  ;;  %v349_v57 = vrot.slane %v306_v22, 1  ;;  %v308_v58 = vunpack.c.l.bf16 %v288_v42  ;;  %v310_v59 = vunpack.c.l.bf16 %v290_v47  ;;  %v298_v42 = vld [vmem:[%s3830_s12 + $0x4c] sm:$0x1] }
  0x1d   : > { %v3701_v60 = vpack.i.bf16 %v3932_v56, %v3926_v53  ;;  %v3937_v61 = vsel %vm338_vm3, %v345_v51, %v346_v54  ;;  %v910_v62 = vrot.slane %v3835_v6, 2  ;;  %v913_v63 = vrot.slane %v3837_v7, 2 }
  0x1e   : > { %3429 = vmatmul.mubr.msk.f32.gmra.mxu1 %vm365_vm2, %v3837_v7  ;;  %3707 = vrot.lane.b32.xlu1 %v3706_v43, %s3758_s15  ;;  %v3949_v2 = vsel %vm338_vm3, %v348_v55, %v349_v57  ;;  %v911_v3 = vrot.slane %v308_v58, 2  ;;  %v914_v4 = vrot.slane %v310_v59, 2  ;;  %v339_v5 = vrot.slane %v3839_v8, 1 }
  0x1f   : > { %3431 = vmatprep.mubr.msk.f32.mxu1 %vm365_vm2, %v3846_v13  ;;  %3702 = vrot.lane.b32.xlu0 %v3701_v60, %s3758_s15  ;;  %v340_v10 = vrot.slane %v300_v36, 1  ;;  %v357_v11 = vrot.slane %v3846_v13, 1  ;;  %v358_v12 = vrot.slane %v312_v32, 1  ;;  %v3963_v20 = vunpack.c.l.bf16 %v295_v0 }
  0x20   : > { %v3958_v17 = vsel %vm897_vm1, %v910_v62, %v911_v3  ;;  %v3961_v19 = vsel %vm897_vm1, %v913_v63, %v914_v4  ;;  %v342_v8 = vrot.slane %v3841_v9, 1  ;;  %v3726_v22 = vpack.i.bf16 %v3949_v2, %v3937_v61 }
  0x21   : > { %v3711_v23 = vpack.i.bf16 %v3961_v19, %v3958_v17  ;;  %v341_v24 = vsel %vm338_vm3, %v339_v5, %v340_v10  ;;  %v343_v25 = vrot.slane %v302_v37, 1  ;;  %v3976_v26 = vsel %vm338_vm3, %v357_v11, %v358_v12  ;;  %v3106_v10 = vld [vmem:[%s4654_s1 + $0x1c] sm:$0xf] }
  0x22   : > { %3432 = vmatmul.mubr.msk.f32.gmra.mxu1 %vm365_vm2, %v3848_v14  ;;  %3717 = vrot.lane.b32.xlu1 %v3716_v52, %s3758_s15  ;;  %v351_v27 = vrot.slane %v3835_v6, 1  ;;  %v352_v28 = vrot.slane %v308_v58, 1  ;;  %v354_v30 = vrot.slane %v3837_v7, 1  ;;  %v355_v32 = vrot.slane %v310_v59, 1  ;;  %v4036_v59 = vld [vmem:[%s4654_s1 + $0x10] sm:$0xf] }
  0x23   : > { %3408 = vmatprep.mubr.msk.f32.mxu0 %vm365_vm2, %v341_v24  ;;  %3712 = vrot.lane.b32.xlu0 %v3711_v23, %s3758_s15  ;;  %v3983_v31 = vsel %vm338_vm3, %v342_v8, %v343_v25  ;;  %v316_v34 = vunpack.c.l.bf16 %v296_v21  ;;  %v360_v35 = vrot.slane %v3848_v14, 1  ;;  %v361_v40 = vrot.slane %v314_v33, 1 }
  0x24   : > { %v3721_v36 = vpack.i.bf16 %v3983_v31, %v3963_v20  ;;  %v3989_v37 = vsel %vm338_vm3, %v351_v27, %v352_v28  ;;  %v1450_v41 = vrot.slane %v3963_v20, 1  ;;  %3409 = vmatmul.mubr.msk.f32.vlgmr.msra.gmra.mxu0 %vm365_vm2, %v3983_v31  ;;  %v3998_v43 = vsel %vm338_vm3, %v354_v30, %v355_v32 }
  0x25   : > { %v1451_v44 = vrot.slane %v316_v34, 1  ;;  %3411 = vmatprep.mubr.msk.f32.mxu0 %vm365_vm2, %v3937_v61  ;;  %3435 = vmatpush3.msk.msra.mxu0 %vm382_vm0, %v3057_v1  ;;  %v3736_v18 = vpack.i.bf16 %v341_v24, %v3976_v26  ;;  %v3731_v33 = vpack.i.bf16 %v3998_v43, %v3989_v37  ;;  %v1695_v45 = vrot.slane %v3963_v20, 2 }
  0x26   : > { %3727 = vrot.lane.b32.xlu1 %v3726_v22, %s3758_s15  ;;  %v1696_v46 = vrot.slane %v316_v34, 2  ;;  %v318_v47 = vunpack.c.l.bf16 %v298_v42  ;;  %v4010_v50 = vsel %vm338_vm3, %v360_v35, %v361_v40  ;;  %v4017_v52 = vunpack.c.h.bf16 %v295_v0  ;;  %3462 = vmatprep.subr.msk.mxu0 %vm382_vm0, %v4036_v59 }
  0x27   : > { %3722 = vrot.lane.b32.xlu0 %v3721_v36, %s3758_s15  ;;  %v4013_v51 = vsel %vm338_vm3, %v1450_v41, %v1451_v44  ;;  %v3126_v41 = vld [vmem:[%s4654_s1 + $0x24] sm:$0xf] }
  0x28   : > { %3412 = vmatmul.mubr.msk.f32.gmra.mxu0 %vm365_vm2, %v3949_v2  ;;  %v3741_v54 = vpack.i.bf16 %v4013_v51, %v4010_v50  ;;  %v4026_v55 = vsel %vm897_vm1, %v1695_v45, %v1696_v46  ;;  %v2184_v57 = vrot.slane %v4017_v52, 1  ;;  %v2185_v58 = vrot.slane %v318_v47, 1 }
  0x29   : > { %3414 = vmatprep.mubr.msk.f32.mxu0 %vm365_vm2, %v3989_v37  ;;  %v2429_v62 = vrot.slane %v4017_v52, 2  ;;  %v2430_v63 = vrot.slane %v318_v47, 2 }
  0x2a   : > { %3737 = vrot.lane.b32.xlu1 %v3736_v18, %s3758_s15  ;;  %v4044_v60 = vsel %vm338_vm3, %v2184_v57, %v2185_v58  ;;  %v3096_v58 = vld [vmem:[%s4654_s1 + $0x18] sm:$0xf] }
  0x2b   : > { %3732 = vrot.lane.b32.xlu0 %v3731_v33, %s3758_s15  ;;  %v4054_v0 = vsel %vm897_vm1, %v2429_v62, %v2430_v63 }
  0x2c   : > { %3415 = vmatmul.mubr.msk.f32.gmra.mxu0 %vm365_vm2, %v3998_v43 }
  0x2d   : > { %3417 = vmatprep.mubr.msk.f32.mxu0 %vm365_vm2, %v3976_v26 }
  0x2e   : > { %1820 = vrot.lane.b32.xlu1 %v4026_v55, %s3758_s15 }
  0x2f   : > { %3742 = vrot.lane.b32.xlu0 %v3741_v54, %s3758_s15 }
  0x30   : > { %3418 = vmatmul.mubr.msk.f32.gmra.mxu0 %vm365_vm2, %v4010_v50 }
  0x32   : > { %2309 = vrot.lane.b32.xlu1 %v4044_v60, %s3758_s15 }
  0x33   : > { %2063 = vrot.lane.b32.xlu0 %v4017_v52, %s3758_s15 }
  0x37   : > { %2554 = vrot.lane.b32.xlu0 %v4054_v0, %s3758_s15 }
  0x88   : > { %v3693_v1 = vpop.permute.xlu1 %3692 }
  0x89   : > { %v4058_v3 = vpop.permute.xlu0 %3682  ;;  %v4069_v8 = vunpack.i.l.bf16 %v3693_v1  ;;  %v4080_v23 = vunpack.i.h.bf16 %v3693_v1 }
  0x8a   : > { %v3685_v4 = vunpack.i.h.bf16 %v4058_v3  ;;  %v3684_v5 = vunpack.i.l.bf16 %v4058_v3  ;;  %v3116_v3 = vld [vmem:[%s4654_s1 + $0x20] sm:$0xf] }
  0x8c   : > { %3450 = vmatprep.mubr.msk.f32.mxu1 %vm365_vm2, %v3684_v5  ;;  %v3698_v11 = vpop.permute.xlu1 %3697 }
  0x8d   : > { %v3688_v12 = vpop.permute.xlu0 %3687  ;;  %3451 = vmatmul.mubr.msk.f32.vlgmr.msra.gmra.mxu1 %vm365_vm2, %v3685_v4  ;;  %v4084_v25 = vunpack.i.l.bf16 %v3698_v11  ;;  %v4090_v28 = vunpack.i.h.bf16 %v3698_v11 }
  0x8e   : > { %v4071_v21 = vunpack.i.h.bf16 %v3688_v12  ;;  %v4073_v22 = vunpack.i.l.bf16 %v3688_v12  ;;  %3477 = vmatpush3.msk.msra.mxu1 %vm382_vm0, %v3883_v29  ;;  %v3146_v12 = vld [vmem:[%s4654_s1 + $0x2c] sm:$0xf] }
  0x8f   : > { %3504 = vmatprep.subr.msk.mxu1 %vm382_vm0, %v3106_v10 }
  0x90   : > { %3453 = vmatprep.mubr.msk.f32.mxu1 %vm365_vm2, %v4073_v22  ;;  %v3708_v24 = vpop.permute.xlu1 %3707 }
  0x91   : > { %3454 = vmatmul.mubr.msk.f32.gmra.mxu1 %vm365_vm2, %v4071_v21  ;;  %v4088_v27 = vpop.permute.xlu0 %3702  ;;  %v4100_v36 = vunpack.i.l.bf16 %v3708_v24  ;;  %v4108_v42 = vunpack.i.h.bf16 %v3708_v24  ;;  %v3136_v24 = vld [vmem:[%s4654_s1 + $0x28] sm:$0xf] }
  0x92   : > { %3456 = vmatprep.mubr.msk.f32.mxu1 %vm365_vm2, %v4069_v8  ;;  %v3704_v30 = vunpack.i.l.bf16 %v4088_v27  ;;  %v3705_v34 = vunpack.i.h.bf16 %v4088_v27  ;;  %v3156_v27 = vld [vmem:[%s4654_s1 + $0x30] sm:$0xf] }
  0x94   : > { %v3718_v29 = vpop.permute.xlu1 %3717 }
  0x95   : > { %3457 = vmatmul.mubr.msk.f32.gmra.mxu1 %vm365_vm2, %v4080_v23  ;;  %v3713_v32 = vpop.permute.xlu0 %3712  ;;  %v4133_v62 = vunpack.i.l.bf16 %v3718_v29  ;;  %v4144_v1 = vunpack.i.h.bf16 %v3718_v29  ;;  %v3186_v29 = vld [vmem:[%s4654_s1 + $0x3c] sm:$0xf] }
  0x96   : > { %3459 = vmatprep.mubr.msk.f32.mxu1 %vm365_vm2, %v4084_v25  ;;  %v4116_v45 = vunpack.i.l.bf16 %v3713_v32  ;;  %v4125_v57 = vunpack.i.h.bf16 %v3713_v32  ;;  %v3206_v32 = vld [vmem:[%s4654_s1 + $0x44] sm:$0xf] }
  0x98   : > { %v3728_v35 = vpop.permute.xlu1 %3727 }
  0x99   : > { %3460 = vmatmul.mubr.msk.f32.gmra.mxu1 %vm365_vm2, %v4090_v28  ;;  %v4103_v40 = vpop.permute.xlu0 %3722  ;;  %v4114_v33 = vunpack.i.l.bf16 %v3728_v35  ;;  %v4123_v54 = vunpack.i.h.bf16 %v3728_v35 }
  0x9a   : > { %3478 = vmatprep.mubr.msk.f32.mxu1 %vm365_vm2, %v3704_v30  ;;  %v3725_v18 = vunpack.i.h.bf16 %v4103_v40 }
  0x9c   : > { %v3738_v44 = vpop.permute.xlu1 %3737 }
  0x9d   : > { %3479 = vmatmul.mubr.msk.f32.vlgmr.msra.gmra.mxu1 %vm365_vm2, %v3705_v34  ;;  %v3740_v46 = vunpack.i.h.bf16 %v3738_v44  ;;  %v3733_v47 = vpop.permute.xlu0 %3732 }
  0x9e   : > { %3505 = vmatpush3.msk.msra.mxu1 %vm382_vm0, %v3106_v10  ;;  %3481 = vmatprep.mubr.msk.f32.mxu1 %vm365_vm2, %v4100_v36  ;;  %v4139_v63 = vunpack.i.l.bf16 %v3733_v47  ;;  %v4146_v5 = vunpack.i.h.bf16 %v3733_v47  ;;  %v4152_v10 = vunpack.i.l.bf16 %v3738_v44 }
  0x9f   : > { %3532 = vmatprep.subr.msk.mxu1 %vm382_vm0, %v3126_v41  ;;  %3436 = vmatprep.mubr.msk.f32.mxu0 %vm365_vm2, %v3740_v46 }
  0xa0   : > { %3437 = vmatmul.mubr.msk.f32.vlgmr.msra.gmra.mxu0 %vm365_vm2, %v3725_v18 }
  0xa1   : > { %3482 = vmatmul.mubr.msk.f32.gmra.mxu1 %vm365_vm2, %v4108_v42  ;;  %3439 = vmatprep.mubr.msk.f32.mxu0 %vm365_vm2, %v4114_v33 }
  0xa2   : > { %3484 = vmatprep.mubr.msk.f32.mxu1 %vm365_vm2, %v4116_v45  ;;  %3463 = vmatpush3.msk.msra.mxu0 %vm382_vm0, %v4036_v59  ;;  %v4158_v59 = vpop.permute.xlu0 %3742 }
  0xa3   : > { %3490 = vmatprep.subr.msk.mxu0 %vm382_vm0, %v3096_v58  ;;  %v4165_v11 = vunpack.i.l.bf16 %v4158_v59 }
  0xa4   : > { %3440 = vmatmul.mubr.msk.f32.gmra.mxu0 %vm365_vm2, %v4123_v54 }
  0xa5   : > { %3485 = vmatmul.mubr.msk.f32.gmra.mxu1 %vm365_vm2, %v4125_v57  ;;  %3442 = vmatprep.mubr.msk.f32.mxu0 %vm365_vm2, %v4139_v63 }
  0xa6   : > { %3487 = vmatprep.mubr.msk.f32.mxu1 %vm365_vm2, %v4133_v62 }
  0xa8   : > { %3443 = vmatmul.mubr.msk.f32.gmra.mxu0 %vm365_vm2, %v4146_v5 }
  0xa9   : > { %3488 = vmatmul.mubr.msk.f32.gmra.mxu1 %vm365_vm2, %v4144_v1  ;;  %3445 = vmatprep.mubr.msk.f32.mxu0 %vm365_vm2, %v4152_v10 }
  0xaa   : > { %3506 = vmatprep.mubr.msk.f32.mxu1 %vm365_vm2, %v3685_v4  ;;  %v3166_v4 = vld [vmem:[%s4654_s1 + $0x34] sm:$0xf] }
  0xac   : > { %3446 = vmatmul.mubr.msk.f32.gmra.mxu0 %vm365_vm2, %v4165_v11 }
  0xad   : > { %3507 = vmatmul.mubr.msk.f32.vlgmr.msra.gmra.mxu1 %vm365_vm2, %v4073_v22  ;;  %3464 = vmatprep.mubr.msk.f32.mxu0 %vm365_vm2, %v3926_v53  ;;  %v3724_v53 = vunpack.i.l.bf16 %v4103_v40 }
  0xae   : > { %3533 = vmatpush3.msk.msra.mxu1 %vm382_vm0, %v3126_v41  ;;  %3509 = vmatprep.mubr.msk.f32.mxu1 %vm365_vm2, %v4071_v21 }
  0xaf   : > { %3560 = vmatprep.subr.msk.mxu1 %vm382_vm0, %v3146_v12 }
  0xb0   : > { %3465 = vmatmul.mubr.msk.f32.vlgmr.msra.gmra.mxu0 %vm365_vm2, %v3932_v56 }
  0xb1   : > { %3510 = vmatmul.mubr.msk.f32.gmra.mxu1 %vm365_vm2, %v4069_v8  ;;  %3467 = vmatprep.mubr.msk.f32.mxu0 %vm365_vm2, %v3897_v38 }
  0xb2   : > { %3512 = vmatprep.mubr.msk.f32.mxu1 %vm365_vm2, %v4080_v23  ;;  %3491 = vmatpush3.msk.msra.mxu0 %vm382_vm0, %v3096_v58 }
  0xb3   : > { %3518 = vmatprep.subr.msk.mxu0 %vm382_vm0, %v3116_v3 }
  0xb4   : > { %3468 = vmatmul.mubr.msk.f32.gmra.mxu0 %vm365_vm2, %v3900_v39 }
  0xb5   : > { %3513 = vmatmul.mubr.msk.f32.gmra.mxu1 %vm365_vm2, %v4084_v25  ;;  %3470 = vmatprep.mubr.msk.f32.mxu0 %vm365_vm2, %v3958_v17 }
  0xb6   : > { %3515 = vmatprep.mubr.msk.f32.mxu1 %vm365_vm2, %v4090_v28 }
  0xb8   : > { %3471 = vmatmul.mubr.msk.f32.gmra.mxu0 %vm365_vm2, %v3961_v19 }
  0xb9   : > { %3516 = vmatmul.mubr.msk.f32.gmra.mxu1 %vm365_vm2, %v3724_v53  ;;  %3473 = vmatprep.mubr.msk.f32.mxu0 %vm365_vm2, %v3917_v48 }
  0xba   : > { %3534 = vmatprep.mubr.msk.f32.mxu1 %vm365_vm2, %v3725_v18 }
  0xbc   : > { %3474 = vmatmul.mubr.msk.f32.gmra.mxu0 %vm365_vm2, %v3920_v49 }
  0xbd   : > { %3535 = vmatmul.mubr.msk.f32.vlgmr.msra.gmra.mxu1 %vm365_vm2, %v4114_v33  ;;  %3492 = vmatprep.mubr.msk.f32.mxu0 %vm365_vm2, %v3841_v9  ;;  %v3745_v9 = vunpack.i.h.bf16 %v4158_v59 }
  0xbe   : > { %3561 = vmatpush3.msk.msra.mxu1 %vm382_vm0, %v3146_v12  ;;  %3537 = vmatprep.mubr.msk.f32.mxu1 %vm365_vm2, %v4123_v54 }
  0xbf   : > { %3588 = vmatprep.subr.msk.mxu1 %vm382_vm0, %v3166_v4 }
  0xc0   : > { %3493 = vmatmul.mubr.msk.f32.vlgmr.msra.gmra.mxu0 %vm365_vm2, %v3850_v15 }
  0xc1   : > { %3538 = vmatmul.mubr.msk.f32.gmra.mxu1 %vm365_vm2, %v4139_v63  ;;  %3495 = vmatprep.mubr.msk.f32.mxu0 %vm365_vm2, %v3852_v16 }
  0xc2   : > { %3540 = vmatprep.mubr.msk.f32.mxu1 %vm365_vm2, %v4146_v5  ;;  %3519 = vmatpush3.msk.msra.mxu0 %vm382_vm0, %v3116_v3 }
  0xc3   : > { %3546 = vmatprep.subr.msk.mxu0 %vm382_vm0, %v3136_v24 }
  0xc4   : > { %3496 = vmatmul.mubr.msk.f32.gmra.mxu0 %vm365_vm2, %v3835_v6 }
  0xc5   : > { %3541 = vmatmul.mubr.msk.f32.gmra.mxu1 %vm365_vm2, %v4152_v10  ;;  %3498 = vmatprep.mubr.msk.f32.mxu0 %vm365_vm2, %v3837_v7 }
  0xc6   : > { %3543 = vmatprep.mubr.msk.f32.mxu1 %vm365_vm2, %v4165_v11 }
  0xc8   : > { %3499 = vmatmul.mubr.msk.f32.gmra.mxu0 %vm365_vm2, %v3846_v13 }
  0xc9   : > { %3544 = vmatmul.mubr.msk.f32.gmra.mxu1 %vm365_vm2, %v3745_v9  ;;  %3501 = vmatprep.mubr.msk.f32.mxu0 %vm365_vm2, %v3848_v14 }
  0xca   : > { %3562 = vmatprep.mubr.msk.f32.mxu1 %vm365_vm2, %v3705_v34 }
  0xcc   : > { %3502 = vmatmul.mubr.msk.f32.gmra.mxu0 %vm365_vm2, %v3963_v20 }
  0xcd   : > { %3563 = vmatmul.mubr.msk.f32.vlgmr.msra.gmra.mxu1 %vm365_vm2, %v4100_v36  ;;  %3520 = vmatprep.mubr.msk.f32.mxu0 %vm365_vm2, %v3983_v31  ;;  %v4292_v31 = vpop.permute.xlu1 %1820 }
  0xce   : > { %3589 = vmatpush3.msk.msra.mxu1 %vm382_vm0, %v3166_v4  ;;  %3565 = vmatprep.mubr.msk.f32.mxu1 %vm365_vm2, %v4108_v42 }
  0xcf   : > { %3616 = vmatprep.subr.msk.mxu1 %vm382_vm0, %v3186_v29 }
  0xd0   : > { %3521 = vmatmul.mubr.msk.f32.vlgmr.msra.gmra.mxu0 %vm365_vm2, %v3937_v61 }
  0xd1   : > { %3566 = vmatmul.mubr.msk.f32.gmra.mxu1 %vm365_vm2, %v4116_v45  ;;  %3523 = vmatprep.mubr.msk.f32.mxu0 %vm365_vm2, %v3949_v2 }
  0xd2   : > { %3568 = vmatprep.mubr.msk.f32.mxu1 %vm365_vm2, %v4125_v57  ;;  %3547 = vmatpush3.msk.msra.mxu0 %vm382_vm0, %v3136_v24 }
  0xd3   : > { %3574 = vmatprep.subr.msk.mxu0 %vm382_vm0, %v3156_v27 }
  0xd4   : > { %3524 = vmatmul.mubr.msk.f32.gmra.mxu0 %vm365_vm2, %v3989_v37 }
  0xd5   : > { %3569 = vmatmul.mubr.msk.f32.gmra.mxu1 %vm365_vm2, %v4133_v62  ;;  %3526 = vmatprep.mubr.msk.f32.mxu0 %vm365_vm2, %v3998_v43 }
  0xd6   : > { %3571 = vmatprep.mubr.msk.f32.mxu1 %vm365_vm2, %v4144_v1  ;;  %v3424_v30 = vpop.f32.mrf.mxu1 }
  0xd8   : > { %3527 = vmatmul.mubr.msk.f32.gmra.mxu0 %vm365_vm2, %v3976_v26  ;;  %v576_v34 = vpop.f32.mrf.mxu1 }
  0xd9   : > { %3572 = vmatmul.mubr.msk.f32.gmra.mxu1 %vm365_vm2, %v4292_v31  ;;  %3529 = vmatprep.mubr.msk.f32.mxu0 %vm365_vm2, %v4010_v50 }
  0xda   : > { %3590 = vmatprep.mubr.msk.f32.mxu1 %vm365_vm2, %v4073_v22  ;;  %v3427_v22 = vpop.f32.mrf.mxu1 }
  0xdc   : > { %3530 = vmatmul.mubr.msk.f32.gmra.mxu0 %vm365_vm2, %v4013_v51 }
  0xdd   : > { %3591 = vmatmul.mubr.msk.f32.vlgmr.msra.gmra.mxu1 %vm365_vm2, %v4071_v21  ;;  %3548 = vmatprep.mubr.msk.f32.mxu0 %vm365_vm2, %v3932_v56  ;;  %v3176_v21 = vld [vmem:[%s4654_s1 + $0x38] sm:$0xf] }
  0xde   : > { %3617 = vmatpush3.msk.msra.mxu1 %vm382_vm0, %v3186_v29  ;;  %3593 = vmatprep.mubr.msk.f32.mxu1 %vm365_vm2, %v4069_v8  ;;  %v586_v8 = vpop.f32.mrf.mxu1 }
  0xdf   : > { %3644 = vmatprep.subr.msk.mxu1 %vm382_vm0, %v3206_v32 }
  0xe0   : > { %3549 = vmatmul.mubr.msk.f32.vlgmr.msra.gmra.mxu0 %vm365_vm2, %v3897_v38  ;;  %v3430_v44 = vpop.f32.mrf.mxu1 }
  0xe1   : > { %3594 = vmatmul.mubr.msk.f32.gmra.mxu1 %vm365_vm2, %v4080_v23  ;;  %3551 = vmatprep.mubr.msk.f32.mxu0 %vm365_vm2, %v3900_v39  ;;  %v2064_v23 = vpop.permute.xlu0 %2063 }
  0xe2   : > { %3596 = vmatprep.mubr.msk.f32.mxu1 %vm365_vm2, %v4084_v25  ;;  %3575 = vmatpush3.msk.msra.mxu0 %vm382_vm0, %v3156_v27  ;;  %v596_v58 = vpop.f32.mrf.mxu1 }
  0xe3   : > { %3602 = vmatprep.subr.msk.mxu0 %vm382_vm0, %v3176_v21 }
  0xe4   : > { %3552 = vmatmul.mubr.msk.f32.gmra.mxu0 %vm365_vm2, %v3958_v17  ;;  %v3410_v56 = vpop.f32.mrf.mxu0 }
  0xe5   : > { %3597 = vmatmul.mubr.msk.f32.gmra.mxu1 %vm365_vm2, %v4090_v28  ;;  %3554 = vmatprep.mubr.msk.f32.mxu0 %vm365_vm2, %v3961_v19  ;;  %v4339_v25 = vadd.f32 %v3424_v30, %v3410_v56 }
  0xe6   : > { %3599 = vmatprep.mubr.msk.f32.mxu1 %vm365_vm2, %v3724_v53  ;;  %v452_v35 = vpop.f32.mrf.mxu0 }
  0xe7   : > { %v4341_v41 = vadd.f32 %v576_v34, %v452_v35 }
  0xe8   : > { %3555 = vmatmul.mubr.msk.f32.gmra.mxu0 %vm365_vm2, %v3917_v48  ;;  %v3413_v28 = vpop.f32.mrf.mxu0 }
  0xe9   : > { %3600 = vmatmul.mubr.msk.f32.gmra.mxu1 %vm365_vm2, %v2064_v23  ;;  %3557 = vmatprep.mubr.msk.f32.mxu0 %vm365_vm2, %v3920_v49  ;;  %v4350_v40 = vadd.f32 %v3427_v22, %v3413_v28 }
  0xea   : > { %3618 = vmatprep.mubr.msk.f32.mxu1 %vm365_vm2, %v4114_v33  ;;  %v462_v18 = vpop.f32.mrf.mxu0 }
  0xeb   : > { %v4352_v46 = vadd.f32 %v586_v8, %v462_v18 }
  0xec   : > { %3558 = vmatmul.mubr.msk.f32.gmra.mxu0 %vm365_vm2, %v4026_v55  ;;  %v3416_v47 = vpop.f32.mrf.mxu0 }
  0xed   : > { %3619 = vmatmul.mubr.msk.f32.vlgmr.msra.gmra.mxu1 %vm365_vm2, %v4123_v54  ;;  %v4361_v33 = vadd.f32 %v3430_v44, %v3416_v47  ;;  %3576 = vmatprep.mubr.msk.f32.mxu0 %vm365_vm2, %v3850_v15  ;;  %v3196_v54 = vld [vmem:[%s4654_s1 + $0x40] sm:$0xf] }
  0xee   : > { %3645 = vmatpush3.msk.msra.mxu1 %vm382_vm0, %v3206_v32  ;;  %3621 = vmatprep.mubr.msk.f32.mxu1 %vm365_vm2, %v4139_v63  ;;  %v472_v12 = vpop.f32.mrf.mxu0  ;;  %v3433_v63 = vpop.f32.mrf.mxu1 }
  0xef   : > { %v4365_v3 = vadd.f32 %v596_v58, %v472_v12 }
  0xf0   : > { %3577 = vmatmul.mubr.msk.f32.vlgmr.msra.gmra.mxu0 %vm365_vm2, %v3852_v16  ;;  %v3419_v53 = vpop.f32.mrf.mxu0  ;;  %v2310_v16 = vpop.permute.xlu1 %2309 }
  0xf1   : > { %3622 = vmatmul.mubr.msk.f32.gmra.mxu1 %vm365_vm2, %v4146_v5  ;;  %3579 = vmatprep.mubr.msk.f32.mxu0 %vm365_vm2, %v3835_v6  ;;  %v4378_v15 = vadd.f32 %v3433_v63, %v3419_v53  ;;  %v2555_v6 = vpop.permute.xlu0 %2554 }
  0xf2   : > { %3624 = vmatprep.mubr.msk.f32.mxu1 %vm365_vm2, %v4152_v10  ;;  %3603 = vmatpush3.msk.msra.mxu0 %vm382_vm0, %v3176_v21 }
  0xf3   : > { %3630 = vmatprep.subr.msk.mxu0 %vm382_vm0, %v3196_v54 }
  0xf4   : > { %3580 = vmatmul.mubr.msk.f32.gmra.mxu0 %vm365_vm2, %v3837_v7  ;;  %v4446_v7 = vpop.f32.mrf.mxu1 }
  0xf5   : > { %3625 = vmatmul.mubr.msk.f32.gmra.mxu1 %vm365_vm2, %v4165_v11  ;;  %3582 = vmatprep.mubr.msk.f32.mxu0 %vm365_vm2, %v3846_v13 }
  0xf6   : > { %3627 = vmatprep.mubr.msk.f32.mxu1 %vm365_vm2, %v3745_v9 }
  0xf8   : > { %3583 = vmatmul.mubr.msk.f32.gmra.mxu0 %vm365_vm2, %v3848_v14 }
  0xf9   : > { %3628 = vmatmul.mubr.msk.f32.gmra.mxu1 %vm365_vm2, %v2310_v16  ;;  %3585 = vmatprep.mubr.msk.f32.mxu0 %vm365_vm2, %v3963_v20  ;;  %v4448_v20 = vpop.f32.mrf.mxu0 }
  0xfa   : > { %3646 = vmatprep.mubr.msk.f32.mxu1 %vm365_vm2, %v4100_v36 }
  0xfc   : > { %3586 = vmatmul.mubr.msk.f32.gmra.mxu0 %vm365_vm2, %v4017_v52 }
  0xfd   : > { %3647 = vmatmul.mubr.msk.f32.vlgmr.msra.gmra.mxu1 %vm365_vm2, %v4108_v42  ;;  %3604 = vmatprep.mubr.msk.f32.mxu0 %vm365_vm2, %v3937_v61 }
  0xfe   : > { %3649 = vmatprep.mubr.msk.f32.mxu1 %vm365_vm2, %v4116_v45 }
 0x100   : > { %3605 = vmatmul.mubr.msk.f32.vlgmr.msra.gmra.mxu0 %vm365_vm2, %v3949_v2 }
 0x101   : > { %3650 = vmatmul.mubr.msk.f32.gmra.mxu1 %vm365_vm2, %v4125_v57  ;;  %3607 = vmatprep.mubr.msk.f32.mxu0 %vm365_vm2, %v3989_v37 }
 0x102   : > { %3652 = vmatprep.mubr.msk.f32.mxu1 %vm365_vm2, %v4133_v62  ;;  %3631 = vmatpush3.msk.msra.mxu0 %vm382_vm0, %v3196_v54 }
 0x104   : > { %3608 = vmatmul.mubr.msk.f32.gmra.mxu0 %vm365_vm2, %v3998_v43 }
 0x105   : > { %3653 = vmatmul.mubr.msk.f32.gmra.mxu1 %vm365_vm2, %v4144_v1  ;;  %3610 = vmatprep.mubr.msk.f32.mxu0 %vm365_vm2, %v3976_v26 }
 0x106   : > { %3655 = vmatprep.mubr.msk.f32.mxu1 %vm365_vm2, %v4292_v31 }
 0x108   : > { %3611 = vmatmul.mubr.msk.f32.gmra.mxu0 %vm365_vm2, %v4010_v50 }
 0x109   : > { %3656 = vmatmul.mubr.msk.f32.gmra.mxu1 %vm365_vm2, %v2555_v6  ;;  %3613 = vmatprep.mubr.msk.f32.mxu0 %vm365_vm2, %v4013_v51 }
 0x10c   : > { %3614 = vmatmul.mubr.msk.f32.gmra.mxu0 %vm365_vm2, %v4044_v60 }
 0x10d   : > { %3632 = vmatprep.mubr.msk.f32.mxu0 %vm365_vm2, %v3897_v38 }
 0x110   : > { %3633 = vmatmul.mubr.msk.f32.vlgmr.msra.gmra.mxu0 %vm365_vm2, %v3900_v39 }
 0x111   : > { %3635 = vmatprep.mubr.msk.f32.mxu0 %vm365_vm2, %v3958_v17 }
 0x114   : > { %3636 = vmatmul.mubr.msk.f32.gmra.mxu0 %vm365_vm2, %v3961_v19 }
 0x115   : > { %3638 = vmatprep.mubr.msk.f32.mxu0 %vm365_vm2, %v3917_v48 }
 0x118   : > { %3639 = vmatmul.mubr.msk.f32.gmra.mxu0 %vm365_vm2, %v3920_v49 }
 0x119   : > { %3641 = vmatprep.mubr.msk.f32.mxu0 %vm365_vm2, %v4026_v55 }
 0x11c   : > { %3642 = vmatmul.mubr.msk.f32.gmra.mxu0 %vm365_vm2, %v4054_v0 }
 0x14d   : > { %v3452_v13 = vpop.f32.mrf.mxu1 }
 0x14f   : > { %v858_v14 = vpop.f32.mrf.mxu1 }
 0x151   : > { %v3455_v38 = vpop.f32.mrf.mxu1 }
 0x153   : > { %v868_v39 = vpop.f32.mrf.mxu1 }
 0x155   : > { %v3458_v61 = vpop.f32.mrf.mxu1 }
 0x157   : > { %v878_v2 = vpop.f32.mrf.mxu1 }
 0x159   : > { %v3461_v17 = vpop.f32.mrf.mxu1 }
 0x15b   : > { %v888_v19 = vpop.f32.mrf.mxu1 }
 0x15d   : > { %v3480_v48 = vpop.f32.mrf.mxu1 }
 0x15f   : > { %v1159_v49 = vpop.f32.mrf.mxu1 }
 0x160   : > { %v3438_v26 = vpop.f32.mrf.mxu0 }
 0x161   : > { %v3483_v37 = vpop.f32.mrf.mxu1  ;;  %v864_v43 = vadd.f32 %v3452_v13, %v3438_v26 }
 0x162   : > { %v718_v50 = vpop.f32.mrf.mxu0 }
 0x163   : > { %v1169_v51 = vpop.f32.mrf.mxu1  ;;  %v859_v52 = vadd.f32 %v858_v14, %v718_v50  ;;  %v1199_v55 = vadd.f32 %v3480_v48, %v864_v43 }
 0x164   : > { %v3441_v60 = vpop.f32.mrf.mxu0 }
 0x165   : > { %v3486_v0 = vpop.f32.mrf.mxu1  ;;  %v874_v36 = vadd.f32 %v3455_v38, %v3441_v60  ;;  %v1198_v42 = vadd.f32 %v1159_v49, %v859_v52 }
 0x166   : > { %v728_v45 = vpop.f32.mrf.mxu0 }
 0x167   : > { %v1179_v57 = vpop.f32.mrf.mxu1  ;;  %v869_v62 = vadd.f32 %v868_v39, %v728_v45  ;;  %v1201_v1 = vadd.f32 %v3483_v37, %v874_v36 }
 0x168   : > { %v3444_v5 = vpop.f32.mrf.mxu0 }
 0x169   : > { %v3489_v10 = vpop.f32.mrf.mxu1  ;;  %v884_v59 = vadd.f32 %v3458_v61, %v3444_v5  ;;  %v1200_v11 = vadd.f32 %v1169_v51, %v869_v62 }
 0x16a   : > { %v738_v4 = vpop.f32.mrf.mxu0 }
 0x16b   : > { %v1189_v24 = vpop.f32.mrf.mxu1  ;;  %v879_v9 = vadd.f32 %v878_v2, %v738_v4  ;;  %v1203_v29 = vadd.f32 %v3486_v0, %v884_v59 }
 0x16c   : > { %v3447_v27 = vpop.f32.mrf.mxu0 }
 0x16d   : > { %v3508_v31 = vpop.f32.mrf.mxu1  ;;  %v894_v30 = vadd.f32 %v3461_v17, %v3447_v27  ;;  %v1202_v34 = vadd.f32 %v1179_v57, %v879_v9 }
 0x16e   : > { %v4450_v32 = vadd.f32 %v3508_v31, %v1199_v55  ;;  %v748_v21 = vpop.f32.mrf.mxu0 }
 0x16f   : > { %v1402_v22 = vpop.f32.mrf.mxu1  ;;  %v889_v56 = vadd.f32 %v888_v19, %v748_v21  ;;  %v1205_v23 = vadd.f32 %v3489_v10, %v894_v30 }
 0x170   : > { %v4452_v8 = vadd.f32 %v1402_v22, %v1198_v42  ;;  %v3466_v35 = vpop.f32.mrf.mxu0 }
 0x171   : > { %v3511_v28 = vpop.f32.mrf.mxu1  ;;  %v1049_v44 = vadd.f32 %v3466_v35, %v4339_v25  ;;  %v1204_v47 = vadd.f32 %v1189_v24, %v889_v56 }
 0x172   : > { %v4455_v18 = vadd.f32 %v3511_v28, %v1201_v1  ;;  %v1009_v58 = vpop.f32.mrf.mxu0 }
 0x173   : > { %v1412_v12 = vpop.f32.mrf.mxu1  ;;  %v1048_v54 = vadd.f32 %v1009_v58, %v4341_v41 }
 0x174   : > { %v4458_v53 = vadd.f32 %v1412_v12, %v1200_v11  ;;  %v3469_v63 = vpop.f32.mrf.mxu0  ;;  %v607_v11 = vadd.f32 %v4446_v7, %v4448_v20 }
 0x175   : > { %v3514_v16 = vpop.f32.mrf.mxu1  ;;  %v1051_v6 = vadd.f32 %v3469_v63, %v4350_v40 }
 0x176   : > { %v4461_v13 = vadd.f32 %v3514_v16, %v1203_v29  ;;  %v1019_v14 = vpop.f32.mrf.mxu0 }
 0x177   : > { %v1422_v38 = vpop.f32.mrf.mxu1  ;;  %v1050_v39 = vadd.f32 %v1019_v14, %v4352_v46 }
 0x178   : > { %v4464_v25 = vadd.f32 %v1422_v38, %v1202_v34  ;;  %v3472_v61 = vpop.f32.mrf.mxu0 }
 0x179   : > { %v3517_v2 = vpop.f32.mrf.mxu1  ;;  %v1053_v17 = vadd.f32 %v3472_v61, %v4361_v33 }
 0x17a   : > { %v4467_v19 = vadd.f32 %v3517_v2, %v1205_v23  ;;  %v1029_v41 = vpop.f32.mrf.mxu0 }
 0x17b   : > { %v1432_v48 = vpop.f32.mrf.mxu1  ;;  %v1052_v49 = vadd.f32 %v1029_v41, %v4365_v3 }
 0x17c   : > { %v4470_v26 = vadd.f32 %v1432_v48, %v1204_v47  ;;  %v3475_v40 = vpop.f32.mrf.mxu0 }
 0x17d   : > { %v3536_v37 = vpop.f32.mrf.mxu1  ;;  %v1055_v43 = vadd.f32 %v3475_v40, %v4378_v15 }
 0x17e   : > { %v1039_v50 = vpop.f32.mrf.mxu0  ;;  %v1688_v40 = vadd.f32 %v3536_v37, %v4450_v32 }
 0x17f   : > { %v1648_v46 = vpop.f32.mrf.mxu1  ;;  %v1054_v29 = vadd.f32 %v1039_v50, %v607_v11 }
 0x180   : > { %v3494_v51 = vpop.f32.mrf.mxu0  ;;  %v1687_v50 = vadd.f32 %v1648_v46, %v4452_v8 }
 0x181   : > { %v3539_v52 = vpop.f32.mrf.mxu1  ;;  %v4473_v55 = vadd.f32 %v3494_v51, %v1049_v44 }
 0x182   : > { %v1280_v60 = vpop.f32.mrf.mxu0 }
 0x183   : > { %v1658_v33 = vpop.f32.mrf.mxu1  ;;  %v4475_v0 = vadd.f32 %v1280_v60, %v1048_v54 }
 0x184   : > { %v3497_v36 = vpop.f32.mrf.mxu0 }
 0x185   : > { %v3542_v42 = vpop.f32.mrf.mxu1  ;;  %v4477_v45 = vadd.f32 %v3497_v36, %v1051_v6 }
 0x186   : > { %v1290_v3 = vpop.f32.mrf.mxu0  ;;  %v1692_v32 = vadd.f32 %v3542_v42, %v4461_v13 }
 0x187   : > { %v1668_v57 = vpop.f32.mrf.mxu1  ;;  %v4479_v62 = vadd.f32 %v1290_v3, %v1050_v39  ;;  %v1690_v3 = vadd.f32 %v3539_v52, %v4455_v18 }
 0x188   : > { %v3500_v1 = vpop.f32.mrf.mxu0 }
 0x189   : > { %v4481_v15 = vpop.f32.mrf.mxu1  ;;  %v4483_v5 = vadd.f32 %v3500_v1, %v1053_v17 }
 0x18a   : > { %v1300_v10 = vpop.f32.mrf.mxu0  ;;  %v1694_v13 = vadd.f32 %v4481_v15, %v4467_v19 }
 0x18b   : > { %v4485_v59 = vpop.f32.mrf.mxu1  ;;  %v4489_v4 = vadd.f32 %v1300_v10, %v1052_v49 }
 0x18c   : > { %v3503_v24 = vpop.f32.mrf.mxu0 }
 0x18d   : > { %v3564_v9 = vpop.f32.mrf.mxu1  ;;  %v4491_v27 = vadd.f32 %v3503_v24, %v1055_v43  ;;  %v1689_v24 = vadd.f32 %v1658_v33, %v4458_v53 }
 0x18e   : > { %v1310_v31 = vpop.f32.mrf.mxu0  ;;  %v1933_v51 = vadd.f32 %v3564_v9, %v1688_v40 }
 0x18f   : > { %4661 = vst [vmem:[#allocation2_spill] sm:$0xff] %v4491_v27  ;;  %v1893_v30 = vpop.f32.mrf.mxu1  ;;  %v4493_v34 = vadd.f32 %v1310_v31, %v1054_v29 }
 0x190   : > { %v4497_v20 = vpop.f32.mrf.mxu0  ;;  %v1932_v1 = vadd.f32 %v1893_v30, %v1687_v50 }
 0x191   : > { %4662 = vst [vmem:[#allocation3_spill] sm:$0xff] %v4493_v34  ;;  %v3567_v21 = vpop.f32.mrf.mxu1 }
 0x192   : > { %v4499_v12 = vpop.f32.mrf.mxu0  ;;  %v1935_v29 = vadd.f32 %v3567_v21, %v1690_v3  ;;  %v3760_v3 = vmov 0.0  }
 0x193   : > { %v1903_v22 = vpop.f32.mrf.mxu1  ;;  %3658 = vmatprep.subr.mxu0 %v3760_v3  ;;  %3663 = vmatprep.subr.mxu1 %v3760_v3 }
 0x194   : > { %v4501_v16 = vpop.f32.mrf.mxu0  ;;  %v1934_v8 = vadd.f32 %v1903_v22, %v1689_v24  ;;  %3660 = vmatprep.mubr.msk.f32.mxu0 %vm3761_vm4, %v3760_v3  ;;  %3665 = vmatprep.mubr.msk.f32.mxu1 %vm3761_vm4, %v3760_v3 }
 0x195   : > { %v3570_v56 = vpop.f32.mrf.mxu1 }
 0x196   : > { %v4503_v38 = vpop.f32.mrf.mxu0  ;;  %v1937_v52 = vadd.f32 %v3570_v56, %v1692_v32 }
 0x197   : > { %v1913_v23 = vpop.f32.mrf.mxu1 }
 0x198   : > { %v4505_v2 = vpop.f32.mrf.mxu0 }
 0x199   : > { %v3573_v35 = vpop.f32.mrf.mxu1 }
 0x19a   : > { %v4507_v48 = vpop.f32.mrf.mxu0  ;;  %v1939_v56 = vadd.f32 %v3573_v35, %v1694_v13 }
 0x19b   : > { %v4495_v28 = vpop.f32.mrf.mxu1 }
 0x19c   : > { %v4511_v60 = vpop.f32.mrf.mxu0 }
 0x19d   : > { %v3592_v44 = vpop.f32.mrf.mxu1  ;;  %4663 = vst [vmem:[#allocation4_spill] sm:$0xff] %v4511_v60  ;;  %v1691_v60 = vadd.f32 %v1668_v57, %v4464_v25  ;;  %v1693_v25 = vadd.f32 %v4485_v59, %v4470_v26 }
 0x19e   : > { %v2176_v10 = vadd.f32 %v3592_v44, %v1933_v51  ;;  %v4515_v31 = vpop.f32.mrf.mxu0 }
 0x19f   : > { %v2136_v7 = vpop.f32.mrf.mxu1  ;;  %v1936_v21 = vadd.f32 %v1913_v23, %v1691_v60  ;;  %v1938_v15 = vadd.f32 %v4495_v28, %v1693_v25  ;;  %v1565_v25 = vadd.f32 %v4499_v12, %v4475_v0 }
 0x1a0   : > { %v2175_v34 = vadd.f32 %v2136_v7, %v1932_v1  ;;  %v4519_v30 = vpop.f32.mrf.mxu0  ;;  %v2837_v1 = vld [vmem:[%s4658_s5] sm:$0xf] }
 0x1a1   : > { %v3595_v47 = vpop.f32.mrf.mxu1  ;;  %3664 = vmatpush3.msk.msra.mxu1 %vm382_vm0, %v2837_v1 }
 0x1a2   : > { %v2178_v46 = vadd.f32 %v3595_v47, %v1935_v29  ;;  %v4527_v7 = vpop.f32.mrf.mxu0 }
 0x1a3   : > { %v2146_v58 = vpop.f32.mrf.mxu1 }
 0x1a4   : > { %v2177_v44 = vadd.f32 %v2146_v58, %v1934_v8 }
 0x1a5   : > { %v3598_v54 = vpop.f32.mrf.mxu1 }
 0x1a6   : > { %v2180_v22 = vadd.f32 %v3598_v54, %v1937_v52 }
 0x1a7   : > { %v2156_v63 = vpop.f32.mrf.mxu1 }
 0x1a8   : > { %v2179_v47 = vadd.f32 %v2156_v63, %v1936_v21 }
 0x1a9   : > { %v3601_v6 = vpop.f32.mrf.mxu1 }
 0x1aa   : > { %v2182_v23 = vadd.f32 %v3601_v6, %v1939_v56 }
 0x1ab   : > { %v2166_v14 = vpop.f32.mrf.mxu1 }
 0x1ac   : > { %v2181_v26 = vadd.f32 %v2166_v14, %v1938_v15  ;;  %v2761_v14 = vld [vmem:[%s4656_s3] sm:$0xff] }
 0x1ad   : > { %v3620_v39 = vpop.f32.mrf.mxu1  ;;  %3659 = vmatpush3.msra.mxu0 %v2761_v14 }
 0x1ae   : > { %v2422_v27 = vadd.f32 %v3620_v39, %v2176_v10 }
 0x1af   : > { %v2382_v61 = vpop.f32.mrf.mxu1 }
 0x1b0   : > { %v2421_v9 = vadd.f32 %v2382_v61, %v2175_v34 }
 0x1b1   : > { %v3623_v17 = vpop.f32.mrf.mxu1 }
 0x1b2   : > { %v2424_v53 = vadd.f32 %v3623_v17, %v2178_v46 }
 0x1b3   : > { %v2392_v41 = vpop.f32.mrf.mxu1 }
 0x1b4   : > { %v2423_v34 = vadd.f32 %v2392_v41, %v2177_v44  ;;  %v3553_v41 = vpop.f32.mrf.mxu0 }
 0x1b5   : > { %v3626_v49 = vpop.f32.mrf.mxu1 }
 0x1b6   : > { %v2426_v58 = vadd.f32 %v3626_v49, %v2180_v22  ;;  %v1781_v60 = vpop.f32.mrf.mxu0 }
 0x1b7   : > { %v2402_v43 = vpop.f32.mrf.mxu1 }
 0x1b8   : > { %v2425_v54 = vadd.f32 %v2402_v43, %v2179_v47  ;;  %v3556_v6 = vpop.f32.mrf.mxu0  ;;  %v1568_v47 = vadd.f32 %v4501_v16, %v4477_v45  ;;  %v4564_v45 = vld [vmem:[%s4655_s2] ss:$0 sm:$0xff]  ;;  %v1569_v16 = vadd.f32 %v4507_v48, %v4489_v4  ;;  %v4666_v48 = vld [vmem:[#allocation3_spill] sm:$0xff] }
 0x1b9   : > { %v3629_v36 = vpop.f32.mrf.mxu1 }
 0x1ba   : > { %v2428_v59 = vadd.f32 %v3629_v36, %v2182_v23  ;;  %v1791_v43 = vpop.f32.mrf.mxu0  ;;  %v1813_v15 = vadd.f32 %v3553_v41, %v1568_v47 }
 0x1bb   : > { %v2412_v11 = vpop.f32.mrf.mxu1 }
 0x1bc   : > { %v2427_v49 = vadd.f32 %v2412_v11, %v2181_v26  ;;  %v3559_v36 = vpop.f32.mrf.mxu0  ;;  %v4665_v26 = vld [vmem:[#allocation4_spill] sm:$0xff] }
 0x1bd   : > { %v3648_v37 = vpop.f32.mrf.mxu1 }
 0x1be   : > { %v2667_v40 = vadd.f32 %v3648_v37, %v2422_v27  ;;  %v4543_v10 = vpop.f32.mrf.mxu0 }
 0x1bf   : > { %v2627_v18 = vpop.f32.mrf.mxu1 }
 0x1c0   : > { %v2666_v33 = vadd.f32 %v2627_v18, %v2421_v9  ;;  %2684 = vrot.lane.b32.xlu0 %v2667_v40, %s3759_s23  ;;  %v3578_v11 = vpop.f32.mrf.mxu0 }
 0x1c1   : > { %v3651_v42 = vpop.f32.mrf.mxu1 }
 0x1c2   : > { %v2669_v27 = vadd.f32 %v3651_v42, %v2424_v53  ;;  %2682 = vrot.lane.b32.xlu1 %v2666_v33, %s3759_s23  ;;  %v2014_v24 = vpop.f32.mrf.mxu0 }
 0x1c3   : > { %v2637_v57 = vpop.f32.mrf.mxu1 }
 0x1c4   : > { %v2668_v39 = vadd.f32 %v2637_v57, %v2423_v34  ;;  %2688 = vrot.lane.b32.xlu0 %v2669_v27, %s3759_s23  ;;  %v3581_v29 = vpop.f32.mrf.mxu0  ;;  %v1566_v27 = vadd.f32 %v4497_v20, %v4473_v55  ;;  %v1570_v55 = vadd.f32 %v4505_v2, %v4483_v5  ;;  %v4664_v2 = vld [vmem:[#allocation2_spill] sm:$0xff] }
 0x1c5   : > { %v3654_v19 = vpop.f32.mrf.mxu1  ;;  %v2056_v12 = vadd.f32 %v3581_v29, %v1813_v15 }
 0x1c6   : > { %v2671_v61 = vadd.f32 %v3654_v19, %v2426_v58  ;;  %2686 = vrot.lane.b32.xlu1 %v2668_v39, %s3759_s23  ;;  %v2024_v32 = vpop.f32.mrf.mxu0  ;;  %v1811_v57 = vadd.f32 %v4519_v30, %v1566_v27  ;;  %v1810_v58 = vadd.f32 %v4527_v7, %v1565_v25  ;;  %v1567_v19 = vadd.f32 %v4503_v38, %v4479_v62 }
 0x1c7   : > { %v2647_v17 = vpop.f32.mrf.mxu1  ;;  %v1815_v62 = vadd.f32 %v3556_v6, %v1570_v55  ;;  %v1571_v6 = vadd.f32 %v4515_v31, %v4666_v48 }
 0x1c8   : > { %v2670_v35 = vadd.f32 %v2647_v17, %v2425_v54  ;;  %2692 = vrot.lane.b32.xlu0 %v2671_v61, %s3759_s23  ;;  %v3584_v37 = vpop.f32.mrf.mxu0  ;;  %v2054_v39 = vadd.f32 %v3578_v11, %v1811_v57  ;;  %v2053_v23 = vadd.f32 %v2014_v24, %v1810_v58  ;;  %v1812_v0 = vadd.f32 %v1781_v60, %v1567_v19 }
 0x1c9   : > { %v3657_v63 = vpop.f32.mrf.mxu1 }
 0x1ca   : > { %v2673_v50 = vadd.f32 %v3657_v63, %v2428_v59  ;;  %2690 = vrot.lane.b32.xlu1 %v2670_v35, %s3759_s23  ;;  %v2034_v8 = vpop.f32.mrf.mxu0  ;;  %v2055_v7 = vadd.f32 %v2024_v32, %v1812_v0  ;;  %v1572_v59 = vadd.f32 %v4665_v26, %v4664_v2  ;;  %v1814_v35 = vadd.f32 %v1791_v43, %v1569_v16 }
 0x1cb   : > { %v2657_v51 = vpop.f32.mrf.mxu1  ;;  %v1816_v32 = vadd.f32 %v4543_v10, %v1571_v6 }
 0x1cc   : > { %v2672_v28 = vadd.f32 %v2657_v51, %v2427_v49  ;;  %2696 = vrot.lane.b32.xlu0 %v2673_v50, %s3759_s23  ;;  %v3587_v46 = vpop.f32.mrf.mxu0  ;;  %v2058_v51 = vadd.f32 %v3584_v37, %v1815_v62  ;;  %v1817_v3 = vadd.f32 %v3559_v36, %v1572_v59  ;;  %v2057_v43 = vadd.f32 %v2034_v8, %v1814_v35 }
 0x1ce   : > { %2694 = vrot.lane.b32.xlu1 %v2672_v28, %s3759_s23  ;;  %v4545_v9 = vpop.f32.mrf.mxu0 }
 0x1d0   : > { %v3606_v40 = vpop.f32.mrf.mxu0 }
 0x1d1   : > { %v2300_v54 = vadd.f32 %v3606_v40, %v2054_v39 }
 0x1d2   : > { %v2260_v18 = vpop.f32.mrf.mxu0 }
 0x1d3   : > { %v2299_v30 = vadd.f32 %v2260_v18, %v2053_v23 }
 0x1d4   : > { %v3609_v52 = vpop.f32.mrf.mxu0 }
 0x1d5   : > { %v2302_v17 = vadd.f32 %v3609_v52, %v2056_v12  ;;  %v2060_v52 = vadd.f32 %v3587_v46, %v1817_v3 }
 0x1d6   : > { %v2270_v44 = vpop.f32.mrf.mxu0 }
 0x1d7   : > { %v2301_v60 = vadd.f32 %v2270_v44, %v2055_v7 }
 0x1d8   : > { %v3612_v53 = vpop.f32.mrf.mxu0 }
 0x1d9   : > { %v2304_v11 = vadd.f32 %v3612_v53, %v2058_v51 }
 0x1da   : > { %v2280_v33 = vpop.f32.mrf.mxu0 }
 0x1db   : > { %v2303_v44 = vadd.f32 %v2280_v33, %v2057_v43 }
 0x1dc   : > { %v3615_v13 = vpop.f32.mrf.mxu0 }
 0x1dd   : > { %v2306_v27 = vadd.f32 %v3615_v13, %v2060_v52 }
 0x1de   : > { %v4547_v42 = vpop.f32.mrf.mxu0 }
 0x1e0   : > { %v3634_v21 = vpop.f32.mrf.mxu0 }
 0x1e1   : > { %v2545_v61 = vadd.f32 %v3634_v21, %v2300_v54 }
 0x1e2   : > { %v2505_v22 = vpop.f32.mrf.mxu0 }
 0x1e3   : > { %v2544_v41 = vadd.f32 %v2505_v22, %v2299_v30 }
 0x1e4   : > { %v3637_v34 = vpop.f32.mrf.mxu0 }
 0x1e5   : > { %v2547_v28 = vadd.f32 %v3637_v34, %v2302_v17  ;;  %v2059_v34 = vadd.f32 %v4545_v9, %v1816_v32 }
 0x1e6   : > { %v2515_v56 = vpop.f32.mrf.mxu0 }
 0x1e7   : > { %v2546_v24 = vadd.f32 %v2515_v56, %v2301_v60  ;;  %v2305_v19 = vadd.f32 %v4547_v42, %v2059_v34 }
 0x1e8   : > { %v3640_v20 = vpop.f32.mrf.mxu0 }
 0x1e9   : > { %v2549_v21 = vadd.f32 %v3640_v20, %v2304_v11 }
 0x1ea   : > { %v2525_v63 = vpop.f32.mrf.mxu0 }
 0x1eb   : > { %v2548_v25 = vadd.f32 %v2525_v63, %v2303_v44 }
 0x1ec   : > { %v3643_v37 = vpop.f32.mrf.mxu0 }
 0x1ed   : > { %v2551_v9 = vadd.f32 %v3643_v37, %v2306_v27  ;;  %v2838_v37 = vld [vmem:[%s4659_s6] sm:$0x1] }
 0x1ee   : > { %v2535_v56 = vpop.f32.mrf.mxu0 }
 0x1ef   : > { %v2550_v20 = vadd.f32 %v2535_v56, %v2305_v19 }
 0x232   : > { %v2685_v38 = vpop.permute.xlu0 %2684 }
 0x233   : > { %v2707_v5 = vsel %vm365_vm2, %v2545_v61, %v2685_v38 }
 0x234   : > { %v4572_v49 = vadd.f32 %v4564_v45, %v2707_v5  ;;  %v2683_v50 = vpop.permute.xlu1 %2682 }
 0x235   : > { %v2706_v4 = vsel %vm365_vm2, %v2544_v41, %v2683_v50 }
 0x236   : > { %v4578_v14 = vadd.f32 %v4564_v45, %v2706_v4  ;;  %v2689_v1 = vpop.permute.xlu0 %2688  ;;  %v2730_v40 = vmax.f32 %v4572_v49, 0.0 }
 0x237   : > { %v2709_v29 = vsel %vm365_vm2, %v2547_v28, %v2689_v1 }
 0x238   : > { %v2729_v18 = vmax.f32 %v4578_v14, 0.0  ;;  %v4585_v31 = vadd.f32 %v4564_v45, %v2709_v29  ;;  %v2687_v36 = vpop.permute.xlu1 %2686  ;;  %v2739_v46 = vsel %vm2737_vm5, %v2730_v40, 0.0 }
 0x239   : > { %v2708_v8 = vsel %vm365_vm2, %v2546_v24, %v2687_v36 }
 0x23a   : > { %v2738_v53 = vsel %vm2737_vm5, %v2729_v18, 0.0  ;;  %v4592_v10 = vadd.f32 %v4564_v45, %v2708_v8  ;;  %v2693_v22 = vpop.permute.xlu0 %2692  ;;  %v2732_v33 = vmax.f32 %v4585_v31, 0.0 }
 0x23b   : > { %v2711_v57 = vsel %vm365_vm2, %v2549_v21, %v2693_v22  ;;  %v2740_v13 = vadd.f32 %v2739_v46, %v2738_v53  ;;  %v2921_v22 = vlaneseq }
 0x23c   : > { %v2731_v47 = vmax.f32 %v4592_v10, 0.0  ;;  %v4602_v58 = vadd.f32 %v4564_v45, %v2711_v57  ;;  %v2691_v39 = vpop.permute.xlu1 %2690  ;;  %v2743_v30 = vsel %vm2737_vm5, %v2732_v33, 0.0 }
 0x23d   : > { %v2710_v15 = vsel %vm365_vm2, %v2548_v25, %v2691_v39  ;;  %v2922_v34 = vshrl.u32 %v2921_v22, 7 }
 0x23e   : > { %v2741_v23 = vsel %vm2737_vm5, %v2731_v47, 0.0  ;;  %v2725_v54 = vadd.f32 %v4564_v45, %v2710_v15  ;;  %v2697_v55 = vpop.permute.xlu0 %2696  ;;  %v2734_v42 = vmax.f32 %v4602_v58, 0.0 }
 0x23f   : > { %v2742_v0 = vadd.f32 %v2741_v23, %v2740_v13  ;;  %v2713_v12 = vsel %vm365_vm2, %v2551_v9, %v2697_v55  ;;  %v2923_v27 = vsub.s32 0, %v2922_v34 }
 0x240   : > { %v2733_v61 = vmax.f32 %v2725_v54, 0.0  ;;  %v2728_v16 = vadd.f32 %v4564_v45, %v2713_v12  ;;  %v2695_v62 = vpop.permute.xlu1 %2694  ;;  %v2747_v2 = vsel %vm2737_vm5, %v2734_v42, 0.0 }
 0x241   : > { %v2744_v38 = vadd.f32 %v2743_v30, %v2742_v0  ;;  %v2712_v7 = vsel %vm365_vm2, %v2550_v20, %v2695_v62 }
 0x242   : > { %v2745_v17 = vsel %vm2737_vm5, %v2733_v61, 0.0  ;;  %v2727_v41 = vadd.f32 %v4564_v45, %v2712_v7  ;;  %v2736_v26 = vmax.f32 %v2728_v16, 0.0  ;;  %v2762_v45 = vld [vmem:[%s4657_s4] sm:$0x1] }
 0x243   : > { %v2746_v5 = vadd.f32 %v2745_v17, %v2744_v38 }
 0x244   : > { %v2735_v59 = vmax.f32 %v2727_v41, 0.0  ;;  %v2751_v51 = vsel %vm2737_vm5, %v2736_v26, 0.0 }
 0x245   : > { %v2748_v35 = vadd.f32 %v2747_v2, %v2746_v5 }
 0x246   : > { %v2749_v63 = vsel %vm2737_vm5, %v2735_v59, 0.0 }
 0x247   : > { %v2750_v50 = vadd.f32 %v2749_v63, %v2748_v35 }
 0x249   : > { %v2752_v60 = vadd.f32 %v2751_v51, %v2750_v50 }
 0x24b   : > { %v2753_v28 = vrot.slane %v2752_v60, 4 }
 0x24d   : > { %v2754_v4 = vadd.f32 %v2753_v28, %v2752_v60 }
 0x24f   : > { %v2755_v48 = vrot.slane %v2754_v4, 2 }
 0x251   : > { %v2756_v6 = vadd.f32 %v2755_v48, %v2754_v4 }
 0x253   : > { %v2757_v3 = vrot.slane %v2756_v6, 1 }
 0x255   : > { %v2758_v1 = vadd.f32 %v2757_v3, %v2756_v6 }
 0x257   : > { %v2760_v43 = vmul.f32 0.015625, %v2758_v1 }
 0x259   : > { %3661 = vmatmul.mubr.msk.f32.vlgmr.msra.gmra.mxu0 %vm2737_vm5, %v2760_v43 }
 0x319   : > { %v2832_v11 = vpop.f32.mrf.mxu0 }
 0x31a   : > { %v2833_v24 = vadd.f32 %v2832_v11, %v2762_v45 }
 0x31b   : > { %v3662_v29 = vpop.f32.mrf.mxu0 }
 0x31c   : > { %v2836_v32 = vmax.f32 %v2833_v24, 0.0 }
 0x31e   : > { %3666 = vmatmul.mubr.msk.f32.vlgmr.msra.gmra.mxu1 %vm365_vm2, %v2836_v32 }
 0x3de   : > { %v2911_v36 = vpop.f32.mrf.mxu1 }
 0x3df   : > { %v2912_v52 = vadd.f32 %v2911_v36, %v2838_v37 }
 0x3e0   : > { %v3667_v44 = vpop.f32.mrf.mxu1 }
 0x3e1   : > { %v3220_v21 = vmul.f32 -1.442695, %v2912_v52 }
 0x3e3   : > { %3746 = vpow2.f32 %v3220_v21 }
 0x3f0   : > { %v3747_v8 = vpop.eup %3746 }
 0x3f1   : > { %v2918_v53 = vadd.f32 1.0, %v3747_v8 }
 0x3f3   : > { %3748 = vrcp.f32 %v2918_v53 }
 0x400   : > { %v3749_v25 = vpop.eup %3748 }
 0x401   : > { %v2924_v57 = vrot.slane %v3749_v25, %v2923_v27 }
 0x403   : > { %v2925_v56 = vmul.f32 %v2924_v57, %v2729_v18  ;;  %v2926_v46 = vmul.f32 %v2924_v57, %v2730_v40  ;;  %v2927_v58 = vmul.f32 %v2924_v57, %v2731_v47  ;;  %v2928_v39 = vmul.f32 %v2924_v57, %v2732_v33 }
 0x404   : > { %v2929_v19 = vmul.f32 %v2924_v57, %v2733_v61  ;;  %v2930_v9 = vmul.f32 %v2924_v57, %v2734_v42  ;;  %v2931_v13 = vmul.f32 %v2924_v57, %v2735_v59  ;;  %v2932_v15 = vmul.f32 %v2924_v57, %v2736_v26 }
 0x405   : > { %v3232_v23 = vpack.c.bf16 %v2925_v56, %v2925_v56  ;;  %v3233_v14 = vpack.c.bf16 %v2926_v46, %v2926_v46  ;;  %v3234_v18 = vpack.c.bf16 %v2927_v58, %v2927_v58  ;;  %v3235_v54 = vpack.c.bf16 %v2928_v39, %v2928_v39 }
 0x406   : > { %v3236_v49 = vpack.c.bf16 %v2929_v19, %v2929_v19  ;;  %v3237_v40 = vpack.c.bf16 %v2930_v9, %v2930_v9  ;;  %v3238_v55 = vpack.c.bf16 %v2931_v13, %v2931_v13  ;;  %v3239_v10 = vpack.c.bf16 %v2932_v15, %v2932_v15 }
 0x407   : > { %2966 = vst.msk [vmem:[%s278_s16] sm:$0xf] %vm2965_vm6, %v3232_v23  ;;  %2967 = vst.msk [vmem:[%s278_s16 + $0x4] sm:$0xf] %vm2965_vm6, %v3233_v14 }
 0x408   : > { %2968 = vst.msk [vmem:[%s278_s16 + $0x8] sm:$0xf] %vm2965_vm6, %v3234_v18  ;;  %2969 = vst.msk [vmem:[%s278_s16 + $0xc] sm:$0xf] %vm2965_vm6, %v3235_v54 }
 0x409   : > { %2970 = vst.msk [vmem:[%s278_s16 + $0x10] sm:$0xf] %vm2965_vm6, %v3236_v49  ;;  %2971 = vst.msk [vmem:[%s278_s16 + $0x14] sm:$0xf] %vm2965_vm6, %v3237_v40 }
 0x40a   : > { %2972 = vst.msk [vmem:[%s278_s16 + $0x18] sm:$0xf] %vm2965_vm6, %v3238_v55  ;;  %2973 = vst.msk [vmem:[%s278_s16 + $0x1c] sm:$0xf] %vm2965_vm6, %v3239_v10 }
 0x40b PF: > { %s17_s24 = sadd.s32 1, %s3756_s24  }
 0x40c   : > { %p14_p4 = scmp.ge.s32.totalorder %s17_s24, 4  }
 0x40e   :  { %16 = sbr.rel (!%p14_p4) target bundleno = 1 (0x1), region = 95 }

</bundles_post_ra>
